<compile_context>
chip_gen: v6e
topology: v6e:2x2x1
jax: 0.10.0
libtpu: 0.0.40
codegen_flags: <defaults>
</compile_context>

<pallas_src>
import functools

import jax
import jax.numpy as jnp
from jax.experimental import pallas as pl
from jax.experimental.pallas import tpu as pltpu


def _round_up(v, m):
    return (v + m - 1) // m * m


def _choose_tiles(N, tm=None, tk=None):
    """Pick (Np, tm, tk) so that tm | tk | Np and all are multiples of 128."""
    Np0 = _round_up(N, 128)
    tm = 256 if tm is None else tm
    tm = min(_round_up(tm, 128), Np0)
    tk = 2048 if tk is None else tk
    tk = min(_round_up(tk, tm), _round_up(Np0, tm))
    Np = _round_up(Np0, tk)
    return Np, tm, tk


def _gcn_layer_kernel(x_rows_ref, adj_ref, xn_cols_ref, w_self_ref, b_ref,
                      invdeg_ref, out_ref, acc_ref, *, activation, valid_cols):
    """One grid step of a gridded GCN layer.

    grid = (row tiles, reduce tiles), reduce axis last.  acc_ref accumulates
    the neighbor aggregate adj01_tile @ Xn_tile (pre-projected neighbor
    features) in f32.  On the last reduce step the self-term matmul runs,
    the aggregate is scaled by the f32 per-row inverse degree ('mean'),
    the bias is added, and relu (layer 1) or masked log_softmax (layer 2)
    produces the lane-dense output tile.
    """
    k = pl.program_id(1)

    @pl.when(k == 0)
    def _():
        acc_ref[...] = jnp.zeros_like(acc_ref)

    # neighbor aggregation on pre-projected features:
    # (tm, tk) bf16 @ (tk, outp) bf16, f32 accumulate
    acc_ref[...] += jnp.dot(adj_ref[...], xn_cols_ref[...],
                            preferred_element_type=jnp.float32)

    @pl.when(k == pl.num_programs(1) - 1)
    def _():
        # self term: (tm, Fin) bf16 @ (Fin, outp) bf16, f32 accumulate.
        z = jnp.dot(x_rows_ref[...], w_self_ref[...],
                    preferred_element_type=jnp.float32)
        # exact 0/1 aggregate scaled by f32 per-row inv_deg, plus bias.
        z = z + invdeg_ref[...] * acc_ref[...] + b_ref[...]
        if activation == "relu":
            out_ref[...] = jnp.maximum(z, 0.0).astype(out_ref.dtype)
        else:  # log_softmax over the real (unpadded) class columns
            col = jax.lax.broadcasted_iota(jnp.int32, z.shape, 1)
            z = jnp.where(col < valid_cols, z, -1e30)
            m = jnp.max(z, axis=1, keepdims=True)
            zc = z - m
            lse = jnp.log(jnp.sum(jnp.exp(zc), axis=1, keepdims=True))
            out_ref[...] = (zc - lse).astype(out_ref.dtype)


def _gcn_layer(x_rows, adj, xn, w_self, b, inv_deg, *, activation, valid_cols,
               out_dtype, tm, tk):
    Np, Fin = x_rows.shape
    outp = w_self.shape[1]
    grid = (Np // tm, Np // tk)

    kernel = functools.partial(_gcn_layer_kernel, activation=activation,
                               valid_cols=valid_cols)

    flops = int(2 * Np * Np * outp + 2 * Np * Fin * outp)
    transcendentals = int(Np * outp) if activation != "relu" else 0
    bytes_accessed = int(
        adj.size * adj.dtype.itemsize                          # adjacency stream
        + (Np // tm) * xn.size * xn.dtype.itemsize             # Xn re-streamed per row tile
        + x_rows.size * x_rows.dtype.itemsize
        + w_self.size * w_self.dtype.itemsize
        + Np * outp * jnp.dtype(out_dtype).itemsize
        + inv_deg.size * 4 + b.size * 4)

    return pl.pallas_call(
        kernel,
        out_shape=jax.ShapeDtypeStruct((Np, outp), out_dtype),
        grid_spec=pltpu.PrefetchScalarGridSpec(
            num_scalar_prefetch=0,
            grid=grid,
            in_specs=[
                pl.BlockSpec((tm, Fin), lambda i, k: (i, 0)),    # self rows (bf16)
                pl.BlockSpec((tm, tk), lambda i, k: (i, k)),     # 0/1 adjacency tile (bf16)
                pl.BlockSpec((tk, outp), lambda i, k: (k, 0)),   # pre-projected neighbor rows
                pl.BlockSpec((Fin, outp), lambda i, k: (0, 0)),  # self-weight (bf16)
                pl.BlockSpec((1, outp), lambda i, k: (0, 0)),    # bias (f32)
                pl.BlockSpec((tm, 1), lambda i, k: (i, 0)),      # per-row inv_deg (f32)
            ],
            out_specs=pl.BlockSpec((tm, outp), lambda i, k: (i, 0)),
            scratch_shapes=[pltpu.VMEM((tm, outp), jnp.float32)],
        ),
        compiler_params=pltpu.CompilerParams(
            dimension_semantics=("parallel", "arbitrary"),
            vmem_limit_bytes=48 * 1024 * 1024,
        ),
        cost_estimate=pl.CostEstimate(
            flops=flops, transcendentals=transcendentals,
            bytes_accessed=bytes_accessed),
    )(x_rows, adj, xn, w_self, b, inv_deg)


@functools.partial(jax.jit, static_argnames=("reduction_type", "tm", "tk"))
def p1gcn0_forward(x, edge_index, params, *, reduction_type="mean",
                   tm=None, tk=None):
    if reduction_type not in ("sum", "mean"):
        raise ValueError("reduction_type must be 'sum' or 'mean'")
    N, F = x.shape
    w1s, w1n, b1, w2s, w2n, b2 = params
    H = w1s.shape[1]
    C = w2s.shape[1]

    Np, tm, tk = _choose_tiles(N, tm, tk)
    Fp = _round_up(F, 128)
    Hp = _round_up(H, 128)
    Cp = _round_up(C, 128)

    # ---- graph: exact 0/1 adjacency (bf16) + f32 inverse degree -------------
    # TODO(synk): in a training loop, hoist this graph build out of the
    # per-forward jit and cache (adj, inv_deg) across calls.
    src = edge_index[0]
    dst = edge_index[1]
    adj = jnp.zeros((Np, Np), jnp.bfloat16)
    adj = adj.at[dst, src].set(1.0)   # NOTE: deduplicates repeated edges
    ids = jnp.arange(N)
    adj = adj.at[ids, ids].set(1.0)   # node's own atom (gather over N(i) u {i})
    if reduction_type == "mean":
        # 0/1 entries are exact in bf16; accumulate degrees in f32 (exact ints).
        deg = jnp.sum(adj, axis=1, dtype=jnp.float32, keepdims=True)
        inv_deg = 1.0 / jnp.maximum(deg, 1.0)
    else:
        inv_deg = jnp.ones((Np, 1), jnp.float32)

    # ---- lane-pad features / weights to multiples of 128 --------------------
    xp = jnp.zeros((Np, Fp), jnp.bfloat16).at[:N, :F].set(x.astype(jnp.bfloat16))
    w1s_p = jnp.zeros((Fp, Hp), jnp.bfloat16).at[:F, :H].set(w1s.astype(jnp.bfloat16))
    w1n_p = jnp.zeros((Fp, Hp), jnp.bfloat16).at[:F, :H].set(w1n.astype(jnp.bfloat16))
    b1_p = jnp.zeros((1, Hp), jnp.float32).at[:, :H].set(b1)
    w2s_p = jnp.zeros((Hp, Cp), jnp.bfloat16).at[:H, :C].set(w2s.astype(jnp.bfloat16))
    w2n_p = jnp.zeros((Hp, Cp), jnp.bfloat16).at[:H, :C].set(w2n.astype(jnp.bfloat16))
    b2_p = jnp.zeros((1, Cp), jnp.float32).at[:, :C].set(b2)

    # ---- layer 1: pre-project neighbor features, then aggregate + fuse ------
    # D^-1 (A (X Wn)) == (D^-1 A X) Wn, so pre-projection is exact math-wise
    # and shrinks the streamed/aggregated width from Fp to Hp.
    xn1 = jnp.dot(xp, w1n_p, preferred_element_type=jnp.float32).astype(jnp.bfloat16)
    # TODO(synk): ptens.modules.Dropout(prob=0.5) treated as eval-mode identity.
    h = _gcn_layer(xp, adj, xn1, w1s_p, b1_p, inv_deg,
                   activation="relu", valid_cols=Hp, out_dtype=jnp.bfloat16,
                   tm=tm, tk=tk)

    # ---- layer 2 + log_softmax (linmaps0/linmaps1 identities, 1-atom domains)
    hn2 = jnp.dot(h, w2n_p, preferred_element_type=jnp.float32).astype(jnp.bfloat16)
    out = _gcn_layer(h, adj, hn2, w2s_p, b2_p, inv_deg,
                     activation="log_softmax", valid_cols=C,
                     out_dtype=jnp.float32, tm=tm, tk=tk)
    return out[:N, :C]


def p1gcn0_reference(x, edge_index, params, *, reduction_type="mean"):
    """Pure-JAX f32 reference for correctness checking."""
    N, _ = x.shape
    w1s, w1n, b1, w2s, w2n, b2 = params
    src, dst = edge_index[0], edge_index[1]
    adj = jnp.zeros((N, N), jnp.float32).at[dst, src].set(1.0)
    ids = jnp.arange(N)
    adj = adj.at[ids, ids].set(1.0)
    if reduction_type == "mean":
        deg = jnp.sum(adj, axis=1, keepdims=True)
        adj = adj / jnp.maximum(deg, 1.0)
    h = jnp.maximum(x @ w1s + (adj @ x) @ w1n + b1, 0.0)
    logits = h @ w2s + (adj @ h) @ w2n + b2
    return jax.nn.log_softmax(logits, axis=1)


def init_params(key, num_features, hidden_channels, num_classes):
    """conv1.lin: Linear(2F -> H), conv2.lin: Linear(2H -> C); each weight is
    stored split into its 'self' and 'neighbor-aggregate' halves."""
    k1, k2, k3, k4 = jax.random.split(key, 4)
    s1 = 1.0 / jnp.sqrt(2.0 * num_features)
    s2 = 1.0 / jnp.sqrt(2.0 * hidden_channels)
    w1s = jax.random.uniform(k1, (num_features, hidden_channels), jnp.float32, -s1, s1)
    w1n = jax.random.uniform(k2, (num_features, hidden_channels), jnp.float32, -s1, s1)
    b1 = jnp.zeros((1, hidden_channels), jnp.float32)
    w2s = jax.random.uniform(k3, (hidden_channels, num_classes), jnp.float32, -s2, s2)
    w2n = jax.random.uniform(k4, (hidden_channels, num_classes), jnp.float32, -s2, s2)
    b2 = jnp.zeros((1, num_classes), jnp.float32)
    return (w1s, w1n, b1, w2s, w2n, b2)


if __name__ == "__main__":
    # Small synthetic "PubMed-like" instance (big enough to exercise the grid).
    N = 512           # nodes
    F = 16            # num_features (padded to 128 in the wrapper)
    H = 32            # hidden_channels (padded to 128)
    C = 8             # num_classes (padded to 128, masked in log_softmax)
    E = 2048          # directed edges

    key = jax.random.PRNGKey(0)
    kx, ke, kp = jax.random.split(key, 3)

    x = jnp.abs(jax.random.normal(kx, (N, F), jnp.float32))
    # row-normalized features (NormalizeFeatures transform analogue)
    x = x / jnp.maximum(jnp.sum(x, axis=1, keepdims=True), 1e-6)

    edge_index = jax.random.randint(ke, (2, E), 0, N, dtype=jnp.int32)

    params = init_params(kp, F, H, C)

    ref = p1gcn0_reference(x, edge_index, params, reduction_type="mean")

    # Default (large) tiles: grid (Np/256, 1).
    out = p1gcn0_forward(x, edge_index, params, reduction_type="mean")
    out = jax.block_until_ready(out)
    assert out.shape == (N, C)
    # rows of log_softmax must exponentiate-sum to 1
    assert bool(jnp.allclose(jnp.sum(jnp.exp(out), axis=1), 1.0, atol=1e-4))
    # match the pure-JAX f32 reference (bf16 MXU operands -> loose tolerance)
    assert bool(jnp.allclose(out, ref, atol=5e-2)), float(jnp.max(jnp.abs(out - ref)))

    # Small tiles to exercise the full (row, reduce) grid: grid (4, 4).
    out_t = p1gcn0_forward(x, edge_index, params, reduction_type="mean",
                           tm=128, tk=128)
    out_t = jax.block_until_ready(out_t)
    assert bool(jnp.allclose(out_t, ref, atol=5e-2)), float(jnp.max(jnp.abs(out_t - ref)))

    print("KERNEL_OK")
</pallas_src>

<mosaic_0001>
module attributes {stable_mosaic.version = 11 : i64} {
  func.func @_gcn_layer_kernel(%arg0: i32, %arg1: i32, %arg2: memref<256x128xbf16, #tpu.memory_space<vmem>>, %arg3: memref<256x512xbf16, #tpu.memory_space<vmem>>, %arg4: memref<512x128xbf16, #tpu.memory_space<vmem>>, %arg5: memref<128x128xbf16, #tpu.memory_space<vmem>>, %arg6: memref<1x128xf32, #tpu.memory_space<vmem>>, %arg7: memref<256x1xf32, #tpu.memory_space<vmem>>, %arg8: memref<256x128xbf16, #tpu.memory_space<vmem>>, %arg9: memref<256x128xf32, #tpu.memory_space<vmem>>) attributes {dimension_semantics = [#tpu.dimension_semantics<parallel>, #tpu.dimension_semantics<arbitrary>], iteration_bounds = array<i64: 2, 1>, scalar_prefetch = 0 : i64, scratch_operands = 1 : i64, tpu.core_type = #tpu.core_type<tc>, window_params = [{transform_indices = @transform_0, window_bounds = array<i64: 256, 128>}, {transform_indices = @transform_1, window_bounds = array<i64: 256, 512>}, {transform_indices = @transform_2, window_bounds = array<i64: 512, 128>}, {pipeline_mode = #tpu.pipeline_mode<synchronous>, transform_indices = @transform_3, window_bounds = array<i64: 128, 128>}, {pipeline_mode = #tpu.pipeline_mode<synchronous>, transform_indices = @transform_4, window_bounds = array<i64: 1, 128>}, {transform_indices = @transform_5, window_bounds = array<i64: 256, 1>}, {transform_indices = @transform_6, window_bounds = array<i64: 256, 128>}]} {
    %c0_i32 = arith.constant 0 : i32
    %0 = arith.cmpi eq, %arg1, %c0_i32 : i32
    %1 = arith.extui %0 : i1 to i32
    %c0_i32_0 = arith.constant 0 : i32
    %2 = arith.cmpi ne, %1, %c0_i32_0 : i32
    scf.if %2 {
      %cst_10 = arith.constant 0.000000e+00 : f32
      %12 = vector.broadcast %cst_10 : f32 to vector<256x128xf32>
      %c0_11 = arith.constant 0 : index
      %c0_12 = arith.constant 0 : index
      %13 = vector.load %arg9[%c0_11, %c0_12] : memref<256x128xf32, #tpu.memory_space<vmem>>, vector<256x128xf32>
      tpu.vector_store %arg9[%c0_11, %c0_12], %12 {strides = array<i32>} : memref<256x128xf32, #tpu.memory_space<vmem>>, vector<256x128xf32>,
    } else {
    }
    %c0 = arith.constant 0 : index
    %c0_1 = arith.constant 0 : index
    %3 = vector.load %arg9[%c0, %c0_1] : memref<256x128xf32, #tpu.memory_space<vmem>>, vector<256x128xf32>
    %c0_2 = arith.constant 0 : index
    %c0_3 = arith.constant 0 : index
    %4 = vector.load %arg3[%c0_2, %c0_3] : memref<256x512xbf16, #tpu.memory_space<vmem>>, vector<256x512xbf16>
    %c0_4 = arith.constant 0 : index
    %c0_5 = arith.constant 0 : index
    %5 = vector.load %arg4[%c0_4, %c0_5] : memref<512x128xbf16, #tpu.memory_space<vmem>>, vector<512x128xbf16>
    %cst = arith.constant dense<0.000000e+00> : vector<256x128xf32>
    %6 = tpu.matmul %4, %5, %cst {dimension_numbers = #tpu.dot_dimension_numbers<[1], [0], [0], [1], [0, 0, 1, 1], [], []>} : vector<256x512xbf16>, vector<512x128xbf16>, vector<256x128xf32> -> vector<256x128xf32>
    %7 = arith.addf %3, %6 : vector<256x128xf32>
    %c0_6 = arith.constant 0 : index
    %c0_7 = arith.constant 0 : index
    %8 = vector.load %arg9[%c0_6, %c0_7] : memref<256x128xf32, #tpu.memory_space<vmem>>, vector<256x128xf32>
    tpu.vector_store %arg9[%c0_6, %c0_7], %7 {strides = array<i32>} : memref<256x128xf32, #tpu.memory_space<vmem>>, vector<256x128xf32>,
    %c0_i32_8 = arith.constant 0 : i32
    %9 = arith.cmpi eq, %arg1, %c0_i32_8 : i32
    %10 = arith.extui %9 : i1 to i32
    %c0_i32_9 = arith.constant 0 : i32
    %11 = arith.cmpi ne, %10, %c0_i32_9 : i32
    scf.if %11 {
      %c0_10 = arith.constant 0 : index
      %c0_11 = arith.constant 0 : index
      %12 = vector.load %arg2[%c0_10, %c0_11] : memref<256x128xbf16, #tpu.memory_space<vmem>>, vector<256x128xbf16>
      %c0_12 = arith.constant 0 : index
      %c0_13 = arith.constant 0 : index
      %13 = vector.load %arg5[%c0_12, %c0_13] : memref<128x128xbf16, #tpu.memory_space<vmem>>, vector<128x128xbf16>
      %cst_14 = arith.constant dense<0.000000e+00> : vector<256x128xf32>
      %14 = tpu.matmul %12, %13, %cst_14 {dimension_numbers = #tpu.dot_dimension_numbers<[1], [0], [0], [1], [0, 0, 1, 1], [], []>} : vector<256x128xbf16>, vector<128x128xbf16>, vector<256x128xf32> -> vector<256x128xf32>
      %c0_15 = arith.constant 0 : index
      %c0_16 = arith.constant 0 : index
      %15 = vector.load %arg7[%c0_15, %c0_16] : memref<256x1xf32, #tpu.memory_space<vmem>>, vector<256x1xf32>
      %c0_17 = arith.constant 0 : index
      %c0_18 = arith.constant 0 : index
      %16 = vector.load %arg9[%c0_17, %c0_18] : memref<256x128xf32, #tpu.memory_space<vmem>>, vector<256x128xf32>
      %17 = vector.broadcast %15 : vector<256x1xf32> to vector<256x128xf32>
      %18 = arith.mulf %17, %16 : vector<256x128xf32>
      %19 = arith.addf %14, %18 : vector<256x128xf32>
      %c0_19 = arith.constant 0 : index
      %c0_20 = arith.constant 0 : index
      %20 = vector.load %arg6[%c0_19, %c0_20] : memref<1x128xf32, #tpu.memory_space<vmem>>, vector<1x128xf32>
      %21 = vector.broadcast %20 : vector<1x128xf32> to vector<256x128xf32>
      %22 = arith.addf %19, %21 : vector<256x128xf32>
      %cst_21 = arith.constant 0.000000e+00 : f32
      %23 = vector.broadcast %cst_21 : f32 to vector<256x128xf32>
      %24 = arith.maximumf %22, %23 : vector<256x128xf32>
      %25 = arith.truncf %24 : vector<256x128xf32> to vector<256x128xbf16>
      %c0_22 = arith.constant 0 : index
      %c0_23 = arith.constant 0 : index
      %26 = vector.load %arg8[%c0_22, %c0_23] : memref<256x128xbf16, #tpu.memory_space<vmem>>, vector<256x128xbf16>
      tpu.vector_store %arg8[%c0_22, %c0_23], %25 {strides = array<i32>} : memref<256x128xbf16, #tpu.memory_space<vmem>>, vector<256x128xbf16>,
    } else {
    }
    return
  }
  func.func @transform_0(%arg0: i32, %arg1: i32) -> (i32, i32) {
    %c0_i32 = arith.constant 0 : i32
    %c0_i32_0 = arith.constant 0 : i32
    return %arg0, %c0_i32 : i32, i32
  }
  func.func @transform_1(%arg0: i32, %arg1: i32) -> (i32, i32) {
    %c0_i32 = arith.constant 0 : i32
    return %arg0, %arg1 : i32, i32
  }
  func.func @transform_2(%arg0: i32, %arg1: i32) -> (i32, i32) {
    %c0_i32 = arith.constant 0 : i32
    %c0_i32_0 = arith.constant 0 : i32
    return %arg1, %c0_i32 : i32, i32
  }
  func.func @transform_3(%arg0: i32, %arg1: i32) -> (i32, i32) {
    %c0_i32 = arith.constant 0 : i32
    %c0_i32_0 = arith.constant 0 : i32
    %c0_i32_1 = arith.constant 0 : i32
    return %c0_i32, %c0_i32_0 : i32, i32
  }
  func.func @transform_4(%arg0: i32, %arg1: i32) -> (i32, i32) {
    %c0_i32 = arith.constant 0 : i32
    %c0_i32_0 = arith.constant 0 : i32
    %c0_i32_1 = arith.constant 0 : i32
    return %c0_i32, %c0_i32_0 : i32, i32
  }
  func.func @transform_5(%arg0: i32, %arg1: i32) -> (i32, i32) {
    %c0_i32 = arith.constant 0 : i32
    %c0_i32_0 = arith.constant 0 : i32
    return %arg0, %c0_i32 : i32, i32
  }
  func.func @transform_6(%arg0: i32, %arg1: i32) -> (i32, i32) {
    %c0_i32 = arith.constant 0 : i32
    %c0_i32_0 = arith.constant 0 : i32
    return %arg0, %c0_i32 : i32, i32
  }
}

module attributes {stable_mosaic.version = 11 : i64} {
  func.func @_gcn_layer_kernel(%arg0: i32, %arg1: i32, %arg2: memref<256x128xbf16, #tpu.memory_space<vmem>>, %arg3: memref<256x512xbf16, #tpu.memory_space<vmem>>, %arg4: memref<512x128xbf16, #tpu.memory_space<vmem>>, %arg5: memref<128x128xbf16, #tpu.memory_space<vmem>>, %arg6: memref<1x128xf32, #tpu.memory_space<vmem>>, %arg7: memref<256x1xf32, #tpu.memory_space<vmem>>, %arg8: memref<256x128xf32, #tpu.memory_space<vmem>>, %arg9: memref<256x128xf32, #tpu.memory_space<vmem>>) attributes {dimension_semantics = [#tpu.dimension_semantics<parallel>, #tpu.dimension_semantics<arbitrary>], iteration_bounds = array<i64: 2, 1>, scalar_prefetch = 0 : i64, scratch_operands = 1 : i64, tpu.core_type = #tpu.core_type<tc>, window_params = [{transform_indices = @transform_0, window_bounds = array<i64: 256, 128>}, {transform_indices = @transform_1, window_bounds = array<i64: 256, 512>}, {transform_indices = @transform_2, window_bounds = array<i64: 512, 128>}, {pipeline_mode = #tpu.pipeline_mode<synchronous>, transform_indices = @transform_3, window_bounds = array<i64: 128, 128>}, {pipeline_mode = #tpu.pipeline_mode<synchronous>, transform_indices = @transform_4, window_bounds = array<i64: 1, 128>}, {transform_indices = @transform_5, window_bounds = array<i64: 256, 1>}, {transform_indices = @transform_6, window_bounds = array<i64: 256, 128>}]} {
    %c0_i32 = arith.constant 0 : i32
    %0 = arith.cmpi eq, %arg1, %c0_i32 : i32
    %1 = arith.extui %0 : i1 to i32
    %c0_i32_0 = arith.constant 0 : i32
    %2 = arith.cmpi ne, %1, %c0_i32_0 : i32
    scf.if %2 {
      %cst_10 = arith.constant 0.000000e+00 : f32
      %12 = vector.broadcast %cst_10 : f32 to vector<256x128xf32>
      %c0_11 = arith.constant 0 : index
      %c0_12 = arith.constant 0 : index
      %13 = vector.load %arg9[%c0_11, %c0_12] : memref<256x128xf32, #tpu.memory_space<vmem>>, vector<256x128xf32>
      tpu.vector_store %arg9[%c0_11, %c0_12], %12 {strides = array<i32>} : memref<256x128xf32, #tpu.memory_space<vmem>>, vector<256x128xf32>,
    } else {
    }
    %c0 = arith.constant 0 : index
    %c0_1 = arith.constant 0 : index
    %3 = vector.load %arg9[%c0, %c0_1] : memref<256x128xf32, #tpu.memory_space<vmem>>, vector<256x128xf32>
    %c0_2 = arith.constant 0 : index
    %c0_3 = arith.constant 0 : index
    %4 = vector.load %arg3[%c0_2, %c0_3] : memref<256x512xbf16, #tpu.memory_space<vmem>>, vector<256x512xbf16>
    %c0_4 = arith.constant 0 : index
    %c0_5 = arith.constant 0 : index
    %5 = vector.load %arg4[%c0_4, %c0_5] : memref<512x128xbf16, #tpu.memory_space<vmem>>, vector<512x128xbf16>
    %cst = arith.constant dense<0.000000e+00> : vector<256x128xf32>
    %6 = tpu.matmul %4, %5, %cst {dimension_numbers = #tpu.dot_dimension_numbers<[1], [0], [0], [1], [0, 0, 1, 1], [], []>} : vector<256x512xbf16>, vector<512x128xbf16>, vector<256x128xf32> -> vector<256x128xf32>
    %7 = arith.addf %3, %6 : vector<256x128xf32>
    %c0_6 = arith.constant 0 : index
    %c0_7 = arith.constant 0 : index
    %8 = vector.load %arg9[%c0_6, %c0_7] : memref<256x128xf32, #tpu.memory_space<vmem>>, vector<256x128xf32>
    tpu.vector_store %arg9[%c0_6, %c0_7], %7 {strides = array<i32>} : memref<256x128xf32, #tpu.memory_space<vmem>>, vector<256x128xf32>,
    %c0_i32_8 = arith.constant 0 : i32
    %9 = arith.cmpi eq, %arg1, %c0_i32_8 : i32
    %10 = arith.extui %9 : i1 to i32
    %c0_i32_9 = arith.constant 0 : i32
    %11 = arith.cmpi ne, %10, %c0_i32_9 : i32
    scf.if %11 {
      %c0_10 = arith.constant 0 : index
      %c0_11 = arith.constant 0 : index
      %12 = vector.load %arg2[%c0_10, %c0_11] : memref<256x128xbf16, #tpu.memory_space<vmem>>, vector<256x128xbf16>
      %c0_12 = arith.constant 0 : index
      %c0_13 = arith.constant 0 : index
      %13 = vector.load %arg5[%c0_12, %c0_13] : memref<128x128xbf16, #tpu.memory_space<vmem>>, vector<128x128xbf16>
      %cst_14 = arith.constant dense<0.000000e+00> : vector<256x128xf32>
      %14 = tpu.matmul %12, %13, %cst_14 {dimension_numbers = #tpu.dot_dimension_numbers<[1], [0], [0], [1], [0, 0, 1, 1], [], []>} : vector<256x128xbf16>, vector<128x128xbf16>, vector<256x128xf32> -> vector<256x128xf32>
      %c0_15 = arith.constant 0 : index
      %c0_16 = arith.constant 0 : index
      %15 = vector.load %arg7[%c0_15, %c0_16] : memref<256x1xf32, #tpu.memory_space<vmem>>, vector<256x1xf32>
      %c0_17 = arith.constant 0 : index
      %c0_18 = arith.constant 0 : index
      %16 = vector.load %arg9[%c0_17, %c0_18] : memref<256x128xf32, #tpu.memory_space<vmem>>, vector<256x128xf32>
      %17 = vector.broadcast %15 : vector<256x1xf32> to vector<256x128xf32>
      %18 = arith.mulf %17, %16 : vector<256x128xf32>
      %19 = arith.addf %14, %18 : vector<256x128xf32>
      %c0_19 = arith.constant 0 : index
      %c0_20 = arith.constant 0 : index
      %20 = vector.load %arg6[%c0_19, %c0_20] : memref<1x128xf32, #tpu.memory_space<vmem>>, vector<1x128xf32>
      %21 = vector.broadcast %20 : vector<1x128xf32> to vector<256x128xf32>
      %22 = arith.addf %19, %21 : vector<256x128xf32>
      %23 = tpu.iota {dimensions = array<i32: 1>} : vector<256x128xi32>
      %c8_i32 = arith.constant 8 : i32
      %24 = vector.broadcast %c8_i32 : i32 to vector<256x128xi32>
      %25 = arith.cmpi slt, %23, %24 : vector<256x128xi32>
      %cst_21 = arith.constant -1.000000e+30 : f32
      %26 = vector.broadcast %cst_21 : f32 to vector<256x128xf32>
      %27 = arith.select %25, %22, %26 : vector<256x128xi1>, vector<256x128xf32>
      %cst_22 = arith.constant dense<0xFF800000> : vector<256xf32>
      %28 = vector.multi_reduction <maximumf>, %27, %cst_22 [1] : vector<256x128xf32> to vector<256xf32>
      %29 = vector.shape_cast %28 : vector<256xf32> to vector<256x1xf32>
      %30 = vector.broadcast %29 : vector<256x1xf32> to vector<256x128xf32>
      %31 = arith.subf %27, %30 : vector<256x128xf32>
      %32 = math.exp %31 : vector<256x128xf32>
      %cst_23 = arith.constant dense<0.000000e+00> : vector<256xf32>
      %33 = vector.multi_reduction <add>, %32, %cst_23 [1] : vector<256x128xf32> to vector<256xf32>
      %34 = vector.shape_cast %33 : vector<256xf32> to vector<256x1xf32>
      %35 = math.log %34 : vector<256x1xf32>
      %36 = vector.broadcast %35 : vector<256x1xf32> to vector<256x128xf32>
      %37 = arith.subf %31, %36 : vector<256x128xf32>
      %c0_24 = arith.constant 0 : index
      %c0_25 = arith.constant 0 : index
      %38 = vector.load %arg8[%c0_24, %c0_25] : memref<256x128xf32, #tpu.memory_space<vmem>>, vector<256x128xf32>
      tpu.vector_store %arg8[%c0_24, %c0_25], %37 {strides = array<i32>} : memref<256x128xf32, #tpu.memory_space<vmem>>, vector<256x128xf32>,
    } else {
    }
    return
  }
  func.func @transform_0(%arg0: i32, %arg1: i32) -> (i32, i32) {
    %c0_i32 = arith.constant 0 : i32
    %c0_i32_0 = arith.constant 0 : i32
    return %arg0, %c0_i32 : i32, i32
  }
  func.func @transform_1(%arg0: i32, %arg1: i32) -> (i32, i32) {
    %c0_i32 = arith.constant 0 : i32
    return %arg0, %arg1 : i32, i32
  }
  func.func @transform_2(%arg0: i32, %arg1: i32) -> (i32, i32) {
    %c0_i32 = arith.constant 0 : i32
    %c0_i32_0 = arith.constant 0 : i32
    return %arg1, %c0_i32 : i32, i32
  }
  func.func @transform_3(%arg0: i32, %arg1: i32) -> (i32, i32) {
    %c0_i32 = arith.constant 0 : i32
    %c0_i32_0 = arith.constant 0 : i32
    %c0_i32_1 = arith.constant 0 : i32
    return %c0_i32, %c0_i32_0 : i32, i32
  }
  func.func @transform_4(%arg0: i32, %arg1: i32) -> (i32, i32) {
    %c0_i32 = arith.constant 0 : i32
    %c0_i32_0 = arith.constant 0 : i32
    %c0_i32_1 = arith.constant 0 : i32
    return %c0_i32, %c0_i32_0 : i32, i32
  }
  func.func @transform_5(%arg0: i32, %arg1: i32) -> (i32, i32) {
    %c0_i32 = arith.constant 0 : i32
    %c0_i32_0 = arith.constant 0 : i32
    return %arg0, %c0_i32 : i32, i32
  }
  func.func @transform_6(%arg0: i32, %arg1: i32) -> (i32, i32) {
    %c0_i32 = arith.constant 0 : i32
    %c0_i32_0 = arith.constant 0 : i32
    return %arg0, %c0_i32 : i32, i32
  }
}

</mosaic_0001>

<bundles_post_ra>
// kernel: p1gcn0_forward.2
= control target key start
LH: loop header
LB: loop body
LE: loop exit
PB: predicated region body
PF: predicated region fallthrough
CT: control target
= control target key end

     0   :  { %s3249_s21 = smov 0   ;;  %s3251_s22 = smov 0   ;;  %s3851_s0 = inlined_call_operand.vmem [shape: bf16[512,128], index: 0, kind: input, shape index: {}]   ;;  %s3852_s1 = inlined_call_operand.vmem [shape: bf16[512,512], index: 1, kind: input, shape index: {}]   ;;  %s3853_s2 = inlined_call_operand.vmem [shape: bf16[512,128], index: 2, kind: input, shape index: {}]   ;;  %s3854_s3 = inlined_call_operand.vmem [shape: bf16[128,128], index: 3, kind: input, shape index: {}]   ;;  %s3855_s4 = inlined_call_operand.vmem [shape: f32[1,128], index: 4, kind: input, shape index: {}]   ;;  %s3856_s5 = inlined_call_operand.vmem [shape: f32[512,1], index: 5, kind: input, shape index: {}]   ;;  %s3857_s6 = inlined_call_operand.vmem [shape: bf16[512,128], index: 6, kind: output, shape index: {}]  }
   0x1   :  { %s3253_s23 = smov 0  }
   0x2 LB: > { %s28_s24 = sadd.s32 1, %s3207_s22  ;;  %p2405_p0 = scmp.ge.s32.totalorder %s3211_s23, 1  ;;  %s3211_s23 = sphi %s3253_s23, %s16_s23   ;;  %s3207_s22 = sphi %s3251_s22, %s3909_s22   ;;  %s3203_s21 = sphi %s3249_s21, %s3908_s21  }
   0x3   : > { %p30_p1 = scmp.ge.s32.totalorder %s28_s24, 2  ;;  %p266_p2 = scmp.lt.s32.totalorder %s3211_s23, 3 }
   0x5   : > { %s3911_s24 = smov (%p30_p1, %s28_s24), 0  ;;  %p267_p3 = pnand %p2405_p0, %p266_p2 }
   0x7   : > { %270 = sbr.rel (%p267_p3) target bundleno = 411 (0x19b), region = 44 }
   0xc   : > { %v3037_v0 = vld [vmem:[%s3853_s2 + $0x78] sm:$0xff]   ;;  %s2406_s27 = sshll.u32 %s3203_s21, 5  ;;  %v3039_v2 = vld [vmem:[%s3853_s2 + $0x70] sm:$0xff]   ;;  %v3041_v4 = vld [vmem:[%s3853_s2 + $0x68] sm:$0xff]   ;;  %v3213_v9 = vmov 0  }
   0xd   : > { %v3038_v1 = vld [vmem:[%s3853_s2 + $0x38] sm:$0xff]   ;;  %2698 = vmatprep.subr.bf16.mxu0 %v3037_v0  ;;  %2994 = vmatprep.subr.bf16.mxu1 %v3037_v0  ;;  %v3040_v3 = vld [vmem:[%s3853_s2 + $0x30] sm:$0xff]   ;;  %p317_p4 = scmp.lt.s32.totalorder %s2406_s27, 63  ;;  %v3042_v5 = vld [vmem:[%s3853_s2 + $0x28] sm:$0xff]  }
   0xe   : > { %2699 = vmatpush3.bf16.msra.mxu0 %v3038_v1  ;;  %3002 = vmatpush3.bf16.msra.mxu1 %v3038_v1  ;;  %v3043_v6 = vld [vmem:[%s3853_s2 + $0x60] sm:$0xff]   ;;  %v3045_v8 = vld [vmem:[%s3853_s2 + $0x58] sm:$0xff]   ;;  %v3047_v11 = vld [vmem:[%s3853_s2 + $0x50] sm:$0xff]  }
   0xf   : > { %2700 = vmatprep.subr.bf16.mxu0 %v3039_v2  ;;  %2995 = vmatprep.subr.bf16.mxu1 %v3039_v2  ;;  %s3913_s27 = smov (!%p317_p4, %s2406_s27), 63  ;;  %v3044_v7 = vld [vmem:[%s3853_s2 + $0x20] sm:$0xff]   ;;  %v3046_v10 = vld [vmem:[%s3853_s2 + $0x18] sm:$0xff]   ;;  %v3048_v14 = vld [vmem:[%s3853_s2 + $0x10] sm:$0xff]  }
  0x10   : > { %s2570_s18 = sshll.u32 %s3913_s27, 4  ;;  %3035 = vset.pattern.permute.xlu0 %v3213_v9  ;;  %3036 = vset.pattern.permute.xlu1 %v3213_v9  ;;  %v3049_v15 = vld [vmem:[%s3853_s2 + $0x48] sm:$0xff]   ;;  %v3051_v17 = vld [vmem:[%s3853_s2 + $0x40] sm:$0xff]   ;;  %v3059_v19 = vld [vmem:[%s3853_s2 + $0xf8] sm:$0xff]   ;;  %s2407_s7 = sshll.u32 %s3913_s27, 2 }
  0x11   : > { %s3300_s26 = scalar_lea.vmem %s3852_s1, %s2570_s18  ;;  %v3050_v16 = vld [vmem:[%s3853_s2 + $0x8] sm:$0xff]   ;;  %v3052_v18 = vld [vmem:[%s3853_s2] sm:$0xff]   ;;  %v3063_v21 = vld [vmem:[%s3854_s3 + $0x38] sm:$0xff]   ;;  %s3427_s12 = scalar_lea.vmem %s3851_s0, %s2407_s7 }
  0x12   : > { %2701 = vmatpush3.bf16.msra.mxu0 %v3040_v3  ;;  %3003 = vmatpush3.bf16.msra.mxu1 %v3040_v3  ;;  %v3055_v12 = vld [vmem:[%s3300_s26 + $0x4] ss:$16 sps:$4 sm:$0xff]   ;;  %v3053_v20 = vld [vmem:[%s3300_s26] ss:$16 sps:$4 sm:$0xff]   ;;  %v3060_v23 = vld [vmem:[%s3853_s2 + $0xb8] sm:$0xff]   ;;  %s2412_s13 = sshll.u32 %s3913_s27, 3  ;;  %s3711_s20 = scalar_lea.vmem %s3857_s6, %s2407_s7 }
  0x13   : > { %2702 = vmatprep.subr.bf16.mxu0 %v3041_v4  ;;  %2996 = vmatprep.subr.bf16.mxu1 %v3041_v4  ;;  %v3058_v13 = vld [vmem:[%s3300_s26 + $0x184] ss:$16 sps:$4 sm:$0xff]   ;;  %v3056_v22 = vld [vmem:[%s3300_s26 + $0x180] ss:$16 sps:$4 sm:$0xff]   ;;  %v3070_v30 = vld [vmem:[%s3853_s2 + $0xe8] sm:$0xff]   ;;  %s3433_s16 = scalar_lea.vmem %s3856_s5, %s2412_s13 }
  0x14   : > { %1093 = vmatprep.mubr.bf16.mxu0 %v3055_v12  ;;  %1189 = vmatprep.mubr.bf16.mxu1 %v3058_v13  ;;  %v3064_v24 = vld [vmem:[%s3300_s26 + $0x24] ss:$16 sps:$4 sm:$0xff]   ;;  %v3068_v29 = vld [vmem:[%s3300_s26 + $0x20] ss:$16 sps:$4 sm:$0xff]   ;;  %v3071_v32 = vld [vmem:[%s3853_s2 + $0xa8] sm:$0xff]  }
  0x15   : > { %v3061_v25 = vld [vmem:[%s3853_s2 + $0xf0] sm:$0xff]   ;;  %v3072_v34 = vld [vmem:[%s3853_s2 + $0xe0] sm:$0xff]   ;;  %v3080_v39 = vld [vmem:[%s3853_s2 + $0xd8] sm:$0xff]  }
  0x16   : > { %2703 = vmatpush3.bf16.msra.mxu0 %v3042_v5  ;;  %3004 = vmatpush3.bf16.msra.mxu1 %v3042_v5  ;;  %v3066_v26 = vld [vmem:[%s3300_s26 + $0x1a4] ss:$16 sps:$4 sm:$0xff]   ;;  %v3069_v31 = vld [vmem:[%s3300_s26 + $0x1a0] ss:$16 sps:$4 sm:$0xff]   ;;  %v3095_v40 = vld [vmem:[%s3854_s3 + $0x28] sm:$0xff]  }
  0x17   : > { %2704 = vmatprep.subr.bf16.mxu0 %v3043_v6  ;;  %2997 = vmatprep.subr.bf16.mxu1 %v3043_v6  ;;  %v3062_v27 = vld [vmem:[%s3853_s2 + $0xb0] sm:$0xff]   ;;  %v3073_v36 = vld [vmem:[%s3853_s2 + $0xa0] sm:$0xff]   ;;  %v3081_v41 = vld [vmem:[%s3853_s2 + $0x98] sm:$0xff]  }
  0x18   : > { %v3082_v28 = vld [vmem:[%s3854_s3 + $0x30] sm:$0xff]   ;;  %v3108_v46 = vld [vmem:[%s3854_s3 + $0x20] sm:$0xff]   ;;  %v3091_v49 = vld [vmem:[%s3853_s2 + $0xc8] sm:$0xff]  }
  0x19   : > { %v3074_v33 = vld [vmem:[%s3300_s26 + $0x44] ss:$16 sps:$4 sm:$0xff]   ;;  %v3078_v37 = vld [vmem:[%s3300_s26 + $0x40] ss:$16 sps:$4 sm:$0xff]   ;;  %v3092_v50 = vld [vmem:[%s3853_s2 + $0x88] sm:$0xff]  }
  0x1a   : > { %2705 = vmatpush3.bf16.msra.mxu0 %v3044_v7  ;;  %3005 = vmatpush3.bf16.msra.mxu1 %v3044_v7  ;;  %v3076_v35 = vld [vmem:[%s3300_s26 + $0x1c4] ss:$16 sps:$4 sm:$0xff]   ;;  %v3079_v38 = vld [vmem:[%s3300_s26 + $0x1c0] ss:$16 sps:$4 sm:$0xff]   ;;  %v3115_v53 = vld [vmem:[%s3854_s3 + $0x18] sm:$0xff]  }
  0x1b   : > { %2706 = vmatprep.subr.bf16.mxu0 %v3045_v8  ;;  %2998 = vmatprep.subr.bf16.mxu1 %v3045_v8  ;;  %v3083_v42 = vld [vmem:[%s3853_s2 + $0xd0] sm:$0xff]   ;;  %v3093_v51 = vld [vmem:[%s3853_s2 + $0xc0] sm:$0xff]   ;;  %v3100_v54 = vld [vmem:[%s3300_s26 + $0xc] ss:$16 sps:$4 sm:$0xff]  }
  0x1c   : > { %v3085_v43 = vld [vmem:[%s3300_s26 + $0x64] ss:$16 sps:$4 sm:$0xff]   ;;  %v3089_v47 = vld [vmem:[%s3300_s26 + $0x60] ss:$16 sps:$4 sm:$0xff]   ;;  %v3098_v56 = vld [vmem:[%s3300_s26 + $0x8] ss:$16 sps:$4 sm:$0xff]  }
  0x1d   : > { %v3087_v44 = vld [vmem:[%s3300_s26 + $0x1e4] ss:$16 sps:$4 sm:$0xff]   ;;  %v3090_v48 = vld [vmem:[%s3300_s26 + $0x1e0] ss:$16 sps:$4 sm:$0xff]   ;;  %v3104_v60 = vld [vmem:[%s3300_s26 + $0x2c] ss:$16 sps:$4 sm:$0xff]  }
  0x1e   : > { %2707 = vmatpush3.bf16.msra.mxu0 %v3046_v10  ;;  %3006 = vmatpush3.bf16.msra.mxu1 %v3046_v10  ;;  %v3084_v45 = vld [vmem:[%s3853_s2 + $0x90] sm:$0xff]   ;;  %v3094_v55 = vld [vmem:[%s3853_s2 + $0x80] sm:$0xff]   ;;  %v3135_v61 = vld [vmem:[%s3854_s3 + $0x8] sm:$0xff]  }
  0x1f   : > { %2708 = vmatprep.subr.bf16.mxu0 %v3047_v11  ;;  %2999 = vmatprep.subr.bf16.mxu1 %v3047_v11  ;;  %v3096_v52 = vld [vmem:[%s3300_s26 + $0x84] ss:$16 sps:$4 sm:$0xff]   ;;  %v3101_v57 = vld [vmem:[%s3300_s26 + $0x80] ss:$16 sps:$4 sm:$0xff]   ;;  %v3107_v63 = vld [vmem:[%s3300_s26 + $0x28] ss:$16 sps:$4 sm:$0xff]  }
  0x20   : > { %v3128_v58 = vld [vmem:[%s3854_s3 + $0x10] sm:$0xff]   ;;  %v3111_v1 = vld [vmem:[%s3300_s26 + $0x4c] ss:$16 sps:$4 sm:$0xff]   ;;  %v3148_v2 = vld [vmem:[%s3854_s3] sm:$0xff]  }
  0x21   : > { %v3102_v59 = vld [vmem:[%s3300_s26 + $0xa4] ss:$16 sps:$4 sm:$0xff]   ;;  %v3106_v62 = vld [vmem:[%s3300_s26 + $0xa0] ss:$16 sps:$4 sm:$0xff]   ;;  %v3114_v4 = vld [vmem:[%s3300_s26 + $0x48] ss:$16 sps:$4 sm:$0xff]  }
  0x22   : > { %2709 = vmatpush3.bf16.msra.mxu0 %v3048_v14  ;;  %3007 = vmatpush3.bf16.msra.mxu1 %v3048_v14  ;;  %v3109_v0 = vld [vmem:[%s3300_s26 + $0xc4] ss:$16 sps:$4 sm:$0xff]   ;;  %v3113_v3 = vld [vmem:[%s3300_s26 + $0xc0] ss:$16 sps:$4 sm:$0xff]   ;;  %v3118_v7 = vld [vmem:[%s3300_s26 + $0x6c] ss:$16 sps:$4 sm:$0xff]  }
  0x23   : > { %2710 = vmatprep.subr.bf16.mxu0 %v3049_v15  ;;  %3000 = vmatprep.subr.bf16.mxu1 %v3049_v15  ;;  %v3116_v5 = vld [vmem:[%s3300_s26 + $0xe4] ss:$16 sps:$4 sm:$0xff]   ;;  %v1499_v8 = vld [vmem:[%s3433_s16 + $0x8] sm:$0xff]  ;;  %v3120_v10 = vld [vmem:[%s3300_s26 + $0xe0] ss:$16 sps:$4 sm:$0xff]  }
  0x24   : > { %v1498_v6 = vld [vmem:[%s3433_s16] sm:$0xff]  ;;  %v1500_v9 = vld [vmem:[%s3433_s16 + $0x10] sm:$0xff]  ;;  %v1501_v11 = vld [vmem:[%s3433_s16 + $0x18] sm:$0xff] }
  0x25   : > { %1564 = vperm.xlu0 %3035, %v1498_v6   ;;  %1574 = vperm.xlu1 %3036, %v1500_v9   ;;  %v1502_v12 = vld [vmem:[%s3433_s16 + $0x20] sm:$0xff]  ;;  %v3121_v13 = vld [vmem:[%s3300_s26 + $0x68] ss:$16 sps:$4 sm:$0xff]   ;;  %v3124_v15 = vld [vmem:[%s3300_s26 + $0x8c] ss:$16 sps:$4 sm:$0xff]  }
  0x26   : > { %2711 = vmatpush3.bf16.msra.mxu0 %v3050_v16  ;;  %3008 = vmatpush3.bf16.msra.mxu1 %v3050_v16  ;;  %v3122_v14 = vld [vmem:[%s3300_s26 + $0x104] ss:$16 sps:$4 sm:$0xff]   ;;  %v1503_v16 = vld [vmem:[%s3433_s16 + $0x28] sm:$0xff] }
  0x27   : > { %2712 = vmatprep.subr.bf16.mxu0 %v3051_v17  ;;  %3001 = vmatprep.subr.bf16.mxu1 %v3051_v17  ;;  %v1504_v17 = vld [vmem:[%s3433_s16 + $0x30] sm:$0xff]  ;;  %v3169_v9 = vld [vmem:[%s3300_s26 + $0x18c] ss:$16 sps:$4 sm:$0xff]  }
  0x28   : > { %v3166_v6 = vld [vmem:[%s3427_s12 + $0x30] sm:$0xff]  }
  0x29   : > { %1569 = vperm.xlu0 %3035, %v1499_v8   ;;  %1579 = vperm.xlu1 %3036, %v1501_v11   ;;  %v3168_v8 = vld [vmem:[%s3427_s12 + $0x38] sm:$0xff]  }
  0x2a   : > { %2713 = vmatpush3.bf16.msra.mxu0 %v3052_v18  ;;  %3009 = vmatpush3.bf16.msra.mxu1 %v3052_v18  ;;  %v1505_v18 = vld [vmem:[%s3433_s16 + $0x38] sm:$0xff] }
  0x2b   : > { %2810 = vmatprep.subr.bf16.mxu1 %v3059_v19  ;;  %2946 = vmatprep.subr.bf16.mxu0 %v3063_v21  ;;  %v1506_v19 = vld [vmem:[%s3433_s16 + $0x40] sm:$0xff]  ;;  %v3172_v11 = vld [vmem:[%s3300_s26 + $0x188] ss:$16 sps:$4 sm:$0xff]  }
  0x2d   : > { %1094 = vmatmul.mubr.bf16.vlgmr.msra.gmra.mxu0 %v3053_v20  ;;  %1190 = vmatmul.mubr.bf16.vlgmr.msra.gmra.mxu1 %v3056_v22  ;;  %v3126_v20 = vld [vmem:[%s3300_s26 + $0x100] ss:$16 sps:$4 sm:$0xff]   ;;  %v3129_v22 = vld [vmem:[%s3300_s26 + $0x124] ss:$16 sps:$4 sm:$0xff]  }
  0x2e   : > { %2811 = vmatpush3.bf16.msra.mxu1 %v3060_v23  ;;  %1101 = vmatprep.mubr.bf16.mxu0 %v3064_v24  ;;  %v3131_v23 = vld [vmem:[%s3300_s26 + $0xac] ss:$16 sps:$4 sm:$0xff]  }
  0x2f   : > { %2812 = vmatprep.subr.bf16.mxu1 %v3061_v25  ;;  %1197 = vmatprep.mubr.bf16.mxu1 %v3066_v26  ;;  %v1507_v24 = vld [vmem:[%s3433_s16 + $0x48] sm:$0xff]  ;;  %v1508_v25 = vld [vmem:[%s3433_s16 + $0x50] sm:$0xff] }
  0x30   : > { %2947 = vmatpush3.bf16.msra.mxu0 %v3063_v21  ;;  %1584 = vperm.xlu0 %3035, %v1502_v12   ;;  %v3127_v21 = vld [vmem:[%s3300_s26 + $0x88] ss:$16 sps:$4 sm:$0xff]   ;;  %v3133_v26 = vld [vmem:[%s3300_s26 + $0x120] ss:$16 sps:$4 sm:$0xff]  }
  0x31   : > { %2948 = vmatprep.subr.bf16.mxu0 %v3082_v28  ;;  %1589 = vperm.xlu1 %3036, %v1503_v16   ;;  %v3173_v12 = vld [vmem:[%s3427_s12 + $0x48] sm:$0xff]   ;;  %v3178_v16 = vld [vmem:[%s3427_s12 + $0x58] sm:$0xff]  }
  0x32   : > { %2813 = vmatpush3.bf16.msra.mxu1 %v3062_v27  ;;  %v3134_v27 = vld [vmem:[%s3300_s26 + $0xa8] ss:$16 sps:$4 sm:$0xff]  }
  0x33   : > { %2814 = vmatprep.subr.bf16.mxu1 %v3070_v30  ;;  %v3136_v30 = vld [vmem:[%s3300_s26 + $0x144] ss:$16 sps:$4 sm:$0xff]  }
  0x34   : > { %2949 = vmatpush3.bf16.msra.mxu0 %v3082_v28  ;;  %1594 = vperm.xlu0 %3035, %v1504_v17   ;;  %v1509_v28 = vld [vmem:[%s3433_s16 + $0x58] sm:$0xff] }
  0x35   : > { %1102 = vmatmul.mubr.bf16.gmra.mxu0 %v3068_v29  ;;  %1198 = vmatmul.mubr.bf16.gmra.mxu1 %v3069_v31  ;;  %v1510_v29 = vld [vmem:[%s3433_s16 + $0x60] sm:$0xff]  ;;  %v3138_v31 = vld [vmem:[%s3300_s26 + $0xcc] ss:$16 sps:$4 sm:$0xff]  }
  0x36   : > { %2815 = vmatpush3.bf16.msra.mxu1 %v3071_v32  ;;  %1109 = vmatprep.mubr.bf16.mxu0 %v3074_v33  ;;  %v1511_v32 = vld [vmem:[%s3433_s16 + $0x68] sm:$0xff]  ;;  %v1512_v33 = vld [vmem:[%s3433_s16 + $0x70] sm:$0xff] }
  0x37   : > { %2816 = vmatprep.subr.bf16.mxu1 %v3072_v34  ;;  %1205 = vmatprep.mubr.bf16.mxu1 %v3076_v35  ;;  %v1513_v34 = vld [vmem:[%s3433_s16 + $0x78] sm:$0xff]  ;;  %v1514_v35 = vld [vmem:[%s3433_s16 + $0x80] sm:$0xff] }
  0x38   : > { %2950 = vmatprep.subr.bf16.mxu0 %v3095_v40  ;;  %1599 = vperm.xlu1 %3036, %v1505_v18   ;;  %v3179_v17 = vld [vmem:[%s3300_s26 + $0x1cc] ss:$16 sps:$4 sm:$0xff]   ;;  %v3181_v18 = vld [vmem:[%s3427_s12 + $0x60] sm:$0xff]  }
  0x39   : > { %2951 = vmatpush3.bf16.msra.mxu0 %v3095_v40  ;;  %1604 = vperm.xlu0 %3035, %v1506_v19   ;;  %v1515_v40 = vld [vmem:[%s3433_s16 + $0x88] sm:$0xff] }
  0x3a   : > { %2817 = vmatpush3.bf16.msra.mxu1 %v3073_v36  ;;  %2952 = vmatprep.subr.bf16.mxu0 %v3108_v46  ;;  %v3140_v36 = vld [vmem:[%s3300_s26 + $0x140] ss:$16 sps:$4 sm:$0xff]   ;;  %v3182_v19 = vld [vmem:[%s3300_s26 + $0x1c8] ss:$16 sps:$4 sm:$0xff]  }
  0x3b   : > { %2818 = vmatprep.subr.bf16.mxu1 %v3080_v39  ;;  %v3144_v39 = vld [vmem:[%s3300_s26 + $0xec] ss:$16 sps:$4 sm:$0xff]  }
  0x3c   : > { %1609 = vperm.xlu1 %3036, %v1507_v24   ;;  %v3188_v24 = vld [vmem:[%s3427_s12 + $0x78] sm:$0xff]  }
  0x3d   : > { %1110 = vmatmul.mubr.bf16.gmra.mxu0 %v3078_v37  ;;  %1206 = vmatmul.mubr.bf16.gmra.mxu1 %v3079_v38  ;;  %v3141_v37 = vld [vmem:[%s3300_s26 + $0xc8] ss:$16 sps:$4 sm:$0xff]   ;;  %v3142_v38 = vld [vmem:[%s3300_s26 + $0x164] ss:$16 sps:$4 sm:$0xff]  }
  0x3e   : > { %2819 = vmatpush3.bf16.msra.mxu1 %v3081_v41  ;;  %1117 = vmatprep.mubr.bf16.mxu0 %v3085_v43  ;;  %v1516_v41 = vld [vmem:[%s3433_s16 + $0x90] sm:$0xff]  ;;  %v1518_v43 = vld [vmem:[%s3433_s16 + $0xa0] sm:$0xff] }
  0x3f   : > { %2820 = vmatprep.subr.bf16.mxu1 %v3083_v42  ;;  %1213 = vmatprep.mubr.bf16.mxu1 %v3087_v44  ;;  %v1517_v42 = vld [vmem:[%s3433_s16 + $0x98] sm:$0xff]  ;;  %v3146_v44 = vld [vmem:[%s3300_s26 + $0x160] ss:$16 sps:$4 sm:$0xff]  }
  0x40   : > { %2953 = vmatpush3.bf16.msra.mxu0 %v3108_v46  ;;  %1614 = vperm.xlu0 %3035, %v1508_v25   ;;  %v3149_v46 = vld [vmem:[%s3300_s26 + $0x10c] ss:$16 sps:$4 sm:$0xff]  }
  0x41   : > { %2954 = vmatprep.subr.bf16.mxu0 %v3115_v53  ;;  %1619 = vperm.xlu1 %3036, %v1509_v28  }
  0x42   : > { %2821 = vmatpush3.bf16.msra.mxu1 %v3084_v45  ;;  %v3147_v45 = vld [vmem:[%s3300_s26 + $0xe8] ss:$16 sps:$4 sm:$0xff]  }
  0x43   : > { %2822 = vmatprep.subr.bf16.mxu1 %v3091_v49  ;;  %v1520_v49 = vld [vmem:[%s3433_s16 + $0xb0] sm:$0xff] }
  0x44   : > { %2955 = vmatpush3.bf16.msra.mxu0 %v3115_v53  ;;  %1624 = vperm.xlu0 %3035, %v1510_v29   ;;  %v3153_v53 = vld [vmem:[%s3427_s12 + $0x8] sm:$0xff]  }
  0x45   : > { %1118 = vmatmul.mubr.bf16.gmra.mxu0 %v3089_v47  ;;  %1214 = vmatmul.mubr.bf16.gmra.mxu1 %v3090_v48  ;;  %v3151_v47 = vld [vmem:[%s3427_s12] sm:$0xff]   ;;  %v1519_v48 = vld [vmem:[%s3433_s16 + $0xa8] sm:$0xff] }
  0x46   : > { %2823 = vmatpush3.bf16.msra.mxu1 %v3092_v50  ;;  %1125 = vmatprep.mubr.bf16.mxu0 %v3096_v52  ;;  %v1521_v50 = vld [vmem:[%s3433_s16 + $0xb8] sm:$0xff] }
  0x47   : > { %2824 = vmatprep.subr.bf16.mxu1 %v3093_v51  ;;  %1254 = vmatprep.mubr.bf16.mxu1 %v3100_v54  ;;  %v1522_v51 = vld [vmem:[%s3433_s16 + $0xc0] sm:$0xff]  ;;  %v3152_v52 = vld [vmem:[%s3300_s26 + $0x108] ss:$16 sps:$4 sm:$0xff]   ;;  %v3154_v54 = vld [vmem:[%s3300_s26 + $0x12c] ss:$16 sps:$4 sm:$0xff]  }
  0x48   : > { %2956 = vmatprep.subr.bf16.mxu0 %v3128_v58  ;;  %1629 = vperm.xlu1 %3036, %v1511_v32  }
  0x49   : > { %2957 = vmatpush3.bf16.msra.mxu0 %v3128_v58  ;;  %1634 = vperm.xlu0 %3035, %v1512_v33   ;;  %v1525_v58 = vld [vmem:[%s3433_s16 + $0xd8] sm:$0xff] }
  0x4a   : > { %2825 = vmatpush3.bf16.msra.mxu1 %v3094_v55  ;;  %2958 = vmatprep.subr.bf16.mxu0 %v3135_v61  ;;  %v3156_v55 = vld [vmem:[%s3427_s12 + $0x10] sm:$0xff]  }
  0x4c   : > { %1639 = vperm.xlu1 %3036, %v1513_v34  }
  0x4d   : > { %1126 = vmatmul.mubr.bf16.gmra.mxu0 %v3101_v57  ;;  %1255 = vmatmul.mubr.bf16.vlgmr.msra.gmra.mxu1 %v3098_v56  ;;  %v1523_v56 = vld [vmem:[%s3433_s16 + $0xc8] sm:$0xff]  ;;  %v1524_v57 = vld [vmem:[%s3433_s16 + $0xd0] sm:$0xff] }
  0x4e   : > { %1133 = vmatprep.mubr.bf16.mxu0 %v3102_v59  ;;  %1262 = vmatprep.mubr.bf16.mxu1 %v3104_v60  ;;  %v1526_v59 = vld [vmem:[%s3433_s16 + $0xe0] sm:$0xff]  ;;  %v3157_v60 = vld [vmem:[%s3300_s26 + $0x128] ss:$16 sps:$4 sm:$0xff]  }
  0x4f   : > { %2959 = vmatpush3.bf16.msra.mxu0 %v3135_v61  ;;  %1644 = vperm.xlu0 %3035, %v1514_v35   ;;  %v3158_v61 = vld [vmem:[%s3427_s12 + $0x18] sm:$0xff]  }
  0x50   : > { %2960 = vmatprep.subr.bf16.mxu0 %v3148_v2  ;;  %1649 = vperm.xlu1 %3036, %v1515_v40  }
  0x53   : > { %2961 = vmatpush3.bf16.msra.mxu0 %v3148_v2  ;;  %1654 = vperm.xlu0 %3035, %v1516_v41   ;;  %v1529_v2 = vld [vmem:[%s3433_s16 + $0xf8] sm:$0xff] }
  0x54   : > { %1659 = vperm.xlu1 %3036, %v1517_v42  }
  0x55   : > { %1134 = vmatmul.mubr.bf16.gmra.mxu0 %v3106_v62  ;;  %1263 = vmatmul.mubr.bf16.gmra.mxu1 %v3107_v63  ;;  %v3159_v62 = vld [vmem:[%s3300_s26 + $0x14c] ss:$16 sps:$4 sm:$0xff]   ;;  %v3161_v63 = vld [vmem:[%s3427_s12 + $0x20] sm:$0xff]  }
  0x56   : > { %1141 = vmatprep.mubr.bf16.mxu0 %v3109_v0  ;;  %1270 = vmatprep.mubr.bf16.mxu1 %v3111_v1  ;;  %v1527_v0 = vld [vmem:[%s3433_s16 + $0xe8] sm:$0xff]  ;;  %v1528_v1 = vld [vmem:[%s3433_s16 + $0xf0] sm:$0xff] }
  0x57   : > { %1664 = vperm.xlu0 %3035, %v1518_v43  }
  0x58   : > { %1669 = vperm.xlu1 %3036, %v1519_v48  }
  0x5b   : > { %1674 = vperm.xlu0 %3035, %v1520_v49  }
  0x5c   : > { %1679 = vperm.xlu1 %3036, %v1521_v50  }
  0x5d   : > { %1142 = vmatmul.mubr.bf16.gmra.mxu0 %v3113_v3  ;;  %1271 = vmatmul.mubr.bf16.gmra.mxu1 %v3114_v4  ;;  %v3162_v3 = vld [vmem:[%s3300_s26 + $0x148] ss:$16 sps:$4 sm:$0xff]  }
  0x5e   : > { %1149 = vmatprep.mubr.bf16.mxu0 %v3116_v5  ;;  %1278 = vmatprep.mubr.bf16.mxu1 %v3118_v7  ;;  %v3163_v4 = vld [vmem:[%s3427_s12 + $0x28] sm:$0xff]  }
  0x5f   : > { %1684 = vperm.xlu0 %3035, %v1522_v51   ;;  %v3164_v5 = vld [vmem:[%s3300_s26 + $0x16c] ss:$16 sps:$4 sm:$0xff]   ;;  %v3167_v7 = vld [vmem:[%s3300_s26 + $0x168] ss:$16 sps:$4 sm:$0xff]  }
  0x60   : > { %1689 = vperm.xlu1 %3036, %v1523_v56  }
  0x63   : > { %1694 = vperm.xlu0 %3035, %v1524_v57  }
  0x64   : > { %1699 = vperm.xlu1 %3036, %v1525_v58  }
  0x65   : > { %1150 = vmatmul.mubr.bf16.gmra.mxu0 %v3120_v10  ;;  %1279 = vmatmul.mubr.bf16.gmra.mxu1 %v3121_v13  ;;  %v3171_v10 = vld [vmem:[%s3427_s12 + $0x40] sm:$0xff]   ;;  %v3174_v13 = vld [vmem:[%s3300_s26 + $0x1ac] ss:$16 sps:$4 sm:$0xff]  }
  0x66   : > { %1157 = vmatprep.mubr.bf16.mxu0 %v3122_v14  ;;  %1286 = vmatprep.mubr.bf16.mxu1 %v3124_v15  ;;  %v3176_v14 = vld [vmem:[%s3427_s12 + $0x50] sm:$0xff]   ;;  %v3177_v15 = vld [vmem:[%s3300_s26 + $0x1a8] ss:$16 sps:$4 sm:$0xff]  }
  0x67   : > { %1704 = vperm.xlu0 %3035, %v1526_v59  }
  0x68   : > { %1709 = vperm.xlu1 %3036, %v1527_v0  }
  0x6b   : > { %1714 = vperm.xlu0 %3035, %v1528_v1  }
  0x6c   : > { %1719 = vperm.xlu1 %3036, %v1529_v2  }
  0x6d   : > { %1158 = vmatmul.mubr.bf16.gmra.mxu0 %v3126_v20  ;;  %1287 = vmatmul.mubr.bf16.gmra.mxu1 %v3127_v21  ;;  %v3183_v20 = vld [vmem:[%s3427_s12 + $0x68] sm:$0xff]  }
  0x6e   : > { %1165 = vmatprep.mubr.bf16.mxu0 %v3129_v22  ;;  %1294 = vmatprep.mubr.bf16.mxu1 %v3131_v23  ;;  %v3184_v21 = vld [vmem:[%s3300_s26 + $0x1ec] ss:$16 sps:$4 sm:$0xff]   ;;  %v3186_v22 = vld [vmem:[%s3427_s12 + $0x70] sm:$0xff]   ;;  %v3187_v23 = vld [vmem:[%s3300_s26 + $0x1e8] ss:$16 sps:$4 sm:$0xff]  }
  0x75   : > { %1166 = vmatmul.mubr.bf16.gmra.mxu0 %v3133_v26  ;;  %1295 = vmatmul.mubr.bf16.gmra.mxu1 %v3134_v27 }
  0x76   : > { %1173 = vmatprep.mubr.bf16.mxu0 %v3136_v30  ;;  %1302 = vmatprep.mubr.bf16.mxu1 %v3138_v31 }
  0x7d   : > { %1174 = vmatmul.mubr.bf16.gmra.mxu0 %v3140_v36  ;;  %1303 = vmatmul.mubr.bf16.gmra.mxu1 %v3141_v37 }
  0x7e   : > { %1181 = vmatprep.mubr.bf16.mxu0 %v3142_v38  ;;  %1310 = vmatprep.mubr.bf16.mxu1 %v3144_v39 }
  0x85   : > { %1182 = vmatmul.mubr.bf16.gmra.mxu0 %v3146_v44  ;;  %1311 = vmatmul.mubr.bf16.gmra.mxu1 %v3147_v45 }
  0x86   : > { %1318 = vmatprep.mubr.bf16.mxu1 %v3149_v46  ;;  %2962 = vmatprep.mubr.bf16.mxu0 %v3151_v47 }
  0x8d   : > { %1319 = vmatmul.mubr.bf16.gmra.mxu1 %v3152_v52  ;;  %2963 = vmatmul.mubr.bf16.vlgmr.msra.gmra.mxu0 %v3153_v53 }
  0x8e   : > { %1326 = vmatprep.mubr.bf16.mxu1 %v3154_v54  ;;  %2966 = vmatprep.mubr.bf16.mxu0 %v3156_v55 }
  0x95   : > { %1327 = vmatmul.mubr.bf16.gmra.mxu1 %v3157_v60  ;;  %2967 = vmatmul.mubr.bf16.gmra.mxu0 %v3158_v61 }
  0x96   : > { %1334 = vmatprep.mubr.bf16.mxu1 %v3159_v62  ;;  %2970 = vmatprep.mubr.bf16.mxu0 %v3161_v63 }
  0x9d   : > { %1335 = vmatmul.mubr.bf16.gmra.mxu1 %v3162_v3  ;;  %2971 = vmatmul.mubr.bf16.gmra.mxu0 %v3163_v4 }
  0x9e   : > { %1342 = vmatprep.mubr.bf16.mxu1 %v3164_v5  ;;  %2974 = vmatprep.mubr.bf16.mxu0 %v3166_v6 }
  0xa5   : > { %1343 = vmatmul.mubr.bf16.gmra.mxu1 %v3167_v7  ;;  %2975 = vmatmul.mubr.bf16.gmra.mxu0 %v3168_v8 }
  0xa6   : > { %1350 = vmatprep.mubr.bf16.mxu1 %v3169_v9  ;;  %2978 = vmatprep.mubr.bf16.mxu0 %v3171_v10 }
  0xad   : > { %1351 = vmatmul.mubr.bf16.gmra.mxu1 %v3172_v11  ;;  %2979 = vmatmul.mubr.bf16.gmra.mxu0 %v3173_v12 }
  0xae   : > { %1358 = vmatprep.mubr.bf16.mxu1 %v3174_v13  ;;  %2982 = vmatprep.mubr.bf16.mxu0 %v3176_v14 }
  0xb5   : > { %1359 = vmatmul.mubr.bf16.gmra.mxu1 %v3177_v15  ;;  %2983 = vmatmul.mubr.bf16.gmra.mxu0 %v3178_v16 }
  0xb6   : > { %1366 = vmatprep.mubr.bf16.mxu1 %v3179_v17  ;;  %2986 = vmatprep.mubr.bf16.mxu0 %v3181_v18 }
  0xbd   : > { %1367 = vmatmul.mubr.bf16.gmra.mxu1 %v3182_v19  ;;  %2987 = vmatmul.mubr.bf16.gmra.mxu0 %v3183_v20 }
  0xbe   : > { %1374 = vmatprep.mubr.bf16.mxu1 %v3184_v21  ;;  %2990 = vmatprep.mubr.bf16.mxu0 %v3186_v22 }
  0xc5   : > { %1375 = vmatmul.mubr.bf16.gmra.mxu1 %v3187_v23  ;;  %2991 = vmatmul.mubr.bf16.gmra.mxu0 %v3188_v24 }
  0xed   : > { %v2714_v25 = vpop.f32.mrf.mxu0  ;;  %v2786_v26 = vpop.f32.mrf.mxu1 }
  0xef   : > { %v2715_v27 = vpop.f32.mrf.mxu0  ;;  %v2787_v28 = vpop.f32.mrf.mxu1 }
  0xf0   : > { %v2716_v29 = vadd.f32 %v2715_v27, %v2714_v25  ;;  %v3521_v30 = vadd.f32 %v2787_v28, %v2786_v26 }
  0xf1   : > { %v2717_v31 = vpop.f32.mrf.mxu0  ;;  %v2789_v32 = vpop.f32.mrf.mxu1 }
  0xf2   : > { %3858 = vst [vmem:[#allocation3_spill] sm:$0xff] %v3521_v30 }
  0xf3   : > { %v2718_v33 = vpop.f32.mrf.mxu0  ;;  %v2790_v34 = vpop.f32.mrf.mxu1 }
  0xf4   : > { %v3523_v35 = vadd.f32 %v2718_v33, %v2717_v31  ;;  %v3525_v36 = vadd.f32 %v2790_v34, %v2789_v32 }
  0xf5   : > { %v2720_v37 = vpop.f32.mrf.mxu0  ;;  %v2792_v38 = vpop.f32.mrf.mxu1 }
  0xf6   : > { %3859 = vst [vmem:[#allocation4_spill] sm:$0xff] %v3525_v36 }
  0xf7   : > { %v2721_v39 = vpop.f32.mrf.mxu0  ;;  %v2793_v40 = vpop.f32.mrf.mxu1 }
  0xf8   : > { %v3527_v41 = vadd.f32 %v2721_v39, %v2720_v37  ;;  %v3529_v42 = vadd.f32 %v2793_v40, %v2792_v38 }
  0xf9   : > { %v2723_v43 = vpop.f32.mrf.mxu0  ;;  %v2795_v44 = vpop.f32.mrf.mxu1 }
  0xfa   : > { %3860 = vst [vmem:[#allocation5_spill] sm:$0xff] %v3529_v42 }
  0xfb   : > { %v2724_v45 = vpop.f32.mrf.mxu0  ;;  %v2796_v46 = vpop.f32.mrf.mxu1 }
  0xfc   : > { %v3531_v47 = vadd.f32 %v2724_v45, %v2723_v43  ;;  %v3533_v48 = vadd.f32 %v2796_v46, %v2795_v44 }
  0xfd   : > { %v2726_v49 = vpop.f32.mrf.mxu0  ;;  %v2798_v50 = vpop.f32.mrf.mxu1 }
  0xfe   : > { %3861 = vst [vmem:[#allocation6_spill] sm:$0xff] %v3533_v48 }
  0xff   : > { %v2727_v51 = vpop.f32.mrf.mxu0  ;;  %v2799_v52 = vpop.f32.mrf.mxu1 }
 0x100   : > { %v3535_v53 = vadd.f32 %v2727_v51, %v2726_v49  ;;  %v3537_v54 = vadd.f32 %v2799_v52, %v2798_v50 }
 0x101   : > { %v2729_v55 = vpop.f32.mrf.mxu0  ;;  %v2801_v56 = vpop.f32.mrf.mxu1 }
 0x102   : > { %3862 = vst [vmem:[#allocation7_spill] sm:$0xff] %v3537_v54 }
 0x103   : > { %v2730_v57 = vpop.f32.mrf.mxu0  ;;  %v2802_v58 = vpop.f32.mrf.mxu1 }
 0x104   : > { %v3539_v59 = vadd.f32 %v2730_v57, %v2729_v55  ;;  %v3541_v60 = vadd.f32 %v2802_v58, %v2801_v56 }
 0x105   : > { %v2732_v61 = vpop.f32.mrf.mxu0  ;;  %v2804_v62 = vpop.f32.mrf.mxu1 }
 0x106   : > { %3863 = vst [vmem:[#allocation8_spill] sm:$0xff] %v3541_v60 }
 0x107   : > { %v2733_v63 = vpop.f32.mrf.mxu0  ;;  %v2805_v0 = vpop.f32.mrf.mxu1 }
 0x108   : > { %v3543_v1 = vadd.f32 %v2733_v63, %v2732_v61  ;;  %v3545_v2 = vadd.f32 %v2805_v0, %v2804_v62  ;;  %v1565_v62 = vpop.permute.xlu0 %1564 }
 0x109   : > { %v2735_v3 = vpop.f32.mrf.mxu0  ;;  %v2807_v4 = vpop.f32.mrf.mxu1 }
 0x10a   : > { %3864 = vst [vmem:[#allocation9_spill] sm:$0xff] %v3545_v2 }
 0x10b   : > { %v2736_v5 = vpop.f32.mrf.mxu0  ;;  %v2808_v6 = vpop.f32.mrf.mxu1 }
 0x10c   : > { %v3547_v7 = vadd.f32 %v2736_v5, %v2735_v3  ;;  %v3549_v8 = vadd.f32 %v2808_v6, %v2807_v4  ;;  %v1575_v5 = vpop.permute.xlu1 %1574 }
 0x10d   : > { %v2738_v9 = vpop.f32.mrf.mxu0  ;;  %v2826_v10 = vpop.f32.mrf.mxu1 }
 0x10e   : > { %3865 = vst [vmem:[#allocation10_spill] sm:$0xff] %v3549_v8 }
 0x10f   : > { %v2739_v11 = vpop.f32.mrf.mxu0  ;;  %v2827_v12 = vpop.f32.mrf.mxu1 }
 0x110   : > { %v3551_v13 = vadd.f32 %v2739_v11, %v2738_v9  ;;  %v2828_v14 = vadd.f32 %v2827_v12, %v2826_v10  ;;  %v1570_v10 = vpop.permute.xlu0 %1569 }
 0x111   : > { %v2741_v15 = vpop.f32.mrf.mxu0  ;;  %v3553_v16 = vpop.f32.mrf.mxu1 }
 0x112   : > { %v3555_v17 = vadd.f32 %v2828_v14, %v2716_v29 }
 0x113   : > { %v2742_v18 = vpop.f32.mrf.mxu0  ;;  %v3557_v19 = vpop.f32.mrf.mxu1 }
 0x114   : > { %v3559_v20 = vadd.f32 %v2742_v18, %v2741_v15  ;;  %v1580_v18 = vpop.permute.xlu1 %1579 }
 0x115   : > { %v2744_v21 = vpop.f32.mrf.mxu0  ;;  %v2832_v22 = vpop.f32.mrf.mxu1 }
 0x117   : > { %v2745_v23 = vpop.f32.mrf.mxu0  ;;  %v2833_v24 = vpop.f32.mrf.mxu1 }
 0x118   : > { %v3561_v25 = vadd.f32 %v2745_v23, %v2744_v21  ;;  %v3607_v21 = vpop.permute.xlu0 %1584  ;;  %v2834_v42 = vadd.f32 %v2833_v24, %v2832_v22  ;;  %v2831_v22 = vadd.f32 %v3557_v19, %v3553_v16 }
 0x119   : > { %v2747_v26 = vpop.f32.mrf.mxu0  ;;  %v2835_v27 = vpop.f32.mrf.mxu1 }
 0x11b   : > { %v2748_v28 = vpop.f32.mrf.mxu0  ;;  %v2836_v31 = vpop.f32.mrf.mxu1 }
 0x11c   : > { %v3563_v32 = vadd.f32 %v2748_v28, %v2747_v26  ;;  %v1595_v8 = vpop.permute.xlu0 %1594 }
 0x11d   : > { %v2750_v33 = vpop.f32.mrf.mxu0  ;;  %v3565_v29 = vpop.f32.mrf.mxu1 }
 0x11f   : > { %v2751_v34 = vpop.f32.mrf.mxu0  ;;  %v3567_v37 = vpop.f32.mrf.mxu1 }
 0x120   : > { %v3569_v38 = vadd.f32 %v2751_v34, %v2750_v33  ;;  %v2840_v19 = vadd.f32 %v3567_v37, %v3565_v29 }
 0x121   : > { %v2753_v39 = vpop.f32.mrf.mxu0  ;;  %v3571_v40 = vpop.f32.mrf.mxu1 }
 0x123   : > { %v2754_v43 = vpop.f32.mrf.mxu0  ;;  %v3573_v44 = vpop.f32.mrf.mxu1 }
 0x124   : > { %v3575_v45 = vadd.f32 %v2754_v43, %v2753_v39  ;;  %v3621_v43 = vpop.permute.xlu1 %1589  ;;  %v2843_v29 = vadd.f32 %v3573_v44, %v3571_v40 }
 0x125   : > { %v3577_v46 = vpop.f32.mrf.mxu0  ;;  %v2844_v49 = vpop.f32.mrf.mxu1 }
 0x126   : > { %3866 = vst [vmem:[#allocation11_spill] sm:$0xff] %v3575_v45 }
 0x127   : > { %v3579_v50 = vpop.f32.mrf.mxu0  ;;  %v2845_v51 = vpop.f32.mrf.mxu1 }
 0x129   : > { %v3581_v52 = vpop.f32.mrf.mxu0  ;;  %v2847_v55 = vpop.f32.mrf.mxu1 }
 0x12b   : > { %v3583_v56 = vpop.f32.mrf.mxu0  ;;  %v2848_v57 = vpop.f32.mrf.mxu1 }
 0x12d   : > { %v3585_v58 = vpop.f32.mrf.mxu0  ;;  %v3587_v61 = vpop.f32.mrf.mxu1 }
 0x12e   : > { %3867 = vst [vmem:[#allocation12_spill] sm:$0xff] %v3585_v58 }
 0x12f   : > { %v3589_v63 = vpop.f32.mrf.mxu0  ;;  %v3591_v0 = vpop.f32.mrf.mxu1 }
 0x130   : > { %3868 = vst [vmem:[#allocation13_spill] sm:$0xff] %v3589_v63  ;;  %v2837_v63 = vadd.f32 %v2836_v31, %v2835_v27  ;;  %v1722_v31 = vmul.f32 %v1565_v62, %v3555_v17 }
 0x131   : > { %v3593_v3 = vpop.f32.mrf.mxu0  ;;  %v3595_v4 = vpop.f32.mrf.mxu1 }
 0x132   : > { %3869 = vst [vmem:[#allocation14_spill] sm:$0xff] %v3593_v3 }
 0x133   : > { %v3597_v6 = vpop.f32.mrf.mxu0  ;;  %v3599_v9 = vpop.f32.mrf.mxu1 }
 0x134   : > { %3870 = vst [vmem:[#allocation15_spill] sm:$0xff] %v3597_v6  ;;  %v3635_v6 = vpop.permute.xlu1 %1599 }
 0x135   : > { %v3601_v11 = vpop.f32.mrf.mxu0  ;;  %v3603_v12 = vpop.f32.mrf.mxu1 }
 0x136   : > { %3871 = vst [vmem:[#allocation16_spill] sm:$0xff] %v3601_v11 }
 0x137   : > { %v3605_v14 = vpop.f32.mrf.mxu0  ;;  %v2857_v15 = vpop.f32.mrf.mxu1 }
 0x138   : > { %3872 = vst [vmem:[#allocation17_spill] sm:$0xff] %v3605_v14  ;;  %v3654_v24 = vpop.permute.xlu1 %1609 }
 0x139   : > { %v3609_v23 = vpop.f32.mrf.mxu0  ;;  %v3611_v26 = vpop.f32.mrf.mxu1 }
 0x13a   : > { %3873 = vst [vmem:[#allocation18_spill] sm:$0xff] %v3609_v23 }
 0x13b   : > { %v3613_v28 = vpop.f32.mrf.mxu0  ;;  %v3615_v33 = vpop.f32.mrf.mxu1 }
 0x13c   : > { %3874 = vst [vmem:[#allocation19_spill] sm:$0xff] %v3613_v28 }
 0x13d   : > { %v3617_v34 = vpop.f32.mrf.mxu0  ;;  %v3619_v39 = vpop.f32.mrf.mxu1 }
 0x13e   : > { %3875 = vst [vmem:[#allocation20_spill] sm:$0xff] %v3617_v34  ;;  %v3637_v34 = vpop.permute.xlu0 %1604 }
 0x13f   : > { %v3623_v2 = vpop.f32.mrf.mxu0  ;;  %v3625_v60 = vpop.f32.mrf.mxu1 }
 0x140   : > { %3876 = vst [vmem:[#allocation21_spill] sm:$0xff] %v3623_v2 }
 0x141   : > { %v3627_v54 = vpop.f32.mrf.mxu0  ;;  %v3629_v48 = vpop.f32.mrf.mxu1 }
 0x142   : > { %3877 = vst [vmem:[#allocation22_spill] sm:$0xff] %v3627_v54  ;;  %v1265_v54 = vadd.f32 %v2834_v42, %v3527_v41  ;;  %v3656_v45 = vpop.permute.xlu0 %1614  ;;  %v1268_v41 = vadd.f32 %v2837_v63, %v3531_v47 }
 0x143   : > { %v3631_v36 = vpop.f32.mrf.mxu0  ;;  %v3633_v30 = vpop.f32.mrf.mxu1 }
 0x144   : > { %3878 = vst [vmem:[#allocation23_spill] sm:$0xff] %v3631_v36  ;;  %v1724_v11 = vmul.f32 %v1575_v5, %v1265_v54  ;;  %v3673_v54 = vld [vmem:[%s3855_s4] ss:$0 sm:$0xff]  ;;  %v1725_v5 = vmul.f32 %v1580_v18, %v1268_v41 }
 0x145   : > { %v3639_v3 = vpop.f32.mrf.mxu0  ;;  %v3641_v28 = vpop.f32.mrf.mxu1 }
 0x146   : > { %3879 = vst [vmem:[#allocation24_spill] sm:$0xff] %v3639_v3  ;;  %v2846_v3 = vadd.f32 %v2845_v51, %v2844_v49  ;;  %v2849_v51 = vadd.f32 %v2848_v57, %v2847_v55  ;;  %v3679_v17 = vpop.permute.xlu0 %1624 }
 0x147   : > { %v3643_v2 = vpop.f32.mrf.mxu0  ;;  %v3645_v23 = vpop.f32.mrf.mxu1 }
 0x148   : > { %3880 = vst [vmem:[#allocation25_spill] sm:$0xff] %v3643_v2  ;;  %v1281_v49 = vadd.f32 %v2846_v3, %v3543_v1  ;;  %v1273_v3 = vadd.f32 %v2840_v19, %v3535_v53 }
 0x149   : > { %v3648_v58 = vpop.f32.mrf.mxu0  ;;  %v3650_v36 = vpop.f32.mrf.mxu1 }
 0x14a   : > { %3881 = vst [vmem:[#allocation26_spill] sm:$0xff] %v3648_v58  ;;  %v1260_v58 = vadd.f32 %v2831_v22, %v3523_v35  ;;  %v1728_v41 = vmul.f32 %v1595_v8, %v1281_v49  ;;  %v2852_v49 = vadd.f32 %v3591_v0, %v3587_v61  ;;  %v2855_v61 = vadd.f32 %v3599_v9, %v3595_v4 }
 0x14b   : > { %v3658_v14 = vpop.f32.mrf.mxu0  ;;  %v3660_v2 = vpop.f32.mrf.mxu1 }
 0x14c   : > { %3882 = vst [vmem:[#allocation27_spill] sm:$0xff] %v3658_v14  ;;  %v3677_v14 = vpop.permute.xlu1 %1619  ;;  %v1723_v55 = vmul.f32 %v1570_v10, %v1260_v58  ;;  %v1276_v58 = vadd.f32 %v2843_v29, %v3539_v59  ;;  %v2861_v59 = vadd.f32 %v3615_v33, %v3611_v26 }
 0x14d   : > { %v3663_v42 = vpop.f32.mrf.mxu1  ;;  %v2964_v27 = vpop.f32.mrf.mxu0 }
 0x14e   : > { %v1941_v16 = vadd.f32 %v2964_v27, %v1724_v11  ;;  %v1284_v11 = vadd.f32 %v2849_v51, %v3547_v7  ;;  %v2858_v27 = vadd.f32 %v2857_v15, %v3603_v12  ;;  %v3698_v7 = vpop.permute.xlu0 %1634  ;;  %v1726_v15 = vmul.f32 %v3607_v21, %v1273_v3 }
 0x14f   : > { %v3675_v47 = vpop.f32.mrf.mxu1  ;;  %v1932_v63 = vpop.f32.mrf.mxu0 }
 0x150   : > { %v1933_v35 = vadd.f32 %v1932_v63, %v1722_v31  ;;  %v2068_v57 = vadd.f32 %v3673_v54, %v1941_v16  ;;  %v3696_v53 = vpop.permute.xlu1 %1629  ;;  %v1297_v29 = vadd.f32 %v2858_v27, %v3561_v25  ;;  %v1289_v25 = vadd.f32 %v2852_v49, %v3551_v13 }
 0x151   : > { %v3683_v37 = vpop.f32.mrf.mxu1  ;;  %v2965_v1 = vpop.f32.mrf.mxu0  ;;  %v2758_v13 = vadd.f32 %v3579_v50, %v3577_v46  ;;  %v2873_v50 = vadd.f32 %v3660_v2, %v3650_v36 }
 0x152   : > { %v1944_v62 = vadd.f32 %v2965_v1, %v1725_v5  ;;  %v2066_v40 = vadd.f32 %v3673_v54, %v1933_v35  ;;  %v2100_v19 = vmax.f32 %v2068_v57, 0.0  ;;  %v1729_v35 = vmul.f32 %v3635_v6, %v1284_v11  ;;  %v3728_v27 = vpop.permute.xlu0 %1644 }
 0x153   : > { %v3688_v18 = vpop.f32.mrf.mxu1  ;;  %v1935_v22 = vpop.f32.mrf.mxu0  ;;  %v1727_v6 = vmul.f32 %v3621_v43, %v1276_v58  ;;  %v1300_v11 = vadd.f32 %v2861_v59, %v3563_v32  ;;  %v1732_v43 = vmul.f32 %v3656_v45, %v1297_v29  ;;  %v1292_v32 = vadd.f32 %v2855_v61, %v3559_v20 }
 0x154   : > { %v2069_v44 = vadd.f32 %v3673_v54, %v1944_v62  ;;  %v1936_v31 = vadd.f32 %v1935_v22, %v1723_v55  ;;  %v2098_v21 = vmax.f32 %v2066_v40, 0.0  ;;  %v2870_v22 = vadd.f32 %v3645_v23, %v3641_v28 }
 0x155   : > { %v3694_v10 = vpop.f32.mrf.mxu1  ;;  %v2968_v16 = vpop.f32.mrf.mxu0  ;;  %v1730_v45 = vmul.f32 %v3637_v34, %v1289_v25  ;;  %v1733_v20 = vmul.f32 %v3677_v14, %v1300_v11 }
 0x156   : > { %v2101_v51 = vmax.f32 %v2069_v44, 0.0  ;;  %v2067_v8 = vadd.f32 %v3673_v54, %v1936_v31  ;;  %v1957_v12 = vadd.f32 %v2968_v16, %v1728_v41  ;;  %v3726_v41 = vpop.permute.xlu1 %1639  ;;  %v1655_v14 = vpop.permute.xlu0 %1654 }
 0x157   : > { %v2881_v63 = vpop.f32.mrf.mxu1  ;;  %v1948_v5 = vpop.f32.mrf.mxu0 }
 0x158   : > { %v2611_v1 = vpack.c.bf16 %v2101_v51, %v2100_v19  ;;  %v2099_v55 = vmax.f32 %v2067_v8, 0.0  ;;  %v1949_v0 = vadd.f32 %v1948_v5, %v1726_v15  ;;  %v2072_v62 = vadd.f32 %v3673_v54, %v1957_v12 }
 0x159   : > { %v3717_v26 = vpop.f32.mrf.mxu1  ;;  %v2969_v33 = vpop.f32.mrf.mxu0  ;;  %v2864_v8 = vadd.f32 %v3625_v60, %v3619_v39  ;;  %v1313_v12 = vadd.f32 %v2870_v22, %v2758_v13  ;;  %v2867_v60 = vadd.f32 %v3633_v30, %v3629_v48 }
 0x15a   : > { %2683 = vst [vmem:[%s3711_s20 + $0x8] sm:$0xff] %v2611_v1   ;;  %v2606_v57 = vpack.c.bf16 %v2099_v55, %v2098_v21  ;;  %v1960_v3 = vadd.f32 %v2969_v33, %v1729_v35  ;;  %v2070_v40 = vadd.f32 %v3673_v54, %v1949_v0  ;;  %v2104_v58 = vmax.f32 %v2072_v62, 0.0  ;;  %v3754_v21 = vpop.permute.xlu1 %1649 }
 0x15b   : > { %v2884_v4 = vpop.f32.mrf.mxu1  ;;  %v1951_v9 = vpop.f32.mrf.mxu0  ;;  %v2761_v35 = vadd.f32 %v3583_v56, %v3581_v52  ;;  %v1731_v55 = vmul.f32 %v3654_v24, %v1292_v32  ;;  %v1305_v52 = vadd.f32 %v2864_v8, %v3569_v38  ;;  %v2882_v56 = vadd.f32 %v2881_v63, %v3694_v10  ;;  %v3885_v24 = vld [vmem:[#allocation11_spill] sm:$0xff] }
 0x15c   : > { %2607 = vst [vmem:[%s3711_s20] sm:$0xff] %v2606_v57   ;;  %v2073_v44 = vadd.f32 %v3673_v54, %v1960_v3  ;;  %v1952_v31 = vadd.f32 %v1951_v9, %v1727_v6  ;;  %v2102_v49 = vmax.f32 %v2070_v40, 0.0  ;;  %v1736_v61 = vmul.f32 %v3698_v7, %v1313_v12  ;;  %v3883_v3 = vld [vmem:[#allocation16_spill] sm:$0xff]  ;;  %v3884_v6 = vld [vmem:[#allocation17_spill] sm:$0xff] }
 0x15d   : > { %v3737_v23 = vpop.f32.mrf.mxu1  ;;  %v2972_v28 = vpop.f32.mrf.mxu0  ;;  %v1316_v0 = vadd.f32 %v2873_v50, %v2761_v35  ;;  %v2770_v25 = vadd.f32 %v3884_v6, %v3883_v3  ;;  %v1308_v11 = vadd.f32 %v2867_v60, %v3885_v24  ;;  %v2876_v7 = vadd.f32 %v3675_v47, %v3663_v42  ;;  %v3886_v12 = vld [vmem:[#allocation12_spill] sm:$0xff]  ;;  %v3888_v42 = vld [vmem:[#allocation18_spill] sm:$0xff]  ;;  %v3889_v47 = vld [vmem:[#allocation19_spill] sm:$0xff] }
 0x15e   : > { %v2105_v16 = vmax.f32 %v2073_v44, 0.0  ;;  %v2071_v19 = vadd.f32 %v3673_v54, %v1952_v31  ;;  %v1973_v51 = vadd.f32 %v2972_v28, %v1732_v43  ;;  %v2885_v31 = vadd.f32 %v2884_v4, %v3717_v26  ;;  %v1660_v28 = vpop.permute.xlu1 %1659  ;;  %v3890_v35 = vld [vmem:[#allocation14_spill] sm:$0xff]  ;;  %v3891_v60 = vld [vmem:[#allocation15_spill] sm:$0xff] }
 0x15f   : > { %v3742_v15 = vpop.f32.mrf.mxu1  ;;  %v1964_v46 = vpop.f32.mrf.mxu0  ;;  %v1329_v44 = vadd.f32 %v2882_v56, %v2770_v25  ;;  %v1734_v13 = vmul.f32 %v3679_v17, %v1305_v52  ;;  %v1737_v8 = vmul.f32 %v3726_v41, %v1316_v0  ;;  %v2879_v26 = vadd.f32 %v3688_v18, %v3683_v37 }
 0x160   : > { %v2621_v59 = vpack.c.bf16 %v2105_v16, %v2104_v58  ;;  %v2103_v5 = vmax.f32 %v2071_v19, 0.0  ;;  %v1965_v39 = vadd.f32 %v1964_v46, %v1730_v45  ;;  %v2076_v36 = vadd.f32 %v3673_v54, %v1973_v51  ;;  %v3775_v58 = vpop.permute.xlu0 %1664  ;;  %v3887_v45 = vld [vmem:[#allocation13_spill] sm:$0xff] }
 0x161   : > { %v3752_v29 = vpop.f32.mrf.mxu1  ;;  %v2973_v34 = vpop.f32.mrf.mxu0  ;;  %v2764_v46 = vadd.f32 %v3887_v45, %v3886_v12  ;;  %v1735_v41 = vmul.f32 %v3696_v53, %v1308_v11  ;;  %v2888_v11 = vadd.f32 %v3742_v15, %v3737_v23 }
 0x162   : > { %2685 = vst [vmem:[%s3711_s20 + $0x18] sm:$0xff] %v2621_v59   ;;  %v2616_v1 = vpack.c.bf16 %v2103_v5, %v2102_v49  ;;  %v1976_v2 = vadd.f32 %v2973_v34, %v1733_v20  ;;  %v2074_v33 = vadd.f32 %v3673_v54, %v1965_v39  ;;  %v2108_v10 = vmax.f32 %v2076_v36, 0.0 }
 0x163   : > { %v3761_v30 = vpop.f32.mrf.mxu1  ;;  %v1967_v48 = vpop.f32.mrf.mxu0  ;;  %v2773_v20 = vadd.f32 %v3889_v47, %v3888_v42  ;;  %v2767_v39 = vadd.f32 %v3891_v60, %v3890_v35  ;;  %v1321_v34 = vadd.f32 %v2876_v7, %v2764_v46  ;;  %v3898_v42 = vld [vmem:[#allocation22_spill] sm:$0xff]  ;;  %v3899_v47 = vld [vmem:[#allocation23_spill] sm:$0xff] }
 0x164   : > { %2684 = vst [vmem:[%s3711_s20 + $0x10] sm:$0xff] %v2616_v1   ;;  %v2077_v57 = vadd.f32 %v3673_v54, %v1976_v2  ;;  %v1968_v62 = vadd.f32 %v1967_v48, %v1731_v55  ;;  %v2106_v16 = vmax.f32 %v2074_v33, 0.0  ;;  %v1740_v55 = vmul.f32 %v1655_v14, %v1329_v44  ;;  %v3892_v48 = vld [vmem:[#allocation24_spill] sm:$0xff]  ;;  %v1675_v3 = vpop.permute.xlu0 %1674 }
 0x165   : > { %v2892_v38 = vpop.f32.mrf.mxu1  ;;  %v2976_v22 = vpop.f32.mrf.mxu0  ;;  %v1332_v1 = vadd.f32 %v2885_v31, %v2773_v20  ;;  %v1324_v33 = vadd.f32 %v2879_v26, %v2767_v39  ;;  %v2891_v23 = vadd.f32 %v3761_v30, %v3752_v29  ;;  %v2779_v20 = vadd.f32 %v3899_v47, %v3898_v42 }
 0x166   : > { %v2109_v63 = vmax.f32 %v2077_v57, 0.0  ;;  %v2075_v9 = vadd.f32 %v3673_v54, %v1968_v62  ;;  %v1989_v40 = vadd.f32 %v2976_v22, %v1736_v61  ;;  %v3893_v61 = vld [vmem:[#allocation25_spill] sm:$0xff]  ;;  %v1670_v62 = vpop.permute.xlu1 %1669 }
 0x167   : > { %v2893_v43 = vpop.f32.mrf.mxu1  ;;  %v1980_v32 = vpop.f32.mrf.mxu0  ;;  %v2782_v0 = vadd.f32 %v3893_v61, %v3892_v48  ;;  %v1739_v46 = vmul.f32 %v3754_v21, %v1324_v33  ;;  %v1340_v35 = vadd.f32 %v2891_v23, %v2779_v20 }
 0x168   : > { %v2631_v19 = vpack.c.bf16 %v2109_v63, %v2108_v10  ;;  %v2107_v51 = vmax.f32 %v2075_v9, 0.0  ;;  %v1981_v17 = vadd.f32 %v1980_v32, %v1734_v13  ;;  %v2080_v59 = vadd.f32 %v3673_v54, %v1989_v40  ;;  %v3895_v13 = vld [vmem:[#allocation21_spill] sm:$0xff]  ;;  %v1685_v29 = vpop.permute.xlu0 %1684 }
 0x169   : > { %v2895_v4 = vpop.f32.mrf.mxu1  ;;  %v2977_v50 = vpop.f32.mrf.mxu0  ;;  %v2894_v37 = vadd.f32 %v2893_v43, %v2892_v38  ;;  %v1738_v10 = vmul.f32 %v3728_v27, %v1321_v34  ;;  %v1741_v9 = vmul.f32 %v1660_v28, %v1332_v1  ;;  %v3894_v43 = vld [vmem:[#allocation20_spill] sm:$0xff] }
 0x16a   : > { %2687 = vst [vmem:[%s3711_s20 + $0x28] sm:$0xff] %v2631_v19   ;;  %v2626_v49 = vpack.c.bf16 %v2107_v51, %v2106_v16  ;;  %v1992_v5 = vadd.f32 %v2977_v50, %v1737_v8  ;;  %v2078_v18 = vadd.f32 %v3673_v54, %v1981_v17  ;;  %v2112_v6 = vmax.f32 %v2080_v59, 0.0  ;;  %v3896_v16 = vld [vmem:[#allocation26_spill] sm:$0xff]  ;;  %v3897_v19 = vld [vmem:[#allocation27_spill] sm:$0xff] }
 0x16b   : > { %v2896_v36 = vpop.f32.mrf.mxu1  ;;  %v1983_v2 = vpop.f32.mrf.mxu0  ;;  %v1345_v40 = vadd.f32 %v2894_v37, %v2782_v0  ;;  %v2776_v32 = vadd.f32 %v3895_v13, %v3894_v43  ;;  %v2785_v51 = vadd.f32 %v3897_v19, %v3896_v16  ;;  %v3902_v13 = vld [vmem:[#allocation4_spill] sm:$0xff] }
 0x16c   : > { %2686 = vst [vmem:[%s3711_s20 + $0x20] sm:$0xff] %v2626_v49   ;;  %v2081_v52 = vadd.f32 %v3673_v54, %v1992_v5  ;;  %v1984_v56 = vadd.f32 %v1983_v2, %v1735_v41  ;;  %v2897_v38 = vadd.f32 %v2896_v36, %v2895_v4  ;;  %v2110_v7 = vmax.f32 %v2078_v18, 0.0  ;;  %v1680_v49 = vpop.permute.xlu1 %1679 }
 0x16d   : > { %v2898_v53 = vpop.f32.mrf.mxu1  ;;  %v2980_v57 = vpop.f32.mrf.mxu0  ;;  %v1337_v26 = vadd.f32 %v2888_v11, %v2776_v32  ;;  %v1744_v41 = vmul.f32 %v1675_v3, %v1345_v40 }
 0x16e   : > { %v2113_v25 = vmax.f32 %v2081_v52, 0.0  ;;  %v2079_v24 = vadd.f32 %v3673_v54, %v1984_v56  ;;  %v2005_v14 = vadd.f32 %v2980_v57, %v1740_v55  ;;  %v1348_v17 = vadd.f32 %v2897_v38, %v2785_v51  ;;  %v3900_v38 = vld [vmem:[#allocation5_spill] sm:$0xff] }
 0x16f   : > { %v2899_v22 = vpop.f32.mrf.mxu1  ;;  %v1996_v63 = vpop.f32.mrf.mxu0  ;;  %v1742_v37 = vmul.f32 %v3775_v58, %v1337_v26 }
 0x170   : > { %v2641_v44 = vpack.c.bf16 %v2113_v25, %v2112_v6  ;;  %v2111_v31 = vmax.f32 %v2079_v24, 0.0  ;;  %v1997_v15 = vadd.f32 %v1996_v63, %v1738_v10  ;;  %v2084_v28 = vadd.f32 %v3673_v54, %v2005_v14  ;;  %v1690_v24 = vpop.permute.xlu1 %1689  ;;  %v1695_v14 = vpop.permute.xlu0 %1694  ;;  %v3901_v10 = vld [vmem:[#allocation3_spill] sm:$0xff] }
 0x171   : > { %v2901_v8 = vpop.f32.mrf.mxu1  ;;  %v2981_v12 = vpop.f32.mrf.mxu0  ;;  %v2900_v2 = vadd.f32 %v2899_v22, %v2898_v53  ;;  %v1745_v52 = vmul.f32 %v1680_v49, %v1348_v17  ;;  %v1743_v25 = vmul.f32 %v1670_v62, %v1340_v35 }
 0x172   : > { %2689 = vst [vmem:[%s3711_s20 + $0x38] sm:$0xff] %v2641_v44   ;;  %v2636_v27 = vpack.c.bf16 %v2111_v31, %v2110_v7  ;;  %v2008_v45 = vadd.f32 %v2981_v12, %v1741_v9  ;;  %v2082_v30 = vadd.f32 %v3673_v54, %v1997_v15  ;;  %v2116_v21 = vmax.f32 %v2084_v28, 0.0  ;;  %v3903_v15 = vld [vmem:[#allocation6_spill] sm:$0xff] }
 0x173   : > { %v2902_v4 = vpop.f32.mrf.mxu1  ;;  %v1999_v50 = vpop.f32.mrf.mxu0  ;;  %v1353_v63 = vadd.f32 %v2900_v2, %v3901_v10 }
 0x174   : > { %2688 = vst [vmem:[%s3711_s20 + $0x30] sm:$0xff] %v2636_v27   ;;  %v2085_v59 = vadd.f32 %v3673_v54, %v2008_v45  ;;  %v2000_v5 = vadd.f32 %v1999_v50, %v1739_v46  ;;  %v2114_v56 = vmax.f32 %v2082_v30, 0.0  ;;  %v2903_v33 = vadd.f32 %v2902_v4, %v2901_v8  ;;  %v1700_v42 = vpop.permute.xlu1 %1699 }
 0x175   : > { %v2904_v60 = vpop.f32.mrf.mxu1  ;;  %v2984_v39 = vpop.f32.mrf.mxu0  ;;  %v1746_v45 = vmul.f32 %v1685_v29, %v1353_v63  ;;  %v3906_v63 = vld [vmem:[#allocation9_spill] sm:$0xff] }
 0x176   : > { %v2117_v34 = vmax.f32 %v2085_v59, 0.0  ;;  %v2083_v1 = vadd.f32 %v3673_v54, %v2000_v5  ;;  %v2021_v36 = vadd.f32 %v2984_v39, %v1744_v41  ;;  %v1356_v32 = vadd.f32 %v2903_v33, %v3902_v13  ;;  %v3904_v5 = vld [vmem:[#allocation7_spill] sm:$0xff] }
 0x177   : > { %v2905_v55 = vpop.f32.mrf.mxu1  ;;  %v2012_v18 = vpop.f32.mrf.mxu0 }
 0x178   : > { %v2651_v48 = vpack.c.bf16 %v2117_v34, %v2116_v21  ;;  %v2115_v61 = vmax.f32 %v2083_v1, 0.0  ;;  %v2906_v0 = vadd.f32 %v2905_v55, %v2904_v60  ;;  %v2013_v57 = vadd.f32 %v2012_v18, %v1742_v37  ;;  %v1705_v34 = vpop.permute.xlu0 %1704 }
 0x179   : > { %v2907_v3 = vpop.f32.mrf.mxu1  ;;  %v2985_v6 = vpop.f32.mrf.mxu0  ;;  %v2088_v11 = vadd.f32 %v3673_v54, %v2021_v36  ;;  %v1747_v35 = vmul.f32 %v1690_v24, %v1356_v32 }
 0x17a   : > { %2691 = vst [vmem:[%s3711_s20 + $0x48] sm:$0xff] %v2651_v48   ;;  %v2646_v53 = vpack.c.bf16 %v2115_v61, %v2114_v56  ;;  %v1361_v58 = vadd.f32 %v2906_v0, %v3900_v38  ;;  %v2024_v22 = vadd.f32 %v2985_v6, %v1745_v52  ;;  %v2086_v9 = vadd.f32 %v3673_v54, %v2013_v57  ;;  %v3905_v52 = vld [vmem:[#allocation8_spill] sm:$0xff]  ;;  %v1710_v6 = vpop.permute.xlu1 %1709 }
 0x17b   : > { %v2908_v40 = vpop.f32.mrf.mxu1  ;;  %v2015_v7 = vpop.f32.mrf.mxu0  ;;  %v2120_v51 = vmax.f32 %v2088_v11, 0.0 }
 0x17c   : > { %2690 = vst [vmem:[%s3711_s20 + $0x40] sm:$0xff] %v2646_v53   ;;  %v2089_v44 = vadd.f32 %v3673_v54, %v2024_v22  ;;  %v2909_v31 = vadd.f32 %v2908_v40, %v2907_v3  ;;  %v2016_v62 = vadd.f32 %v2015_v7, %v1743_v25  ;;  %v1748_v43 = vmul.f32 %v1695_v14, %v1361_v58  ;;  %v1715_v22 = vpop.permute.xlu0 %1714 }
 0x17d   : > { %v2910_v16 = vpop.f32.mrf.mxu1  ;;  %v2988_v19 = vpop.f32.mrf.mxu0  ;;  %v2118_v47 = vmax.f32 %v2086_v9, 0.0 }
 0x17e   : > { %v2121_v23 = vmax.f32 %v2089_v44, 0.0  ;;  %v1364_v8 = vadd.f32 %v2909_v31, %v3903_v15  ;;  %v2087_v12 = vadd.f32 %v3673_v54, %v2016_v62  ;;  %v2037_v27 = vadd.f32 %v2988_v19, %v1748_v43 }
 0x17f   : > { %v2911_v28 = vpop.f32.mrf.mxu1  ;;  %v2028_v46 = vpop.f32.mrf.mxu0 }
 0x180   : > { %v2661_v20 = vpack.c.bf16 %v2121_v23, %v2120_v51  ;;  %v2119_v26 = vmax.f32 %v2087_v12, 0.0  ;;  %v2912_v17 = vadd.f32 %v2911_v28, %v2910_v16  ;;  %v2029_v4 = vadd.f32 %v2028_v46, %v1746_v45  ;;  %v3907_v16 = vld [vmem:[#allocation10_spill] sm:$0xff]  ;;  %v1720_v23 = vpop.permute.xlu1 %1719 }
 0x181   : > { %v2913_v50 = vpop.f32.mrf.mxu1  ;;  %v1749_v49 = vmul.f32 %v1700_v42, %v1364_v8  ;;  %v2989_v30 = vpop.f32.mrf.mxu0  ;;  %v2092_v60 = vadd.f32 %v3673_v54, %v2037_v27 }
 0x182   : > { %2693 = vst [vmem:[%s3711_s20 + $0x58] sm:$0xff] %v2661_v20   ;;  %v2656_v59 = vpack.c.bf16 %v2119_v26, %v2118_v47  ;;  %v1369_v41 = vadd.f32 %v2912_v17, %v3904_v5  ;;  %v2090_v1 = vadd.f32 %v3673_v54, %v2029_v4 }
 0x183   : > { %v2040_v39 = vadd.f32 %v2989_v30, %v1749_v49  ;;  %v2914_v29 = vpop.f32.mrf.mxu1  ;;  %v2031_v21 = vpop.f32.mrf.mxu0  ;;  %v2124_v0 = vmax.f32 %v2092_v60, 0.0 }
 0x184   : > { %2692 = vst [vmem:[%s3711_s20 + $0x50] sm:$0xff] %v2656_v59   ;;  %v2915_v36 = vadd.f32 %v2914_v29, %v2913_v50  ;;  %v2032_v2 = vadd.f32 %v2031_v21, %v1747_v35  ;;  %v1750_v61 = vmul.f32 %v1705_v34, %v1369_v41  ;;  %v2122_v25 = vmax.f32 %v2090_v1, 0.0 }
 0x185   : > { %v2093_v55 = vadd.f32 %v3673_v54, %v2040_v39  ;;  %v2916_v37 = vpop.f32.mrf.mxu1  ;;  %v2992_v18 = vpop.f32.mrf.mxu0 }
 0x186   : > { %v1372_v56 = vadd.f32 %v2915_v36, %v3905_v52  ;;  %v2091_v48 = vadd.f32 %v3673_v54, %v2032_v2 }
 0x187   : > { %v2125_v33 = vmax.f32 %v2093_v55, 0.0  ;;  %v2917_v57 = vpop.f32.mrf.mxu1  ;;  %v2044_v3 = vpop.f32.mrf.mxu0 }
 0x188   : > { %v2123_v24 = vmax.f32 %v2091_v48, 0.0  ;;  %v2918_v14 = vadd.f32 %v2917_v57, %v2916_v37  ;;  %v2045_v53 = vadd.f32 %v2044_v3, %v1750_v61  ;;  %v1751_v40 = vmul.f32 %v1710_v6, %v1372_v56 }
 0x189   : > { %v2671_v11 = vpack.c.bf16 %v2125_v33, %v2124_v0  ;;  %v2919_v38 = vpop.f32.mrf.mxu1  ;;  %v2993_v58 = vpop.f32.mrf.mxu0 }
 0x18a   : > { %v2666_v10 = vpack.c.bf16 %v2123_v24, %v2122_v25  ;;  %v1377_v9 = vadd.f32 %v2918_v14, %v3906_v63  ;;  %v2094_v62 = vadd.f32 %v3673_v54, %v2045_v53 }
 0x18b   : > { %2695 = vst [vmem:[%s3711_s20 + $0x68] sm:$0xff] %v2671_v11   ;;  %v2920_v7 = vpop.f32.mrf.mxu1  ;;  %v2047_v44 = vpop.f32.mrf.mxu0 }
 0x18c   : > { %2694 = vst [vmem:[%s3711_s20 + $0x60] sm:$0xff] %v2666_v10   ;;  %v1752_v31 = vmul.f32 %v1715_v22, %v1377_v9  ;;  %v2921_v43 = vadd.f32 %v2920_v7, %v2919_v38  ;;  %v2048_v13 = vadd.f32 %v2047_v44, %v1751_v40  ;;  %v2126_v8 = vmax.f32 %v2094_v62, 0.0 }
 0x18e   : > { %v2053_v32 = vadd.f32 %v2992_v18, %v1752_v31  ;;  %v1380_v19 = vadd.f32 %v2921_v43, %v3907_v16  ;;  %v2095_v51 = vadd.f32 %v3673_v54, %v2048_v13 }
 0x190   : > { %v2096_v15 = vadd.f32 %v3673_v54, %v2053_v32  ;;  %v1753_v12 = vmul.f32 %v1720_v23, %v1380_v19  ;;  %v2127_v27 = vmax.f32 %v2095_v51, 0.0 }
 0x192   : > { %v2056_v28 = vadd.f32 %v2993_v58, %v1753_v12  ;;  %v2676_v45 = vpack.c.bf16 %v2127_v27, %v2126_v8  ;;  %v2128_v42 = vmax.f32 %v2096_v15, 0.0 }
 0x194   : > { %v2097_v46 = vadd.f32 %v3673_v54, %v2056_v28  ;;  %2696 = vst [vmem:[%s3711_s20 + $0x70] sm:$0xff] %v2676_v45  }
 0x196   : > { %v2129_v47 = vmax.f32 %v2097_v46, 0.0 }
 0x198   : > { %v2681_v20 = vpack.c.bf16 %v2129_v47, %v2128_v42 }
 0x19a   : > { %2697 = vst [vmem:[%s3711_s20 + $0x78] sm:$0xff] %v2681_v20  }
 0x19b PF: > { %s16_s23 = sadd.s32 1, %s3211_s23   ;;  %s3908_s21 = smov %s3207_s22 }
 0x19c   : > { %p13_p5 = scmp.ge.s32.totalorder %s16_s23, 4   ;;  %s3909_s22 = smov %s3911_s24 }
 0x19e   :  { %15 = sbr.rel (!%p13_p5) target bundleno = 2 (0x2), region = 91 }

// kernel: p1gcn0_forward.3
= control target key start
LH: loop header
LB: loop body
LE: loop exit
PB: predicated region body
PF: predicated region fallthrough
CT: control target
= control target key end

     0   :  { %s3413_s21 = smov 0   ;;  %s3415_s22 = smov 0   ;;  %s4378_s0 = inlined_call_operand.vmem [shape: bf16[512,128], index: 0, kind: input, shape index: {}]   ;;  %s4379_s1 = inlined_call_operand.vmem [shape: bf16[512,512], index: 1, kind: input, shape index: {}]   ;;  %s4380_s2 = inlined_call_operand.vmem [shape: bf16[512,128], index: 2, kind: input, shape index: {}]   ;;  %s4381_s3 = inlined_call_operand.vmem [shape: bf16[128,128], index: 3, kind: input, shape index: {}]   ;;  %s4382_s4 = inlined_call_operand.vmem [shape: f32[1,128], index: 4, kind: input, shape index: {}]   ;;  %s4383_s5 = inlined_call_operand.vmem [shape: f32[512,1], index: 5, kind: input, shape index: {}]   ;;  %s4384_s6 = inlined_call_operand.vmem [shape: f32[512,128], index: 6, kind: output, shape index: {}]  }
   0x1   :  { %s3417_s23 = smov 0  }
   0x2 LB: > { %s28_s24 = sadd.s32 1, %s3371_s22  ;;  %p2600_p0 = scmp.ge.s32.totalorder %s3375_s23, 1  ;;  %s3375_s23 = sphi %s3417_s23, %s16_s23   ;;  %s3371_s22 = sphi %s3415_s22, %s4438_s22   ;;  %s3367_s21 = sphi %s3413_s21, %s4437_s21  }
   0x3   : > { %p30_p1 = scmp.ge.s32.totalorder %s28_s24, 2  ;;  %p266_p2 = scmp.lt.s32.totalorder %s3375_s23, 3 }
   0x5   : > { %s4440_s24 = smov (%p30_p1, %s28_s24), 0  ;;  %p267_p3 = pnand %p2600_p0, %p266_p2 }
   0x7   : > { %270 = sbr.rel (%p267_p3) target bundleno = 721 (0x2d1), region = 44 }
   0xc   : > { %v3073_v0 = vld [vmem:[%s4380_s2 + $0x78] sm:$0xff]   ;;  %s2601_s27 = sshll.u32 %s3367_s21, 5  ;;  %v3075_v2 = vld [vmem:[%s4380_s2 + $0x70] sm:$0xff]   ;;  %v3077_v4 = vld [vmem:[%s4380_s2 + $0x68] sm:$0xff]   ;;  %v3377_v5 = vmov 0  }
   0xd   : > { %v3074_v1 = vld [vmem:[%s4380_s2 + $0x38] sm:$0xff]   ;;  %2734 = vmatprep.subr.bf16.mxu0 %v3073_v0  ;;  %3030 = vmatprep.subr.bf16.mxu1 %v3073_v0  ;;  %v3076_v3 = vld [vmem:[%s4380_s2 + $0x30] sm:$0xff]   ;;  %p317_p4 = scmp.lt.s32.totalorder %s2601_s27, 63  ;;  %v3078_v6 = vld [vmem:[%s4380_s2 + $0x28] sm:$0xff]  }
   0xe   : > { %2735 = vmatpush3.bf16.msra.mxu0 %v3074_v1  ;;  %3038 = vmatpush3.bf16.msra.mxu1 %v3074_v1  ;;  %v3079_v7 = vld [vmem:[%s4380_s2 + $0x60] sm:$0xff]   ;;  %v3081_v9 = vld [vmem:[%s4380_s2 + $0x58] sm:$0xff]   ;;  %v3083_v11 = vld [vmem:[%s4380_s2 + $0x50] sm:$0xff]  }
   0xf   : > { %2736 = vmatprep.subr.bf16.mxu0 %v3075_v2  ;;  %3031 = vmatprep.subr.bf16.mxu1 %v3075_v2  ;;  %s4442_s27 = smov (!%p317_p4, %s2601_s27), 63  ;;  %v3080_v8 = vld [vmem:[%s4380_s2 + $0x20] sm:$0xff]   ;;  %v3082_v10 = vld [vmem:[%s4380_s2 + $0x18] sm:$0xff]   ;;  %v3084_v14 = vld [vmem:[%s4380_s2 + $0x10] sm:$0xff]  }
  0x10   : > { %3072 = vset.pattern.permute.xlu1 %v3377_v5  ;;  %3071 = vset.pattern.permute.xlu0 %v3377_v5  ;;  %s2733_s18 = sshll.u32 %s4442_s27, 4  ;;  %v3085_v15 = vld [vmem:[%s4380_s2 + $0x48] sm:$0xff]   ;;  %v3087_v17 = vld [vmem:[%s4380_s2 + $0x40] sm:$0xff]   ;;  %v3095_v19 = vld [vmem:[%s4380_s2 + $0xf8] sm:$0xff]   ;;  %s2602_s9 = sshll.u32 %s4442_s27, 2 }
  0x11   : > { %s3467_s26 = scalar_lea.vmem %s4379_s1, %s2733_s18  ;;  %v3086_v16 = vld [vmem:[%s4380_s2 + $0x8] sm:$0xff]   ;;  %v3088_v18 = vld [vmem:[%s4380_s2] sm:$0xff]   ;;  %v3096_v21 = vld [vmem:[%s4381_s3 + $0x38] sm:$0xff]   ;;  %s2607_s10 = sshll.u32 %s4442_s27, 3 }
  0x12   : > { %2737 = vmatpush3.bf16.msra.mxu0 %v3076_v3  ;;  %3039 = vmatpush3.bf16.msra.mxu1 %v3076_v3  ;;  %v3091_v12 = vld [vmem:[%s3467_s26 + $0x4] ss:$16 sps:$4 sm:$0xff]   ;;  %v3089_v20 = vld [vmem:[%s3467_s26] ss:$16 sps:$4 sm:$0xff]   ;;  %v3097_v23 = vld [vmem:[%s4380_s2 + $0xb8] sm:$0xff]   ;;  %s3593_s13 = scalar_lea.vmem %s4378_s0, %s2602_s9  ;;  %s3600_s16 = scalar_lea.vmem %s4383_s5, %s2607_s10 }
  0x13   : > { %2738 = vmatprep.subr.bf16.mxu0 %v3077_v4  ;;  %3032 = vmatprep.subr.bf16.mxu1 %v3077_v4  ;;  %v3094_v13 = vld [vmem:[%s3467_s26 + $0x184] ss:$16 sps:$4 sm:$0xff]   ;;  %v3092_v22 = vld [vmem:[%s3467_s26 + $0x180] ss:$16 sps:$4 sm:$0xff]   ;;  %v3106_v30 = vld [vmem:[%s4380_s2 + $0xe8] sm:$0xff]   ;;  %s4303_s20 = scalar_lea.vmem %s4384_s6, %s2607_s10 }
  0x14   : > { %1093 = vmatprep.mubr.bf16.mxu0 %v3091_v12  ;;  %1189 = vmatprep.mubr.bf16.mxu1 %v3094_v13  ;;  %v3098_v24 = vld [vmem:[%s4380_s2 + $0xf0] sm:$0xff]   ;;  %v3107_v32 = vld [vmem:[%s4380_s2 + $0xa8] sm:$0xff]   ;;  %v3108_v34 = vld [vmem:[%s4380_s2 + $0xe0] sm:$0xff]  }
  0x15   : > { %v3100_v25 = vld [vmem:[%s3467_s26 + $0x24] ss:$16 sps:$4 sm:$0xff]   ;;  %v3104_v29 = vld [vmem:[%s3467_s26 + $0x20] ss:$16 sps:$4 sm:$0xff]   ;;  %v3128_v36 = vld [vmem:[%s4381_s3 + $0x28] sm:$0xff]  }
  0x16   : > { %2739 = vmatpush3.bf16.msra.mxu0 %v3078_v6  ;;  %3040 = vmatpush3.bf16.msra.mxu1 %v3078_v6  ;;  %v3102_v26 = vld [vmem:[%s3467_s26 + $0x1a4] ss:$16 sps:$4 sm:$0xff]   ;;  %v3105_v31 = vld [vmem:[%s3467_s26 + $0x1a0] ss:$16 sps:$4 sm:$0xff]   ;;  %v3117_v39 = vld [vmem:[%s4380_s2 + $0xd8] sm:$0xff]  }
  0x17   : > { %2740 = vmatprep.subr.bf16.mxu0 %v3079_v7  ;;  %3033 = vmatprep.subr.bf16.mxu1 %v3079_v7  ;;  %v3109_v27 = vld [vmem:[%s4381_s3 + $0x30] sm:$0xff]   ;;  %v3110_v37 = vld [vmem:[%s4380_s2 + $0xa0] sm:$0xff]   ;;  %v3118_v41 = vld [vmem:[%s4380_s2 + $0x98] sm:$0xff]  }
  0x18   : > { %v3099_v28 = vld [vmem:[%s4380_s2 + $0xb0] sm:$0xff]   ;;  %v3138_v45 = vld [vmem:[%s4381_s3 + $0x20] sm:$0xff]   ;;  %v3127_v49 = vld [vmem:[%s4380_s2 + $0xc8] sm:$0xff]  }
  0x19   : > { %v3111_v33 = vld [vmem:[%s3467_s26 + $0x44] ss:$16 sps:$4 sm:$0xff]   ;;  %v3115_v38 = vld [vmem:[%s3467_s26 + $0x40] ss:$16 sps:$4 sm:$0xff]   ;;  %v3129_v50 = vld [vmem:[%s4380_s2 + $0x88] sm:$0xff]  }
  0x1a   : > { %2741 = vmatpush3.bf16.msra.mxu0 %v3080_v8  ;;  %3041 = vmatpush3.bf16.msra.mxu1 %v3080_v8  ;;  %v3113_v35 = vld [vmem:[%s3467_s26 + $0x1c4] ss:$16 sps:$4 sm:$0xff]   ;;  %v3116_v40 = vld [vmem:[%s3467_s26 + $0x1c0] ss:$16 sps:$4 sm:$0xff]   ;;  %v3151_v53 = vld [vmem:[%s4381_s3 + $0x18] sm:$0xff]  }
  0x1b   : > { %2742 = vmatprep.subr.bf16.mxu0 %v3081_v9  ;;  %3034 = vmatprep.subr.bf16.mxu1 %v3081_v9  ;;  %v3119_v42 = vld [vmem:[%s4380_s2 + $0xd0] sm:$0xff]   ;;  %v3130_v51 = vld [vmem:[%s4380_s2 + $0xc0] sm:$0xff]   ;;  %v3136_v54 = vld [vmem:[%s3467_s26 + $0xc] ss:$16 sps:$4 sm:$0xff]  }
  0x1c   : > { %v3121_v43 = vld [vmem:[%s3467_s26 + $0x64] ss:$16 sps:$4 sm:$0xff]   ;;  %v3125_v47 = vld [vmem:[%s3467_s26 + $0x60] ss:$16 sps:$4 sm:$0xff]   ;;  %v3134_v57 = vld [vmem:[%s3467_s26 + $0x8] ss:$16 sps:$4 sm:$0xff]  }
  0x1d   : > { %v3123_v44 = vld [vmem:[%s3467_s26 + $0x1e4] ss:$16 sps:$4 sm:$0xff]   ;;  %v3126_v48 = vld [vmem:[%s3467_s26 + $0x1e0] ss:$16 sps:$4 sm:$0xff]   ;;  %v3141_v60 = vld [vmem:[%s3467_s26 + $0x2c] ss:$16 sps:$4 sm:$0xff]  }
  0x1e   : > { %2743 = vmatpush3.bf16.msra.mxu0 %v3082_v10  ;;  %3042 = vmatpush3.bf16.msra.mxu1 %v3082_v10  ;;  %v3120_v46 = vld [vmem:[%s4380_s2 + $0x90] sm:$0xff]   ;;  %v3131_v55 = vld [vmem:[%s4380_s2 + $0x80] sm:$0xff]   ;;  %v3171_v61 = vld [vmem:[%s4381_s3 + $0x8] sm:$0xff]  }
  0x1f   : > { %2744 = vmatprep.subr.bf16.mxu0 %v3083_v11  ;;  %3035 = vmatprep.subr.bf16.mxu1 %v3083_v11  ;;  %v3132_v52 = vld [vmem:[%s3467_s26 + $0x84] ss:$16 sps:$4 sm:$0xff]   ;;  %v3137_v58 = vld [vmem:[%s3467_s26 + $0x80] ss:$16 sps:$4 sm:$0xff]   ;;  %v3144_v0 = vld [vmem:[%s3467_s26 + $0x28] ss:$16 sps:$4 sm:$0xff]  }
  0x20   : > { %v3158_v56 = vld [vmem:[%s4381_s3 + $0x10] sm:$0xff]   ;;  %v3178_v63 = vld [vmem:[%s4381_s3] sm:$0xff]   ;;  %v3147_v2 = vld [vmem:[%s3467_s26 + $0x4c] ss:$16 sps:$4 sm:$0xff]  }
  0x21   : > { %v3139_v59 = vld [vmem:[%s3467_s26 + $0xa4] ss:$16 sps:$4 sm:$0xff]   ;;  %v3143_v62 = vld [vmem:[%s3467_s26 + $0xa0] ss:$16 sps:$4 sm:$0xff]   ;;  %v3150_v5 = vld [vmem:[%s3467_s26 + $0x48] ss:$16 sps:$4 sm:$0xff]  }
  0x22   : > { %2745 = vmatpush3.bf16.msra.mxu0 %v3084_v14  ;;  %3043 = vmatpush3.bf16.msra.mxu1 %v3084_v14  ;;  %v3145_v1 = vld [vmem:[%s3467_s26 + $0xc4] ss:$16 sps:$4 sm:$0xff]   ;;  %v3149_v3 = vld [vmem:[%s3467_s26 + $0xc0] ss:$16 sps:$4 sm:$0xff]   ;;  %v3154_v7 = vld [vmem:[%s3467_s26 + $0x6c] ss:$16 sps:$4 sm:$0xff]  }
  0x23   : > { %2746 = vmatprep.subr.bf16.mxu0 %v3085_v15  ;;  %3036 = vmatprep.subr.bf16.mxu1 %v3085_v15  ;;  %v1500_v4 = vld [vmem:[%s3600_s16 + $0x10] sm:$0xff]  ;;  %v1498_v8 = vld [vmem:[%s3600_s16] sm:$0xff]  ;;  %v1501_v9 = vld [vmem:[%s3600_s16 + $0x18] sm:$0xff] }
  0x24   : > { %1574 = vperm.xlu1 %3072, %v1500_v4   ;;  %v3152_v6 = vld [vmem:[%s3467_s26 + $0xe4] ss:$16 sps:$4 sm:$0xff]   ;;  %1564 = vperm.xlu0 %3071, %v1498_v8   ;;  %v1499_v10 = vld [vmem:[%s3600_s16 + $0x8] sm:$0xff]  ;;  %v3156_v13 = vld [vmem:[%s3467_s26 + $0xe0] ss:$16 sps:$4 sm:$0xff]  }
  0x25   : > { %v1503_v11 = vld [vmem:[%s3600_s16 + $0x28] sm:$0xff]  ;;  %v1502_v12 = vld [vmem:[%s3600_s16 + $0x20] sm:$0xff]  ;;  %v3204_v8 = vld [vmem:[%s3593_s13 + $0x38] sm:$0xff]  }
  0x26   : > { %2747 = vmatpush3.bf16.msra.mxu0 %v3086_v16  ;;  %3044 = vmatpush3.bf16.msra.mxu1 %v3086_v16  ;;  %v3157_v14 = vld [vmem:[%s3467_s26 + $0x68] ss:$16 sps:$4 sm:$0xff]   ;;  %v3159_v15 = vld [vmem:[%s3467_s26 + $0x104] ss:$16 sps:$4 sm:$0xff]   ;;  %v3161_v16 = vld [vmem:[%s3467_s26 + $0x8c] ss:$16 sps:$4 sm:$0xff]  }
  0x27   : > { %2748 = vmatprep.subr.bf16.mxu0 %v3087_v17  ;;  %3037 = vmatprep.subr.bf16.mxu1 %v3087_v17  ;;  %v1505_v17 = vld [vmem:[%s3600_s16 + $0x38] sm:$0xff]  ;;  %v3199_v4 = vld [vmem:[%s3593_s13 + $0x28] sm:$0xff]  }
  0x28   : > { %1579 = vperm.xlu1 %3072, %v1501_v9   ;;  %1569 = vperm.xlu0 %3071, %v1499_v10   ;;  %v3205_v9 = vld [vmem:[%s3467_s26 + $0x18c] ss:$16 sps:$4 sm:$0xff]   ;;  %v3207_v10 = vld [vmem:[%s3593_s13 + $0x40] sm:$0xff]  }
  0x2a   : > { %2749 = vmatpush3.bf16.msra.mxu0 %v3088_v18  ;;  %3045 = vmatpush3.bf16.msra.mxu1 %v3088_v18  ;;  %v1504_v18 = vld [vmem:[%s3600_s16 + $0x30] sm:$0xff] }
  0x2b   : > { %2846 = vmatprep.subr.bf16.mxu1 %v3095_v19  ;;  %2982 = vmatprep.subr.bf16.mxu0 %v3096_v21  ;;  %v3163_v19 = vld [vmem:[%s3467_s26 + $0x100] ss:$16 sps:$4 sm:$0xff]  }
  0x2c   : > { %1589 = vperm.xlu1 %3072, %v1503_v11   ;;  %1584 = vperm.xlu0 %3071, %v1502_v12   ;;  %v3208_v11 = vld [vmem:[%s3467_s26 + $0x188] ss:$16 sps:$4 sm:$0xff]  }
  0x2d   : > { %1094 = vmatmul.mubr.bf16.vlgmr.msra.gmra.mxu0 %v3089_v20  ;;  %1190 = vmatmul.mubr.bf16.vlgmr.msra.gmra.mxu1 %v3092_v22  ;;  %v1507_v20 = vld [vmem:[%s3600_s16 + $0x48] sm:$0xff] }
  0x2e   : > { %2847 = vmatpush3.bf16.msra.mxu1 %v3097_v23  ;;  %2983 = vmatpush3.bf16.msra.mxu0 %v3096_v21  ;;  %v1506_v21 = vld [vmem:[%s3600_s16 + $0x40] sm:$0xff]  ;;  %v3164_v22 = vld [vmem:[%s3467_s26 + $0x88] ss:$16 sps:$4 sm:$0xff]  }
  0x2f   : > { %2848 = vmatprep.subr.bf16.mxu1 %v3098_v24  ;;  %1101 = vmatprep.mubr.bf16.mxu0 %v3100_v25  ;;  %v3165_v23 = vld [vmem:[%s3467_s26 + $0x124] ss:$16 sps:$4 sm:$0xff]   ;;  %v3167_v24 = vld [vmem:[%s3467_s26 + $0xac] ss:$16 sps:$4 sm:$0xff]  }
  0x30   : > { %1197 = vmatprep.mubr.bf16.mxu1 %v3102_v26  ;;  %2984 = vmatprep.subr.bf16.mxu0 %v3109_v27  ;;  %v1509_v25 = vld [vmem:[%s3600_s16 + $0x58] sm:$0xff]  ;;  %v1508_v26 = vld [vmem:[%s3600_s16 + $0x50] sm:$0xff]  ;;  %v3209_v12 = vld [vmem:[%s3593_s13 + $0x48] sm:$0xff]  }
  0x31   : > { %1599 = vperm.xlu1 %3072, %v1505_v17   ;;  %1594 = vperm.xlu0 %3071, %v1504_v18   ;;  %v3215_v17 = vld [vmem:[%s3467_s26 + $0x1cc] ss:$16 sps:$4 sm:$0xff]   ;;  %v3217_v18 = vld [vmem:[%s3593_s13 + $0x60] sm:$0xff]  }
  0x32   : > { %2849 = vmatpush3.bf16.msra.mxu1 %v3099_v28  ;;  %2985 = vmatpush3.bf16.msra.mxu0 %v3109_v27  ;;  %v1511_v27 = vld [vmem:[%s3600_s16 + $0x68] sm:$0xff]  ;;  %v1510_v28 = vld [vmem:[%s3600_s16 + $0x60] sm:$0xff] }
  0x33   : > { %2850 = vmatprep.subr.bf16.mxu1 %v3106_v30  ;;  %2986 = vmatprep.subr.bf16.mxu0 %v3128_v36  ;;  %v3170_v30 = vld [vmem:[%s3467_s26 + $0xa8] ss:$16 sps:$4 sm:$0xff]  }
  0x35   : > { %1102 = vmatmul.mubr.bf16.gmra.mxu0 %v3104_v29  ;;  %1198 = vmatmul.mubr.bf16.gmra.mxu1 %v3105_v31  ;;  %v3169_v29 = vld [vmem:[%s3467_s26 + $0x120] ss:$16 sps:$4 sm:$0xff]   ;;  %v3172_v31 = vld [vmem:[%s3467_s26 + $0x144] ss:$16 sps:$4 sm:$0xff]  }
  0x36   : > { %2851 = vmatpush3.bf16.msra.mxu1 %v3107_v32  ;;  %1109 = vmatprep.mubr.bf16.mxu0 %v3111_v33  ;;  %v3174_v32 = vld [vmem:[%s3467_s26 + $0xcc] ss:$16 sps:$4 sm:$0xff]  }
  0x37   : > { %2852 = vmatprep.subr.bf16.mxu1 %v3108_v34  ;;  %1205 = vmatprep.mubr.bf16.mxu1 %v3113_v35  ;;  %v1513_v33 = vld [vmem:[%s3600_s16 + $0x78] sm:$0xff]  ;;  %v1512_v34 = vld [vmem:[%s3600_s16 + $0x70] sm:$0xff]  ;;  %v1515_v35 = vld [vmem:[%s3600_s16 + $0x88] sm:$0xff] }
  0x38   : > { %2987 = vmatpush3.bf16.msra.mxu0 %v3128_v36  ;;  %1609 = vperm.xlu1 %3072, %v1507_v20   ;;  %v1514_v36 = vld [vmem:[%s3600_s16 + $0x80] sm:$0xff]  ;;  %v3219_v20 = vld [vmem:[%s3593_s13 + $0x68] sm:$0xff]  }
  0x39   : > { %2988 = vmatprep.subr.bf16.mxu0 %v3138_v45  ;;  %1604 = vperm.xlu0 %3071, %v1506_v21   ;;  %v3220_v21 = vld [vmem:[%s3467_s26 + $0x1ec] ss:$16 sps:$4 sm:$0xff]  }
  0x3a   : > { %2853 = vmatpush3.bf16.msra.mxu1 %v3110_v37  ;;  %v3176_v37 = vld [vmem:[%s3467_s26 + $0x140] ss:$16 sps:$4 sm:$0xff]  }
  0x3b   : > { %2854 = vmatprep.subr.bf16.mxu1 %v3117_v39  ;;  %v3179_v39 = vld [vmem:[%s3467_s26 + $0x164] ss:$16 sps:$4 sm:$0xff]  }
  0x3c   : > { %2989 = vmatpush3.bf16.msra.mxu0 %v3138_v45  ;;  %1619 = vperm.xlu1 %3072, %v1509_v25   ;;  %v3183_v45 = vld [vmem:[%s3467_s26 + $0x160] ss:$16 sps:$4 sm:$0xff]  }
  0x3d   : > { %1110 = vmatmul.mubr.bf16.gmra.mxu0 %v3115_v38  ;;  %1206 = vmatmul.mubr.bf16.gmra.mxu1 %v3116_v40  ;;  %v3177_v38 = vld [vmem:[%s3467_s26 + $0xc8] ss:$16 sps:$4 sm:$0xff]   ;;  %v3181_v40 = vld [vmem:[%s3467_s26 + $0xec] ss:$16 sps:$4 sm:$0xff]  }
  0x3e   : > { %2855 = vmatpush3.bf16.msra.mxu1 %v3118_v41  ;;  %1117 = vmatprep.mubr.bf16.mxu0 %v3121_v43  ;;  %v1517_v41 = vld [vmem:[%s3600_s16 + $0x98] sm:$0xff]  ;;  %v1519_v43 = vld [vmem:[%s3600_s16 + $0xa8] sm:$0xff] }
  0x3f   : > { %2856 = vmatprep.subr.bf16.mxu1 %v3119_v42  ;;  %1213 = vmatprep.mubr.bf16.mxu1 %v3123_v44  ;;  %v1516_v42 = vld [vmem:[%s3600_s16 + $0x90] sm:$0xff]  ;;  %v1518_v44 = vld [vmem:[%s3600_s16 + $0xa0] sm:$0xff] }
  0x40   : > { %2990 = vmatprep.subr.bf16.mxu0 %v3151_v53  ;;  %1614 = vperm.xlu0 %3071, %v1508_v26  }
  0x41   : > { %2991 = vmatpush3.bf16.msra.mxu0 %v3151_v53  ;;  %1629 = vperm.xlu1 %3072, %v1511_v27   ;;  %v3188_v53 = vld [vmem:[%s3467_s26 + $0x108] ss:$16 sps:$4 sm:$0xff]  }
  0x42   : > { %2857 = vmatpush3.bf16.msra.mxu1 %v3120_v46  ;;  %2992 = vmatprep.subr.bf16.mxu0 %v3158_v56  ;;  %v3184_v46 = vld [vmem:[%s3467_s26 + $0xe8] ss:$16 sps:$4 sm:$0xff]  }
  0x43   : > { %2858 = vmatprep.subr.bf16.mxu1 %v3127_v49  ;;  %v1521_v49 = vld [vmem:[%s3600_s16 + $0xb8] sm:$0xff] }
  0x44   : > { %1624 = vperm.xlu0 %3071, %v1510_v28  }
  0x45   : > { %1118 = vmatmul.mubr.bf16.gmra.mxu0 %v3125_v47  ;;  %1214 = vmatmul.mubr.bf16.gmra.mxu1 %v3126_v48  ;;  %v3185_v47 = vld [vmem:[%s3467_s26 + $0x10c] ss:$16 sps:$4 sm:$0xff]   ;;  %v3187_v48 = vld [vmem:[%s3593_s13] sm:$0xff]  }
  0x46   : > { %2859 = vmatpush3.bf16.msra.mxu1 %v3129_v50  ;;  %1125 = vmatprep.mubr.bf16.mxu0 %v3132_v52  ;;  %v1520_v50 = vld [vmem:[%s3600_s16 + $0xb0] sm:$0xff]  ;;  %v1522_v52 = vld [vmem:[%s3600_s16 + $0xc0] sm:$0xff] }
  0x47   : > { %2860 = vmatprep.subr.bf16.mxu1 %v3130_v51  ;;  %1254 = vmatprep.mubr.bf16.mxu1 %v3136_v54  ;;  %v1523_v51 = vld [vmem:[%s3600_s16 + $0xc8] sm:$0xff] }
  0x48   : > { %2993 = vmatpush3.bf16.msra.mxu0 %v3158_v56  ;;  %1639 = vperm.xlu1 %3072, %v1513_v33   ;;  %v3189_v54 = vld [vmem:[%s3593_s13 + $0x8] sm:$0xff]   ;;  %v3192_v56 = vld [vmem:[%s3593_s13 + $0x10] sm:$0xff]  }
  0x49   : > { %2994 = vmatprep.subr.bf16.mxu0 %v3171_v61  ;;  %1634 = vperm.xlu0 %3071, %v1512_v34  }
  0x4a   : > { %2861 = vmatpush3.bf16.msra.mxu1 %v3131_v55  ;;  %v3190_v55 = vld [vmem:[%s3467_s26 + $0x12c] ss:$16 sps:$4 sm:$0xff]  }
  0x4c   : > { %2995 = vmatpush3.bf16.msra.mxu0 %v3171_v61  ;;  %1649 = vperm.xlu1 %3072, %v1515_v35   ;;  %v3193_v61 = vld [vmem:[%s3467_s26 + $0x128] ss:$16 sps:$4 sm:$0xff]  }
  0x4d   : > { %1126 = vmatmul.mubr.bf16.gmra.mxu0 %v3137_v58  ;;  %1255 = vmatmul.mubr.bf16.vlgmr.msra.gmra.mxu1 %v3134_v57  ;;  %v1525_v57 = vld [vmem:[%s3600_s16 + $0xd8] sm:$0xff]  ;;  %v1524_v58 = vld [vmem:[%s3600_s16 + $0xd0] sm:$0xff] }
  0x4e   : > { %1133 = vmatprep.mubr.bf16.mxu0 %v3139_v59  ;;  %1262 = vmatprep.mubr.bf16.mxu1 %v3141_v60  ;;  %v1527_v59 = vld [vmem:[%s3600_s16 + $0xe8] sm:$0xff]  ;;  %v1526_v60 = vld [vmem:[%s3600_s16 + $0xe0] sm:$0xff] }
  0x4f   : > { %2996 = vmatprep.subr.bf16.mxu0 %v3178_v63  ;;  %1644 = vperm.xlu0 %3071, %v1514_v36  }
  0x50   : > { %2997 = vmatpush3.bf16.msra.mxu0 %v3178_v63  ;;  %1659 = vperm.xlu1 %3072, %v1517_v41   ;;  %v3195_v63 = vld [vmem:[%s3467_s26 + $0x14c] ss:$16 sps:$4 sm:$0xff]  }
  0x53   : > { %1654 = vperm.xlu0 %3071, %v1516_v42  }
  0x54   : > { %1669 = vperm.xlu1 %3072, %v1519_v43  }
  0x55   : > { %1134 = vmatmul.mubr.bf16.gmra.mxu0 %v3143_v62  ;;  %1263 = vmatmul.mubr.bf16.gmra.mxu1 %v3144_v0  ;;  %v3194_v62 = vld [vmem:[%s3593_s13 + $0x18] sm:$0xff]   ;;  %v3197_v0 = vld [vmem:[%s3593_s13 + $0x20] sm:$0xff]  }
  0x56   : > { %1141 = vmatprep.mubr.bf16.mxu0 %v3145_v1  ;;  %1270 = vmatprep.mubr.bf16.mxu1 %v3147_v2  ;;  %v1529_v1 = vld [vmem:[%s3600_s16 + $0xf8] sm:$0xff]  ;;  %v1528_v2 = vld [vmem:[%s3600_s16 + $0xf0] sm:$0xff] }
  0x57   : > { %1664 = vperm.xlu0 %3071, %v1518_v44  }
  0x58   : > { %1679 = vperm.xlu1 %3072, %v1521_v49  }
  0x5b   : > { %1674 = vperm.xlu0 %3071, %v1520_v50  }
  0x5c   : > { %1689 = vperm.xlu1 %3072, %v1523_v51  }
  0x5d   : > { %1142 = vmatmul.mubr.bf16.gmra.mxu0 %v3149_v3  ;;  %1271 = vmatmul.mubr.bf16.gmra.mxu1 %v3150_v5  ;;  %v3198_v3 = vld [vmem:[%s3467_s26 + $0x148] ss:$16 sps:$4 sm:$0xff]   ;;  %v3200_v5 = vld [vmem:[%s3467_s26 + $0x16c] ss:$16 sps:$4 sm:$0xff]  }
  0x5e   : > { %1149 = vmatprep.mubr.bf16.mxu0 %v3152_v6  ;;  %1278 = vmatprep.mubr.bf16.mxu1 %v3154_v7  ;;  %v3202_v6 = vld [vmem:[%s3593_s13 + $0x30] sm:$0xff]   ;;  %v3203_v7 = vld [vmem:[%s3467_s26 + $0x168] ss:$16 sps:$4 sm:$0xff]  }
  0x5f   : > { %1684 = vperm.xlu0 %3071, %v1522_v52  }
  0x60   : > { %1699 = vperm.xlu1 %3072, %v1525_v57  }
  0x63   : > { %1694 = vperm.xlu0 %3071, %v1524_v58  }
  0x64   : > { %1709 = vperm.xlu1 %3072, %v1527_v59  }
  0x65   : > { %1150 = vmatmul.mubr.bf16.gmra.mxu0 %v3156_v13  ;;  %1279 = vmatmul.mubr.bf16.gmra.mxu1 %v3157_v14  ;;  %v3210_v13 = vld [vmem:[%s3467_s26 + $0x1ac] ss:$16 sps:$4 sm:$0xff]   ;;  %v3212_v14 = vld [vmem:[%s3593_s13 + $0x50] sm:$0xff]  }
  0x66   : > { %1157 = vmatprep.mubr.bf16.mxu0 %v3159_v15  ;;  %1286 = vmatprep.mubr.bf16.mxu1 %v3161_v16  ;;  %v3213_v15 = vld [vmem:[%s3467_s26 + $0x1a8] ss:$16 sps:$4 sm:$0xff]  }
  0x67   : > { %1704 = vperm.xlu0 %3071, %v1526_v60   ;;  %v3214_v16 = vld [vmem:[%s3593_s13 + $0x58] sm:$0xff]  }
  0x68   : > { %1719 = vperm.xlu1 %3072, %v1529_v1  }
  0x6b   : > { %1714 = vperm.xlu0 %3071, %v1528_v2  }
  0x6d   : > { %1158 = vmatmul.mubr.bf16.gmra.mxu0 %v3163_v19  ;;  %1287 = vmatmul.mubr.bf16.gmra.mxu1 %v3164_v22  ;;  %v3218_v19 = vld [vmem:[%s3467_s26 + $0x1c8] ss:$16 sps:$4 sm:$0xff]   ;;  %v3222_v22 = vld [vmem:[%s3593_s13 + $0x70] sm:$0xff]  }
  0x6e   : > { %1165 = vmatprep.mubr.bf16.mxu0 %v3165_v23  ;;  %1294 = vmatprep.mubr.bf16.mxu1 %v3167_v24  ;;  %v3223_v23 = vld [vmem:[%s3467_s26 + $0x1e8] ss:$16 sps:$4 sm:$0xff]  }
  0x6f   : > { %v3224_v24 = vld [vmem:[%s3593_s13 + $0x78] sm:$0xff]  }
  0x75   : > { %1166 = vmatmul.mubr.bf16.gmra.mxu0 %v3169_v29  ;;  %1295 = vmatmul.mubr.bf16.gmra.mxu1 %v3170_v30 }
  0x76   : > { %1173 = vmatprep.mubr.bf16.mxu0 %v3172_v31  ;;  %1302 = vmatprep.mubr.bf16.mxu1 %v3174_v32 }
  0x7d   : > { %1174 = vmatmul.mubr.bf16.gmra.mxu0 %v3176_v37  ;;  %1303 = vmatmul.mubr.bf16.gmra.mxu1 %v3177_v38 }
  0x7e   : > { %1181 = vmatprep.mubr.bf16.mxu0 %v3179_v39  ;;  %1310 = vmatprep.mubr.bf16.mxu1 %v3181_v40 }
  0x85   : > { %1182 = vmatmul.mubr.bf16.gmra.mxu0 %v3183_v45  ;;  %1311 = vmatmul.mubr.bf16.gmra.mxu1 %v3184_v46 }
  0x86   : > { %1318 = vmatprep.mubr.bf16.mxu1 %v3185_v47  ;;  %2998 = vmatprep.mubr.bf16.mxu0 %v3187_v48 }
  0x8d   : > { %1319 = vmatmul.mubr.bf16.gmra.mxu1 %v3188_v53  ;;  %2999 = vmatmul.mubr.bf16.vlgmr.msra.gmra.mxu0 %v3189_v54 }
  0x8e   : > { %1326 = vmatprep.mubr.bf16.mxu1 %v3190_v55  ;;  %3002 = vmatprep.mubr.bf16.mxu0 %v3192_v56 }
  0x95   : > { %1327 = vmatmul.mubr.bf16.gmra.mxu1 %v3193_v61  ;;  %3003 = vmatmul.mubr.bf16.gmra.mxu0 %v3194_v62 }
  0x96   : > { %1334 = vmatprep.mubr.bf16.mxu1 %v3195_v63  ;;  %3006 = vmatprep.mubr.bf16.mxu0 %v3197_v0 }
  0x9d   : > { %1335 = vmatmul.mubr.bf16.gmra.mxu1 %v3198_v3  ;;  %3007 = vmatmul.mubr.bf16.gmra.mxu0 %v3199_v4 }
  0x9e   : > { %1342 = vmatprep.mubr.bf16.mxu1 %v3200_v5  ;;  %3010 = vmatprep.mubr.bf16.mxu0 %v3202_v6 }
  0xa5   : > { %1343 = vmatmul.mubr.bf16.gmra.mxu1 %v3203_v7  ;;  %3011 = vmatmul.mubr.bf16.gmra.mxu0 %v3204_v8 }
  0xa6   : > { %1350 = vmatprep.mubr.bf16.mxu1 %v3205_v9  ;;  %3014 = vmatprep.mubr.bf16.mxu0 %v3207_v10 }
  0xad   : > { %1351 = vmatmul.mubr.bf16.gmra.mxu1 %v3208_v11  ;;  %3015 = vmatmul.mubr.bf16.gmra.mxu0 %v3209_v12 }
  0xae   : > { %1358 = vmatprep.mubr.bf16.mxu1 %v3210_v13  ;;  %3018 = vmatprep.mubr.bf16.mxu0 %v3212_v14 }
  0xb5   : > { %1359 = vmatmul.mubr.bf16.gmra.mxu1 %v3213_v15  ;;  %3019 = vmatmul.mubr.bf16.gmra.mxu0 %v3214_v16 }
  0xb6   : > { %1366 = vmatprep.mubr.bf16.mxu1 %v3215_v17  ;;  %3022 = vmatprep.mubr.bf16.mxu0 %v3217_v18 }
  0xbd   : > { %1367 = vmatmul.mubr.bf16.gmra.mxu1 %v3218_v19  ;;  %3023 = vmatmul.mubr.bf16.gmra.mxu0 %v3219_v20 }
  0xbe   : > { %1374 = vmatprep.mubr.bf16.mxu1 %v3220_v21  ;;  %3026 = vmatprep.mubr.bf16.mxu0 %v3222_v22 }
  0xc5   : > { %1375 = vmatmul.mubr.bf16.gmra.mxu1 %v3223_v23  ;;  %3027 = vmatmul.mubr.bf16.gmra.mxu0 %v3224_v24 }
  0xed   : > { %v2750_v25 = vpop.f32.mrf.mxu0  ;;  %v2822_v26 = vpop.f32.mrf.mxu1 }
  0xef   : > { %v2751_v27 = vpop.f32.mrf.mxu0  ;;  %v2823_v28 = vpop.f32.mrf.mxu1 }
  0xf0   : > { %v3688_v29 = vadd.f32 %v2751_v27, %v2750_v25  ;;  %v3690_v30 = vadd.f32 %v2823_v28, %v2822_v26 }
  0xf1   : > { %v2753_v31 = vpop.f32.mrf.mxu0  ;;  %v2825_v32 = vpop.f32.mrf.mxu1 }
  0xf2   : > { %4385 = vst [vmem:[#allocation3_spill] sm:$0xff] %v3690_v30 }
  0xf3   : > { %v2754_v33 = vpop.f32.mrf.mxu0  ;;  %v2826_v34 = vpop.f32.mrf.mxu1 }
  0xf4   : > { %v3692_v35 = vadd.f32 %v2754_v33, %v2753_v31  ;;  %v3694_v36 = vadd.f32 %v2826_v34, %v2825_v32 }
  0xf5   : > { %v2756_v37 = vpop.f32.mrf.mxu0  ;;  %v2828_v38 = vpop.f32.mrf.mxu1 }
  0xf6   : > { %4386 = vst [vmem:[#allocation4_spill] sm:$0xff] %v3694_v36 }
  0xf7   : > { %v2757_v39 = vpop.f32.mrf.mxu0  ;;  %v2829_v40 = vpop.f32.mrf.mxu1 }
  0xf8   : > { %v3696_v41 = vadd.f32 %v2757_v39, %v2756_v37  ;;  %v3698_v42 = vadd.f32 %v2829_v40, %v2828_v38 }
  0xf9   : > { %v2759_v43 = vpop.f32.mrf.mxu0  ;;  %v2831_v44 = vpop.f32.mrf.mxu1 }
  0xfa   : > { %4387 = vst [vmem:[#allocation5_spill] sm:$0xff] %v3698_v42 }
  0xfb   : > { %v2760_v45 = vpop.f32.mrf.mxu0  ;;  %v2832_v46 = vpop.f32.mrf.mxu1 }
  0xfc   : > { %v3700_v47 = vadd.f32 %v2760_v45, %v2759_v43  ;;  %v3702_v48 = vadd.f32 %v2832_v46, %v2831_v44 }
  0xfd   : > { %v2762_v49 = vpop.f32.mrf.mxu0  ;;  %v2834_v50 = vpop.f32.mrf.mxu1 }
  0xfe   : > { %4388 = vst [vmem:[#allocation6_spill] sm:$0xff] %v3702_v48 }
  0xff   : > { %v2763_v51 = vpop.f32.mrf.mxu0  ;;  %v2835_v52 = vpop.f32.mrf.mxu1 }
 0x100   : > { %v3704_v53 = vadd.f32 %v2763_v51, %v2762_v49  ;;  %v3706_v54 = vadd.f32 %v2835_v52, %v2834_v50 }
 0x101   : > { %v2765_v55 = vpop.f32.mrf.mxu0  ;;  %v2837_v56 = vpop.f32.mrf.mxu1 }
 0x102   : > { %4389 = vst [vmem:[#allocation7_spill] sm:$0xff] %v3706_v54 }
 0x103   : > { %v2766_v57 = vpop.f32.mrf.mxu0  ;;  %v2838_v58 = vpop.f32.mrf.mxu1 }
 0x104   : > { %v3708_v59 = vadd.f32 %v2766_v57, %v2765_v55  ;;  %v3710_v60 = vadd.f32 %v2838_v58, %v2837_v56  ;;  %v1565_v57 = vpop.permute.xlu0 %1564 }
 0x105   : > { %v2768_v61 = vpop.f32.mrf.mxu0  ;;  %v2840_v62 = vpop.f32.mrf.mxu1 }
 0x106   : > { %4390 = vst [vmem:[#allocation8_spill] sm:$0xff] %v3710_v60 }
 0x107   : > { %v2769_v63 = vpop.f32.mrf.mxu0  ;;  %v2841_v0 = vpop.f32.mrf.mxu1 }
 0x108   : > { %v3712_v1 = vadd.f32 %v2769_v63, %v2768_v61  ;;  %v3714_v2 = vadd.f32 %v2841_v0, %v2840_v62  ;;  %v1575_v0 = vpop.permute.xlu1 %1574 }
 0x109   : > { %v2771_v3 = vpop.f32.mrf.mxu0  ;;  %v2843_v4 = vpop.f32.mrf.mxu1 }
 0x10a   : > { %4391 = vst [vmem:[#allocation9_spill] sm:$0xff] %v3714_v2 }
 0x10b   : > { %v2772_v5 = vpop.f32.mrf.mxu0  ;;  %v2844_v6 = vpop.f32.mrf.mxu1 }
 0x10c   : > { %v3716_v7 = vadd.f32 %v2772_v5, %v2771_v3  ;;  %v3718_v8 = vadd.f32 %v2844_v6, %v2843_v4  ;;  %v3772_v5 = vpop.permute.xlu0 %1569 }
 0x10d   : > { %v2774_v9 = vpop.f32.mrf.mxu0  ;;  %v3720_v10 = vpop.f32.mrf.mxu1 }
 0x10e   : > { %4392 = vst [vmem:[#allocation10_spill] sm:$0xff] %v3718_v8 }
 0x10f   : > { %v2775_v11 = vpop.f32.mrf.mxu0  ;;  %v3722_v12 = vpop.f32.mrf.mxu1 }
 0x110   : > { %v3724_v13 = vadd.f32 %v2775_v11, %v2774_v9 }
 0x111   : > { %v2777_v14 = vpop.f32.mrf.mxu0  ;;  %v3726_v15 = vpop.f32.mrf.mxu1 }
 0x113   : > { %v2778_v16 = vpop.f32.mrf.mxu0  ;;  %v3728_v17 = vpop.f32.mrf.mxu1 }
 0x114   : > { %v3730_v18 = vadd.f32 %v2778_v16, %v2777_v14  ;;  %v1580_v16 = vpop.permute.xlu1 %1579 }
 0x115   : > { %v2780_v19 = vpop.f32.mrf.mxu0  ;;  %v2868_v20 = vpop.f32.mrf.mxu1 }
 0x117   : > { %v2781_v21 = vpop.f32.mrf.mxu0  ;;  %v2869_v22 = vpop.f32.mrf.mxu1 }
 0x118   : > { %v3732_v23 = vadd.f32 %v2781_v21, %v2780_v19 }
 0x119   : > { %v2783_v24 = vpop.f32.mrf.mxu0  ;;  %v2871_v25 = vpop.f32.mrf.mxu1 }
 0x11b   : > { %v2784_v26 = vpop.f32.mrf.mxu0  ;;  %v2872_v27 = vpop.f32.mrf.mxu1 }
 0x11c   : > { %v3734_v28 = vadd.f32 %v2784_v26, %v2783_v24  ;;  %v3786_v24 = vpop.permute.xlu0 %1584 }
 0x11d   : > { %v2786_v31 = vpop.f32.mrf.mxu0  ;;  %v3736_v32 = vpop.f32.mrf.mxu1 }
 0x11f   : > { %v2787_v33 = vpop.f32.mrf.mxu0  ;;  %v3738_v34 = vpop.f32.mrf.mxu1 }
 0x120   : > { %v3740_v37 = vadd.f32 %v2787_v33, %v2786_v31  ;;  %v1595_v60 = vpop.permute.xlu0 %1594 }
 0x121   : > { %v2789_v38 = vpop.f32.mrf.mxu0  ;;  %v3742_v39 = vpop.f32.mrf.mxu1 }
 0x123   : > { %v2790_v40 = vpop.f32.mrf.mxu0  ;;  %v3744_v43 = vpop.f32.mrf.mxu1 }
 0x124   : > { %v3746_v44 = vadd.f32 %v2790_v40, %v2789_v38  ;;  %v3796_v40 = vpop.permute.xlu1 %1589 }
 0x125   : > { %v3748_v45 = vpop.f32.mrf.mxu0  ;;  %v2880_v46 = vpop.f32.mrf.mxu1 }
 0x126   : > { %4393 = vst [vmem:[#allocation11_spill] sm:$0xff] %v3746_v44 }
 0x127   : > { %v3750_v49 = vpop.f32.mrf.mxu0  ;;  %v2881_v50 = vpop.f32.mrf.mxu1 }
 0x128   : > { %v3810_v30 = vpop.permute.xlu1 %1599 }
 0x129   : > { %v3752_v51 = vpop.f32.mrf.mxu0  ;;  %v3754_v52 = vpop.f32.mrf.mxu1 }
 0x12b   : > { %v3756_v55 = vpop.f32.mrf.mxu0  ;;  %v3758_v56 = vpop.f32.mrf.mxu1 }
 0x12d   : > { %v3760_v58 = vpop.f32.mrf.mxu0  ;;  %v3762_v61 = vpop.f32.mrf.mxu1 }
 0x12e   : > { %4394 = vst [vmem:[#allocation12_spill] sm:$0xff] %v3760_v58  ;;  %v2873_v58 = vadd.f32 %v2872_v27, %v2871_v25 }
 0x12f   : > { %v3764_v62 = vpop.f32.mrf.mxu0  ;;  %v3766_v63 = vpop.f32.mrf.mxu1 }
 0x130   : > { %4395 = vst [vmem:[#allocation13_spill] sm:$0xff] %v3764_v62 }
 0x131   : > { %v3768_v3 = vpop.f32.mrf.mxu0  ;;  %v3770_v4 = vpop.f32.mrf.mxu1 }
 0x132   : > { %4396 = vst [vmem:[#allocation14_spill] sm:$0xff] %v3768_v3 }
 0x133   : > { %v3774_v6 = vpop.f32.mrf.mxu0  ;;  %v3776_v9 = vpop.f32.mrf.mxu1 }
 0x134   : > { %4397 = vst [vmem:[#allocation15_spill] sm:$0xff] %v3774_v6 }
 0x135   : > { %v3778_v11 = vpop.f32.mrf.mxu0  ;;  %v3780_v14 = vpop.f32.mrf.mxu1 }
 0x136   : > { %4398 = vst [vmem:[#allocation16_spill] sm:$0xff] %v3778_v11  ;;  %v3829_v11 = vpop.permute.xlu1 %1609 }
 0x137   : > { %v3782_v19 = vpop.f32.mrf.mxu0  ;;  %v3784_v21 = vpop.f32.mrf.mxu1  ;;  %4409 = vst [vmem:[#allocation27_spill] sm:$0xff] %v3829_v11 }
 0x138   : > { %4399 = vst [vmem:[#allocation17_spill] sm:$0xff] %v3782_v19  ;;  %v2098_v19 = vlaneseq }
 0x139   : > { %v3788_v26 = vpop.f32.mrf.mxu0  ;;  %v3790_v31 = vpop.f32.mrf.mxu1 }
 0x13a   : > { %4400 = vst [vmem:[#allocation18_spill] sm:$0xff] %v3788_v26  ;;  %v3816_v26 = vpop.permute.xlu0 %1604 }
 0x13b   : > { %v3792_v33 = vpop.f32.mrf.mxu0  ;;  %v3794_v38 = vpop.f32.mrf.mxu1 }
 0x13c   : > { %4401 = vst [vmem:[#allocation19_spill] sm:$0xff] %v3792_v33  ;;  %v2870_v33 = vadd.f32 %v2869_v22, %v2868_v20 }
 0x13d   : > { %v3798_v8 = vpop.f32.mrf.mxu0  ;;  %v3800_v2 = vpop.f32.mrf.mxu1 }
 0x13e   : > { %4402 = vst [vmem:[#allocation20_spill] sm:$0xff] %v3798_v8 }
 0x13f   : > { %v3802_v54 = vpop.f32.mrf.mxu0  ;;  %v3804_v48 = vpop.f32.mrf.mxu1 }
 0x140   : > { %4403 = vst [vmem:[#allocation21_spill] sm:$0xff] %v3802_v54  ;;  %v2864_v54 = vadd.f32 %v3722_v12, %v3720_v10  ;;  %v3838_v10 = vpop.permute.xlu0 %1614  ;;  %v1268_v12 = vadd.f32 %v2873_v58, %v3700_v47 }
 0x141   : > { %v3806_v36 = vpop.f32.mrf.mxu0  ;;  %v3808_v42 = vpop.f32.mrf.mxu1 }
 0x142   : > { %4404 = vst [vmem:[#allocation22_spill] sm:$0xff] %v3806_v36 }
 0x143   : > { %v3812_v6 = vpop.f32.mrf.mxu0  ;;  %v3814_v3 = vpop.f32.mrf.mxu1 }
 0x144   : > { %4405 = vst [vmem:[#allocation23_spill] sm:$0xff] %v3812_v6  ;;  %4406 = vst [vmem:[#allocation24_spill] sm:$0xff] %v3814_v3  ;;  %v1265_v6 = vadd.f32 %v2870_v33, %v3696_v41  ;;  %v2867_v3 = vadd.f32 %v3728_v17, %v3726_v15  ;;  %v3845_v41 = vand.u32 127, %v2098_v19  ;;  %v2882_v33 = vadd.f32 %v2881_v50, %v2880_v46  ;;  %v3857_v17 = vpop.permute.xlu1 %1619 }
 0x145   : > { %v3818_v8 = vpop.f32.mrf.mxu0  ;;  %v3820_v62 = vpop.f32.mrf.mxu1  ;;  %v1725_v50 = vmul.f32 %v1580_v16, %v1268_v12 }
 0x146   : > { %4407 = vst [vmem:[#allocation25_spill] sm:$0xff] %v3818_v8  ;;  %v1257_v8 = vadd.f32 %v2864_v54, %v3688_v29  ;;  %v3854_v54 = vld [vmem:[%s4382_s4] ss:$0 sm:$0xff]  ;;  %v1260_v15 = vadd.f32 %v2867_v3, %v3692_v35  ;;  %vm2100_vm0 = vcmp.lt.s32.totalorder %v3845_v41, 8 }
 0x147   : > { %v3824_v36 = vpop.f32.mrf.mxu0  ;;  %v3826_v44 = vpop.f32.mrf.mxu1 }
 0x148   : > { %4408 = vst [vmem:[#allocation26_spill] sm:$0xff] %v3824_v36  ;;  %v1724_v36 = vmul.f32 %v1575_v0, %v1265_v6  ;;  %v1722_v47 = vmul.f32 %v1565_v57, %v1257_v8  ;;  %v3865_v0 = vpop.permute.xlu0 %1624  ;;  %v1723_v16 = vmul.f32 %v3772_v5, %v1260_v15 }
 0x149   : > { %v3831_v20 = vpop.f32.mrf.mxu0  ;;  %v3833_v22 = vpop.f32.mrf.mxu1 }
 0x14a   : > { %4410 = vst [vmem:[#allocation28_spill] sm:$0xff] %v3831_v20  ;;  %v2876_v20 = vadd.f32 %v3738_v34, %v3736_v32  ;;  %v1281_v32 = vadd.f32 %v2882_v33, %v3712_v1  ;;  %v2885_v34 = vadd.f32 %v3758_v56, %v3754_v52  ;;  %v2894_v56 = vadd.f32 %v3784_v21, %v3780_v14 }
 0x14b   : > { %v3841_v25 = vpop.f32.mrf.mxu0  ;;  %v3843_v27 = vpop.f32.mrf.mxu1 }
 0x14c   : > { %v1273_v35 = vadd.f32 %v2876_v20, %v3704_v53  ;;  %v1728_v20 = vmul.f32 %v1595_v60, %v1281_v32  ;;  %v3893_v21 = vpop.permute.xlu0 %1634 }
 0x14d   : > { %v3849_v11 = vpop.f32.mrf.mxu1  ;;  %v3000_v29 = vpop.f32.mrf.mxu0 }
 0x14e   : > { %v1941_v58 = vadd.f32 %v3000_v29, %v1724_v36  ;;  %v2879_v36 = vadd.f32 %v3744_v43, %v3742_v39  ;;  %v3884_v39 = vpop.permute.xlu1 %1629  ;;  %v1284_v43 = vadd.f32 %v2885_v34, %v3716_v7  ;;  %v1726_v14 = vmul.f32 %v3786_v24, %v1273_v35 }
 0x14f   : > { %v3859_v19 = vpop.f32.mrf.mxu1  ;;  %v1932_v46 = vpop.f32.mrf.mxu0 }
 0x150   : > { %v1933_v6 = vadd.f32 %v1932_v46, %v1722_v47  ;;  %v2068_v8 = vadd.f32 %v3854_v54, %v1941_v58  ;;  %v1276_v29 = vadd.f32 %v2879_v36, %v3708_v59  ;;  %v2888_v47 = vadd.f32 %v3766_v63, %v3762_v61 }
 0x151   : > { %v3871_v57 = vpop.f32.mrf.mxu1  ;;  %v3001_v3 = vpop.f32.mrf.mxu0  ;;  %v1297_v59 = vadd.f32 %v2894_v56, %v3732_v23  ;;  %v2897_v61 = vadd.f32 %v3794_v38, %v3790_v31  ;;  %v1729_v34 = vmul.f32 %v3810_v30, %v1284_v43  ;;  %v2891_v38 = vadd.f32 %v3776_v9, %v3770_v4 }
 0x152   : > { %v1944_v12 = vadd.f32 %v3001_v3, %v1725_v50  ;;  %v3876_v1 = vsel %vm2100_vm0, %v2068_v8, -1e+30  ;;  %v2066_v52 = vadd.f32 %v3854_v54, %v1933_v6  ;;  %v1289_v35 = vadd.f32 %v2888_v47, %v3724_v13  ;;  %v3915_v31 = vpop.permute.xlu1 %1639  ;;  %v3929_v43 = vpop.permute.xlu0 %1644 }
 0x153   : > { %v3881_v33 = vpop.f32.mrf.mxu1  ;;  %2137 = vmax.xlane.f32.xlu0 %v3876_v1  ;;  %v1935_v53 = vpop.f32.mrf.mxu0  ;;  %v1727_v30 = vmul.f32 %v3796_v40, %v1276_v29  ;;  %v2906_v13 = vadd.f32 %v3826_v44, %v3820_v62  ;;  %v2794_v44 = vadd.f32 %v3750_v49, %v3748_v45  ;;  %v2900_v62 = vadd.f32 %v3804_v48, %v3800_v2 }
 0x154   : > { %v1936_v5 = vadd.f32 %v1935_v53, %v1723_v16  ;;  %v3897_v50 = vsel %vm2100_vm0, %v2066_v52, -1e+30  ;;  %v2069_v60 = vadd.f32 %v3854_v54, %v1944_v12  ;;  %v1300_v12 = vadd.f32 %v2897_v61, %v3734_v28 }
 0x155   : > { %v3890_v15 = vpop.f32.mrf.mxu1  ;;  %v3004_v58 = vpop.f32.mrf.mxu0  ;;  %v1732_v53 = vmul.f32 %v3838_v10, %v1297_v59  ;;  %v1292_v29 = vadd.f32 %v2891_v38, %v3730_v18  ;;  %v1313_v45 = vadd.f32 %v2906_v13, %v2794_v44  ;;  %v2909_v48 = vadd.f32 %v3843_v27, %v3833_v22  ;;  %v4415_v44 = vld [vmem:[#allocation11_spill] sm:$0xff] }
 0x156   : > { %v1957_v46 = vadd.f32 %v3004_v58, %v1728_v20  ;;  %v2067_v7 = vadd.f32 %v3854_v54, %v1936_v5  ;;  %v3922_v16 = vsel %vm2100_vm0, %v2069_v60, -1e+30  ;;  %v1730_v20 = vmul.f32 %v3816_v26, %v1289_v35 }
 0x157   : > { %v2917_v63 = vpop.f32.mrf.mxu1  ;;  %v1948_v32 = vpop.f32.mrf.mxu0  ;;  %2133 = vmax.xlane.f32.xlu0 %v3897_v50  ;;  %v1733_v18 = vmul.f32 %v3857_v17, %v1300_v12  ;;  %v2797_v59 = vadd.f32 %v3756_v55, %v3752_v51  ;;  %v1305_v22 = vadd.f32 %v2900_v62, %v3740_v37 }
 0x158   : > { %v1949_v24 = vadd.f32 %v1948_v32, %v1726_v14  ;;  %v3908_v6 = vsel %vm2100_vm0, %v2067_v7, -1e+30  ;;  %v2072_v8 = vadd.f32 %v3854_v54, %v1957_v46  ;;  %v3956_v46 = vpop.permute.xlu1 %1649  ;;  %v1655_v32 = vpop.permute.xlu0 %1654  ;;  %v2918_v51 = vadd.f32 %v2917_v63, %v3890_v15 }
 0x159   : > { %v3912_v36 = vpop.f32.mrf.mxu1  ;;  %v3005_v23 = vpop.f32.mrf.mxu0  ;;  %2135 = vmax.xlane.f32.xlu1 %v3908_v6  ;;  %v1316_v38 = vadd.f32 %v2909_v48, %v2797_v59  ;;  %v2912_v15 = vadd.f32 %v3859_v19, %v3849_v11 }
 0x15a   : > { %v1960_v3 = vadd.f32 %v3005_v23, %v1729_v34  ;;  %v3933_v9 = vsel %vm2100_vm0, %v2072_v8, -1e+30  ;;  %v2070_v28 = vadd.f32 %v3854_v54, %v1949_v24  ;;  %v4411_v24 = vld [vmem:[#allocation24_spill] sm:$0xff]  ;;  %v4412_v8 = vld [vmem:[#allocation27_spill] sm:$0xff] }
 0x15b   : > { %v2920_v52 = vpop.f32.mrf.mxu1  ;;  %v1951_v56 = vpop.f32.mrf.mxu0  ;;  %2139 = vmax.xlane.f32.xlu0 %v3922_v16  ;;  %v2903_v17 = vadd.f32 %v4411_v24, %v3808_v42  ;;  %v1731_v35 = vmul.f32 %v4412_v8, %v1292_v29 }
 0x15c   : > { %v1952_v4 = vadd.f32 %v1951_v56, %v1727_v30  ;;  %v2073_v40 = vadd.f32 %v3854_v54, %v1960_v3  ;;  %v3961_v7 = vsel %vm2100_vm0, %v2070_v28, -1e+30  ;;  %v1736_v3 = vmul.f32 %v3893_v21, %v1313_v45  ;;  %v4413_v56 = vld [vmem:[#allocation16_spill] sm:$0xff]  ;;  %v1660_v28 = vpop.permute.xlu1 %1659 }
 0x15d   : > { %v3941_v5 = vpop.f32.mrf.mxu1  ;;  %v3008_v10 = vpop.f32.mrf.mxu0  ;;  %2145 = vmax.xlane.f32.xlu1 %v3933_v9  ;;  %v1734_v21 = vmul.f32 %v3865_v0, %v1305_v22  ;;  %v1308_v62 = vadd.f32 %v2903_v17, %v4415_v44  ;;  %v2921_v19 = vadd.f32 %v2920_v52, %v3912_v36  ;;  %v4418_v22 = vld [vmem:[#allocation18_spill] sm:$0xff] }
 0x15e   : > { %v1973_v47 = vadd.f32 %v3008_v10, %v1732_v53  ;;  %v3948_v58 = vsel %vm2100_vm0, %v2073_v40, -1e+30  ;;  %v2071_v14 = vadd.f32 %v3854_v54, %v1952_v4  ;;  %v4414_v53 = vld [vmem:[#allocation17_spill] sm:$0xff]  ;;  %v4004_v0 = vpop.permute.xlu0 %1664 }
 0x15f   : > { %v3953_v2 = vpop.f32.mrf.mxu1  ;;  %v1964_v49 = vpop.f32.mrf.mxu0  ;;  %2147 = vmax.xlane.f32.xlu0 %v3948_v58  ;;  %v2806_v4 = vadd.f32 %v4414_v53, %v4413_v56 }
 0x160   : > { %v1965_v26 = vadd.f32 %v1964_v49, %v1730_v20  ;;  %v2076_v60 = vadd.f32 %v3854_v54, %v1973_v47  ;;  %v3975_v23 = vsel %vm2100_vm0, %v2071_v14, -1e+30  ;;  %v4416_v47 = vld [vmem:[#allocation12_spill] sm:$0xff]  ;;  %v4417_v14 = vld [vmem:[#allocation13_spill] sm:$0xff]  ;;  %v4025_v53 = vpop.permute.xlu1 %1669 }
 0x161   : > { %v3967_v27 = vpop.f32.mrf.mxu1  ;;  %v3009_v61 = vpop.f32.mrf.mxu0  ;;  %2141 = vmax.xlane.f32.xlu1 %v3961_v7  ;;  %v2800_v45 = vadd.f32 %v4417_v14, %v4416_v47  ;;  %v1329_v11 = vadd.f32 %v2918_v51, %v2806_v4  ;;  %v4421_v51 = vld [vmem:[#allocation15_spill] sm:$0xff] }
 0x162   : > { %v1976_v34 = vadd.f32 %v3009_v61, %v1733_v18  ;;  %v3984_v42 = vsel %vm2100_vm0, %v2076_v60, -1e+30  ;;  %v2074_v13 = vadd.f32 %v3854_v54, %v1965_v26  ;;  %v1737_v18 = vmul.f32 %v3915_v31, %v1316_v38  ;;  %v4419_v61 = vld [vmem:[#allocation19_spill] sm:$0xff]  ;;  %v4420_v38 = vld [vmem:[#allocation14_spill] sm:$0xff] }
 0x163   : > { %v3978_v37 = vpop.f32.mrf.mxu1  ;;  %v1967_v55 = vpop.f32.mrf.mxu0  ;;  %2143 = vmax.xlane.f32.xlu0 %v3975_v23  ;;  %v2809_v24 = vadd.f32 %v4419_v61, %v4418_v22  ;;  %v1321_v17 = vadd.f32 %v2912_v15, %v2800_v45  ;;  %v1735_v31 = vmul.f32 %v3884_v39, %v1308_v62  ;;  %v1740_v56 = vmul.f32 %v1655_v32, %v1329_v11  ;;  %v4422_v15 = vld [vmem:[#allocation25_spill] sm:$0xff]  ;;  %v4424_v11 = vld [vmem:[#allocation20_spill] sm:$0xff] }
 0x164   : > { %v1968_v30 = vadd.f32 %v1967_v55, %v1731_v35  ;;  %v2077_v12 = vadd.f32 %v3854_v54, %v1976_v34  ;;  %v4009_v60 = vsel %vm2100_vm0, %v2074_v13, -1e+30  ;;  %v2915_v34 = vadd.f32 %v3881_v33, %v3871_v57  ;;  %v4426_v61 = vld [vmem:[#allocation28_spill] sm:$0xff] }
 0x165   : > { %v2928_v63 = vpop.f32.mrf.mxu1  ;;  %v3012_v40 = vpop.f32.mrf.mxu0  ;;  %2153 = vmax.xlane.f32.xlu1 %v3984_v42  ;;  %v2803_v55 = vadd.f32 %v4421_v51, %v4420_v38  ;;  %v1738_v32 = vmul.f32 %v3929_v43, %v1321_v17  ;;  %v4427_v51 = vld [vmem:[#allocation22_spill] sm:$0xff] }
 0x166   : > { %v1989_v10 = vadd.f32 %v3012_v40, %v1736_v3  ;;  %v3997_v20 = vsel %vm2100_vm0, %v2077_v12, -1e+30  ;;  %v2075_v29 = vadd.f32 %v3854_v54, %v1968_v30  ;;  %v1332_v3 = vadd.f32 %v2921_v19, %v2809_v24  ;;  %v4423_v40 = vld [vmem:[#allocation26_spill] sm:$0xff]  ;;  %v4425_v19 = vld [vmem:[#allocation21_spill] sm:$0xff] }
 0x167   : > { %v2929_v48 = vpop.f32.mrf.mxu1  ;;  %v1980_v49 = vpop.f32.mrf.mxu0  ;;  %2155 = vmax.xlane.f32.xlu0 %v3997_v20  ;;  %v2821_v24 = vadd.f32 %v3841_v25, %v4426_v61 }
 0x168   : > { %v1981_v26 = vadd.f32 %v1980_v49, %v1734_v21  ;;  %v2080_v59 = vadd.f32 %v3854_v54, %v1989_v10  ;;  %v4020_v35 = vsel %vm2100_vm0, %v2075_v29, -1e+30  ;;  %v2930_v30 = vadd.f32 %v2929_v48, %v2928_v63  ;;  %v1675_v10 = vpop.permute.xlu0 %1674 }
 0x169   : > { %v2931_v36 = vpop.f32.mrf.mxu1  ;;  %v3013_v52 = vpop.f32.mrf.mxu0  ;;  %2149 = vmax.xlane.f32.xlu1 %v4009_v60  ;;  %v2818_v21 = vadd.f32 %v4423_v40, %v4422_v15  ;;  %v2924_v63 = vadd.f32 %v3953_v2, %v3941_v5  ;;  %v1324_v29 = vadd.f32 %v2915_v34, %v2803_v55  ;;  %v2812_v48 = vadd.f32 %v4425_v19, %v4424_v11  ;;  %v4428_v55 = vld [vmem:[#allocation23_spill] sm:$0xff] }
 0x16a   : > { %v1992_v8 = vadd.f32 %v3013_v52, %v1737_v18  ;;  %v4029_v33 = vsel %vm2100_vm0, %v2080_v59, -1e+30  ;;  %v2078_v4 = vadd.f32 %v3854_v54, %v1981_v26  ;;  %v1741_v43 = vmul.f32 %v1660_v28, %v1332_v3 }
 0x16b   : > { %v2932_v12 = vpop.f32.mrf.mxu1  ;;  %v1983_v13 = vpop.f32.mrf.mxu0  ;;  %2151 = vmax.xlane.f32.xlu0 %v4020_v35  ;;  %v1345_v49 = vadd.f32 %v2930_v30, %v2818_v21  ;;  %v1337_v17 = vadd.f32 %v2924_v63, %v2812_v48  ;;  %v1739_v28 = vmul.f32 %v3956_v46, %v1324_v29  ;;  %v2815_v3 = vadd.f32 %v4428_v55, %v4427_v51  ;;  %v4429_v48 = vld [vmem:[#allocation3_spill] sm:$0xff] }
 0x16c   : > { %v1984_v57 = vadd.f32 %v1983_v13, %v1735_v31  ;;  %v2081_v39 = vadd.f32 %v3854_v54, %v1992_v8  ;;  %v2933_v5 = vadd.f32 %v2932_v12, %v2931_v36  ;;  %v4049_v59 = vsel %vm2100_vm0, %v2078_v4, -1e+30  ;;  %v1680_v36 = vpop.permute.xlu1 %1679 }
 0x16d   : > { %v2934_v44 = vpop.f32.mrf.mxu1  ;;  %v3016_v62 = vpop.f32.mrf.mxu0  ;;  %2161 = vmax.xlane.f32.xlu1 %v4029_v33  ;;  %v2927_v8 = vadd.f32 %v3978_v37, %v3967_v27  ;;  %v1744_v13 = vmul.f32 %v1675_v10, %v1345_v49  ;;  %v1742_v40 = vmul.f32 %v4004_v0, %v1337_v17 }
 0x16e   : > { %v2005_v47 = vadd.f32 %v3016_v62, %v1740_v56  ;;  %v4041_v14 = vsel %vm2100_vm0, %v2081_v39, -1e+30  ;;  %v2079_v45 = vadd.f32 %v3854_v54, %v1984_v57  ;;  %v1348_v25 = vadd.f32 %v2933_v5, %v2821_v24  ;;  %v1685_v56 = vpop.permute.xlu0 %1684 }
 0x16f   : > { %v2935_v2 = vpop.f32.mrf.mxu1  ;;  %v1996_v26 = vpop.f32.mrf.mxu0  ;;  %2163 = vmax.xlane.f32.xlu0 %v4041_v14  ;;  %v1340_v21 = vadd.f32 %v2927_v8, %v2815_v3 }
 0x170   : > { %v1997_v18 = vadd.f32 %v1996_v26, %v1738_v32  ;;  %v2084_v22 = vadd.f32 %v3854_v54, %v2005_v47  ;;  %v4060_v38 = vsel %vm2100_vm0, %v2079_v45, -1e+30  ;;  %v2936_v39 = vadd.f32 %v2935_v2, %v2934_v44  ;;  %v1690_v44 = vpop.permute.xlu1 %1689 }
 0x171   : > { %v2937_v52 = vpop.f32.mrf.mxu1  ;;  %v3017_v34 = vpop.f32.mrf.mxu0  ;;  %2157 = vmax.xlane.f32.xlu1 %v4049_v59  ;;  %v1745_v47 = vmul.f32 %v1680_v36, %v1348_v25  ;;  %v1743_v24 = vmul.f32 %v4025_v53, %v1340_v21  ;;  %v4431_v53 = vld [vmem:[#allocation4_spill] sm:$0xff] }
 0x172   : > { %v2008_v31 = vadd.f32 %v3017_v34, %v1741_v43  ;;  %v4067_v27 = vsel %vm2100_vm0, %v2084_v22, -1e+30  ;;  %v2082_v37 = vadd.f32 %v3854_v54, %v1997_v18  ;;  %v1353_v49 = vadd.f32 %v2936_v39, %v4429_v48  ;;  %v1695_v18 = vpop.permute.xlu0 %1694  ;;  %v4430_v43 = vld [vmem:[#allocation5_spill] sm:$0xff] }
 0x173   : > { %v2938_v30 = vpop.f32.mrf.mxu1  ;;  %v1999_v12 = vpop.f32.mrf.mxu0  ;;  %2159 = vmax.xlane.f32.xlu0 %v4060_v38 }
 0x174   : > { %v2000_v57 = vadd.f32 %v1999_v12, %v1739_v28  ;;  %v2085_v46 = vadd.f32 %v3854_v54, %v2008_v31  ;;  %v4081_v19 = vsel %vm2100_vm0, %v2082_v37, -1e+30  ;;  %v2939_v5 = vadd.f32 %v2938_v30, %v2937_v52 }
 0x175   : > { %v2940_v4 = vpop.f32.mrf.mxu1  ;;  %v3020_v15 = vpop.f32.mrf.mxu0  ;;  %2169 = vmax.xlane.f32.xlu1 %v4067_v27  ;;  %v1746_v12 = vmul.f32 %v1685_v56, %v1353_v49 }
 0x176   : > { %v2021_v63 = vadd.f32 %v3020_v15, %v1744_v13  ;;  %v4075_v62 = vsel %vm2100_vm0, %v2085_v46, -1e+30  ;;  %v2083_v32 = vadd.f32 %v3854_v54, %v2000_v57  ;;  %v1356_v3 = vadd.f32 %v2939_v5, %v4431_v53  ;;  %v1700_v13 = vpop.permute.xlu1 %1699  ;;  %v4432_v57 = vld [vmem:[#allocation6_spill] sm:$0xff] }
 0x177   : > { %v2941_v10 = vpop.f32.mrf.mxu1  ;;  %v2012_v29 = vpop.f32.mrf.mxu0  ;;  %2171 = vmax.xlane.f32.xlu0 %v4075_v62 }
 0x178   : > { %v2942_v45 = vadd.f32 %v2941_v10, %v2940_v4  ;;  %v2013_v11 = vadd.f32 %v2012_v29, %v1742_v40  ;;  %v2088_v0 = vadd.f32 %v3854_v54, %v2021_v63  ;;  %v4090_v17 = vsel %vm2100_vm0, %v2083_v32, -1e+30 }
 0x179   : > { %v2943_v2 = vpop.f32.mrf.mxu1  ;;  %v3021_v26 = vpop.f32.mrf.mxu0  ;;  %2165 = vmax.xlane.f32.xlu1 %v4081_v19  ;;  %v1747_v48 = vmul.f32 %v1690_v44, %v1356_v3 }
 0x17a   : > { %v1361_v22 = vadd.f32 %v2942_v45, %v4430_v43  ;;  %v2024_v61 = vadd.f32 %v3021_v26, %v1745_v47  ;;  %v4095_v52 = vsel %vm2100_vm0, %v2088_v0, -1e+30  ;;  %v2086_v8 = vadd.f32 %v3854_v54, %v2013_v11  ;;  %v4433_v45 = vld [vmem:[#allocation7_spill] sm:$0xff]  ;;  %v1710_v3 = vpop.permute.xlu1 %1709 }
 0x17b   : > { %v2944_v34 = vpop.f32.mrf.mxu1  ;;  %v2015_v36 = vpop.f32.mrf.mxu0  ;;  %2167 = vmax.xlane.f32.xlu0 %v4090_v17 }
 0x17c   : > { %v2945_v31 = vadd.f32 %v2944_v34, %v2943_v2  ;;  %v2016_v28 = vadd.f32 %v2015_v36, %v1743_v24  ;;  %v1748_v51 = vmul.f32 %v1695_v18, %v1361_v22  ;;  %v2089_v55 = vadd.f32 %v3854_v54, %v2024_v61  ;;  %v1705_v18 = vpop.permute.xlu0 %1704  ;;  %v4434_v36 = vld [vmem:[#allocation8_spill] sm:$0xff] }
 0x17d   : > { %v2946_v25 = vpop.f32.mrf.mxu1  ;;  %v3024_v30 = vpop.f32.mrf.mxu0  ;;  %2177 = vmax.xlane.f32.xlu1 %v4095_v52  ;;  %v4110_v56 = vsel %vm2100_vm0, %v2086_v8, -1e+30 }
 0x17e   : > { %v1364_v46 = vadd.f32 %v2945_v31, %v4432_v57  ;;  %v2037_v37 = vadd.f32 %v3024_v30, %v1748_v51  ;;  %v4104_v39 = vsel %vm2100_vm0, %v2089_v55, -1e+30  ;;  %v2087_v4 = vadd.f32 %v3854_v54, %v2016_v28 }
 0x17f   : > { %v2947_v15 = vpop.f32.mrf.mxu1  ;;  %v2028_v40 = vpop.f32.mrf.mxu0  ;;  %2179 = vmax.xlane.f32.xlu0 %v4104_v39 }
 0x180   : > { %v2948_v21 = vadd.f32 %v2947_v15, %v2946_v25  ;;  %v2029_v63 = vadd.f32 %v2028_v40, %v1746_v12  ;;  %v1749_v32 = vmul.f32 %v1700_v13, %v1364_v46  ;;  %v2092_v47 = vadd.f32 %v3854_v54, %v2037_v37  ;;  %v1715_v46 = vpop.permute.xlu0 %1714  ;;  %v4435_v37 = vld [vmem:[#allocation9_spill] sm:$0xff] }
 0x181   : > { %v2949_v10 = vpop.f32.mrf.mxu1  ;;  %v3025_v29 = vpop.f32.mrf.mxu0  ;;  %2173 = vmax.xlane.f32.xlu1 %v4110_v56  ;;  %v4117_v49 = vsel %vm2100_vm0, %v2087_v4, -1e+30 }
 0x182   : > { %v1369_v11 = vadd.f32 %v2948_v21, %v4433_v45  ;;  %v2040_v0 = vadd.f32 %v3025_v29, %v1749_v32  ;;  %v2090_v26 = vadd.f32 %v3854_v54, %v2029_v63  ;;  %v4123_v61 = vsel %vm2100_vm0, %v2092_v47, -1e+30 }
 0x183   : > { %v2950_v5 = vpop.f32.mrf.mxu1  ;;  %v2031_v2 = vpop.f32.mrf.mxu0  ;;  %2175 = vmax.xlane.f32.xlu0 %v4117_v49 }
 0x184   : > { %v2951_v43 = vadd.f32 %v2950_v5, %v2949_v10  ;;  %v2032_v22 = vadd.f32 %v2031_v2, %v1747_v48  ;;  %v2093_v24 = vadd.f32 %v3854_v54, %v2040_v0  ;;  %v1750_v31 = vmul.f32 %v1705_v18, %v1369_v11  ;;  %v4436_v11 = vld [vmem:[#allocation10_spill] sm:$0xff]  ;;  %v1720_v2 = vpop.permute.xlu1 %1719 }
 0x185   : > { %v2952_v44 = vpop.f32.mrf.mxu1  ;;  %v3028_v34 = vpop.f32.mrf.mxu0  ;;  %2185 = vmax.xlane.f32.xlu1 %v4123_v61  ;;  %v4136_v12 = vsel %vm2100_vm0, %v2090_v26, -1e+30 }
 0x186   : > { %v1372_v8 = vadd.f32 %v2951_v43, %v4434_v36  ;;  %v4130_v28 = vsel %vm2100_vm0, %v2093_v24, -1e+30  ;;  %v2091_v51 = vadd.f32 %v3854_v54, %v2032_v22 }
 0x187   : > { %v2953_v55 = vpop.f32.mrf.mxu1  ;;  %v2044_v53 = vpop.f32.mrf.mxu0  ;;  %2187 = vmax.xlane.f32.xlu0 %v4130_v28 }
 0x188   : > { %v2954_v25 = vadd.f32 %v2953_v55, %v2952_v44  ;;  %v2045_v30 = vadd.f32 %v2044_v53, %v1750_v31  ;;  %v1751_v15 = vmul.f32 %v1710_v3, %v1372_v8  ;;  %v4142_v40 = vsel %vm2100_vm0, %v2091_v51, -1e+30 }
 0x189   : > { %v2955_v13 = vpop.f32.mrf.mxu1  ;;  %v3029_v57 = vpop.f32.mrf.mxu0  ;;  %2181 = vmax.xlane.f32.xlu1 %v4136_v12 }
 0x18a   : > { %v1377_v4 = vadd.f32 %v2954_v25, %v4435_v37  ;;  %v2094_v21 = vadd.f32 %v3854_v54, %v2045_v30 }
 0x18b   : > { %v2956_v63 = vpop.f32.mrf.mxu1  ;;  %v2047_v32 = vpop.f32.mrf.mxu0  ;;  %2183 = vmax.xlane.f32.xlu0 %v4142_v40 }
 0x18c   : > { %v1752_v10 = vmul.f32 %v1715_v46, %v1377_v4  ;;  %v2957_v29 = vadd.f32 %v2956_v63, %v2955_v13  ;;  %v2048_v47 = vadd.f32 %v2047_v32, %v1751_v15  ;;  %v4148_v45 = vsel %vm2100_vm0, %v2094_v21, -1e+30 }
 0x18d   : > { %2189 = vmax.xlane.f32.xlu1 %v4148_v45 }
 0x18e   : > { %v1380_v0 = vadd.f32 %v2957_v29, %v4436_v11  ;;  %v2095_v48 = vadd.f32 %v3854_v54, %v2048_v47  ;;  %v2053_v5 = vadd.f32 %v3028_v34, %v1752_v10 }
 0x190   : > { %v1753_v26 = vmul.f32 %v1720_v2, %v1380_v0  ;;  %v4155_v18 = vsel %vm2100_vm0, %v2095_v48, -1e+30  ;;  %v2096_v43 = vadd.f32 %v3854_v54, %v2053_v5 }
 0x191   : > { %2191 = vmax.xlane.f32.xlu0 %v4155_v18 }
 0x192   : > { %v4161_v22 = vsel %vm2100_vm0, %v2096_v43, -1e+30  ;;  %v2056_v24 = vadd.f32 %v3029_v57, %v1753_v26 }
 0x193   : > { %2193 = vmax.xlane.f32.xlu1 %v4161_v22 }
 0x194   : > { %v2097_v44 = vadd.f32 %v3854_v54, %v2056_v24 }
 0x196   : > { %v4167_v34 = vsel %vm2100_vm0, %v2097_v44, -1e+30 }
 0x197   : > { %2195 = vmax.xlane.f32.xlu0 %v4167_v34 }
 0x1dc   : > { %v2138_v36 = vpop.xlane.xlu0 %2137 }
 0x1dd   : > { %v4171_v8 = vsub.f32 %v3876_v1, %v2138_v36 }
 0x1df   : > { %v2233_v31 = vmul.f32 1.442695, %v4171_v8 }
 0x1e0   : > { %v2134_v51 = vpop.xlane.xlu0 %2133 }
 0x1e1   : > { %3225 = vpow2.f32 %v2233_v31  ;;  %v4175_v55 = vsub.f32 %v3897_v50, %v2134_v51 }
 0x1e2   : > { %v2136_v53 = vpop.xlane.xlu1 %2135 }
 0x1e3   : > { %v2229_v54 = vmul.f32 1.442695, %v4175_v55  ;;  %v4179_v41 = vsub.f32 %v3908_v6, %v2136_v53 }
 0x1e4   : > { %v2140_v3 = vpop.xlane.xlu0 %2139 }
 0x1e5   : > { %3227 = vpow2.f32 %v2229_v54  ;;  %v4182_v25 = vsub.f32 %v3922_v16, %v2140_v3  ;;  %v2231_v50 = vmul.f32 1.442695, %v4179_v41 }
 0x1e6   : > { %v2146_v1 = vpop.xlane.xlu1 %2145 }
 0x1e7   : > { %v2235_v30 = vmul.f32 1.442695, %v4182_v25  ;;  %v4186_v13 = vsub.f32 %v3933_v9, %v2146_v1 }
 0x1e8   : > { %v2148_v57 = vpop.xlane.xlu0 %2147 }
 0x1e9   : > { %3229 = vpow2.f32 %v2235_v30  ;;  %v2241_v46 = vmul.f32 1.442695, %v4186_v13  ;;  %v4191_v37 = vsub.f32 %v3948_v58, %v2148_v57 }
 0x1ea   : > { %v2142_v6 = vpop.xlane.xlu1 %2141 }
 0x1eb   : > { %3231 = vpow2.f32 %v2241_v46  ;;  %v4194_v16 = vsub.f32 %v3961_v7, %v2142_v6  ;;  %v2243_v15 = vmul.f32 1.442695, %v4191_v37 }
 0x1ec   : > { %v2144_v4 = vpop.xlane.xlu0 %2143  ;;  %3233 = vpow2.f32 %v2231_v50 }
 0x1ed   : > { %v2237_v9 = vmul.f32 1.442695, %v4194_v16  ;;  %v4199_v21 = vsub.f32 %v3975_v23, %v2144_v4 }
 0x1ee   : > { %v3226_v63 = vpop.eup %3225  ;;  %v2154_v32 = vpop.xlane.xlu1 %2153 }
 0x1ef   : > { %3235 = vpow2.f32 %v2237_v9  ;;  %v4202_v58 = vsub.f32 %v3984_v42, %v2154_v32  ;;  %2297 = vadd.xlane.f32.xlu1 %v3226_v63  ;;  %v2239_v7 = vmul.f32 1.442695, %v4199_v21 }
 0x1f0   : > { %v2156_v10 = vpop.xlane.xlu0 %2155  ;;  %3237 = vpow2.f32 %v2243_v15 }
 0x1f1   : > { %v2249_v29 = vmul.f32 1.442695, %v4202_v58  ;;  %v4207_v47 = vsub.f32 %v3997_v20, %v2156_v10 }
 0x1f2   : > { %v3228_v11 = vpop.eup %3227  ;;  %v2150_v0 = vpop.xlane.xlu1 %2149 }
 0x1f3   : > { %3239 = vpow2.f32 %v2249_v29  ;;  %v4210_v23 = vsub.f32 %v4009_v60, %v2150_v0  ;;  %2293 = vadd.xlane.f32.xlu1 %v3228_v11  ;;  %v2251_v42 = vmul.f32 1.442695, %v4207_v47 }
 0x1f4   : > { %v2152_v48 = vpop.xlane.xlu0 %2151  ;;  %3241 = vpow2.f32 %v2239_v7 }
 0x1f5   : > { %v2245_v5 = vmul.f32 1.442695, %v4210_v23  ;;  %v4215_v2 = vsub.f32 %v4020_v35, %v2152_v48 }
 0x1f6   : > { %v3230_v26 = vpop.eup %3229  ;;  %v2162_v43 = vpop.xlane.xlu1 %2161 }
 0x1f7   : > { %3243 = vpow2.f32 %v2245_v5  ;;  %v4218_v20 = vsub.f32 %v4029_v33, %v2162_v43  ;;  %2299 = vadd.xlane.f32.xlu0 %v3230_v26  ;;  %v2247_v44 = vmul.f32 1.442695, %v4215_v2 }
 0x1f8   : > { %v3232_v24 = vpop.eup %3231  ;;  %v2164_v60 = vpop.xlane.xlu0 %2163  ;;  %3245 = vpow2.f32 %v2251_v42 }
 0x1f9   : > { %v2257_v36 = vmul.f32 1.442695, %v4218_v20  ;;  %v4223_v31 = vsub.f32 %v4041_v14, %v2164_v60  ;;  %2305 = vadd.xlane.f32.xlu1 %v3232_v24  ;;  %v3234_v35 = vpop.eup %3233 }
 0x1fa   : > { %v2158_v51 = vpop.xlane.xlu1 %2157 }
 0x1fb   : > { %3247 = vpow2.f32 %v2257_v36  ;;  %v4226_v53 = vsub.f32 %v4049_v59, %v2158_v51  ;;  %2295 = vadd.xlane.f32.xlu0 %v3234_v35  ;;  %v2259_v3 = vmul.f32 1.442695, %v4223_v31 }
 0x1fc   : > { %v3236_v33 = vpop.eup %3235  ;;  %v2160_v54 = vpop.xlane.xlu0 %2159  ;;  %3249 = vpow2.f32 %v2247_v44 }
 0x1fd   : > { %v2253_v1 = vmul.f32 1.442695, %v4226_v53  ;;  %v4231_v30 = vsub.f32 %v4060_v38, %v2160_v54  ;;  %2301 = vadd.xlane.f32.xlu1 %v3236_v33  ;;  %v3238_v14 = vpop.eup %3237 }
 0x1fe   : > { %v2170_v57 = vpop.xlane.xlu1 %2169 }
 0x1ff   : > { %3251 = vpow2.f32 %v2253_v1  ;;  %v4234_v50 = vsub.f32 %v4067_v27, %v2170_v57  ;;  %2307 = vadd.xlane.f32.xlu0 %v3238_v14  ;;  %v2255_v6 = vmul.f32 1.442695, %v4231_v30 }
 0x200   : > { %v3240_v59 = vpop.eup %3239  ;;  %v2172_v46 = vpop.xlane.xlu0 %2171  ;;  %3253 = vpow2.f32 %v2259_v3 }
 0x201   : > { %v2265_v4 = vmul.f32 1.442695, %v4234_v50  ;;  %v4239_v15 = vsub.f32 %v4075_v62, %v2172_v46  ;;  %2313 = vadd.xlane.f32.xlu1 %v3240_v59  ;;  %v3242_v38 = vpop.eup %3241 }
 0x202   : > { %v2166_v9 = vpop.xlane.xlu1 %2165 }
 0x203   : > { %3255 = vpow2.f32 %v2265_v4  ;;  %v4242_v63 = vsub.f32 %v4081_v19, %v2166_v9  ;;  %2303 = vadd.xlane.f32.xlu0 %v3242_v38  ;;  %v2267_v10 = vmul.f32 1.442695, %v4239_v15 }
 0x204   : > { %v3244_v27 = vpop.eup %3243  ;;  %v2168_v32 = vpop.xlane.xlu0 %2167  ;;  %3257 = vpow2.f32 %v2255_v6 }
 0x205   : > { %v2261_v7 = vmul.f32 1.442695, %v4242_v63  ;;  %v4247_v29 = vsub.f32 %v4090_v17, %v2168_v32  ;;  %2309 = vadd.xlane.f32.xlu1 %v3244_v27  ;;  %v3246_v62 = vpop.eup %3245 }
 0x206   : > { %v2178_v11 = vpop.xlane.xlu1 %2177 }
 0x207   : > { %3259 = vpow2.f32 %v2261_v7  ;;  %v4250_v0 = vsub.f32 %v4095_v52, %v2178_v11  ;;  %2315 = vadd.xlane.f32.xlu0 %v3246_v62  ;;  %v2263_v42 = vmul.f32 1.442695, %v4247_v29 }
 0x208   : > { %v3248_v19 = vpop.eup %3247  ;;  %v2180_v48 = vpop.xlane.xlu0 %2179  ;;  %3261 = vpow2.f32 %v2267_v10 }
 0x209   : > { %v2273_v5 = vmul.f32 1.442695, %v4250_v0  ;;  %v4255_v26 = vsub.f32 %v4104_v39, %v2180_v48  ;;  %2321 = vadd.xlane.f32.xlu1 %v3248_v19  ;;  %v3250_v17 = vpop.eup %3249 }
 0x20a   : > { %v2174_v43 = vpop.xlane.xlu1 %2173 }
 0x20b   : > { %3263 = vpow2.f32 %v2273_v5  ;;  %v4258_v24 = vsub.f32 %v4110_v56, %v2174_v43  ;;  %2311 = vadd.xlane.f32.xlu0 %v3250_v17  ;;  %v2275_v44 = vmul.f32 1.442695, %v4255_v26 }
 0x20c   : > { %v3252_v52 = vpop.eup %3251  ;;  %v2176_v60 = vpop.xlane.xlu0 %2175  ;;  %3265 = vpow2.f32 %v2263_v42 }
 0x20d   : > { %v2269_v36 = vmul.f32 1.442695, %v4258_v24  ;;  %v4263_v35 = vsub.f32 %v4117_v49, %v2176_v60  ;;  %2317 = vadd.xlane.f32.xlu1 %v3252_v52  ;;  %v3254_v39 = vpop.eup %3253 }
 0x20e   : > { %v2186_v51 = vpop.xlane.xlu1 %2185 }
 0x20f   : > { %3267 = vpow2.f32 %v2269_v36  ;;  %v4266_v33 = vsub.f32 %v4123_v61, %v2186_v51  ;;  %2323 = vadd.xlane.f32.xlu0 %v3254_v39  ;;  %v2271_v3 = vmul.f32 1.442695, %v4263_v35 }
 0x210   : > { %v3256_v56 = vpop.eup %3255  ;;  %v2188_v54 = vpop.xlane.xlu0 %2187  ;;  %3269 = vpow2.f32 %v2275_v44 }
 0x211   : > { %v2281_v1 = vmul.f32 1.442695, %v4266_v33  ;;  %v4271_v14 = vsub.f32 %v4130_v28, %v2188_v54  ;;  %2329 = vadd.xlane.f32.xlu1 %v3256_v56  ;;  %v3258_v49 = vpop.eup %3257 }
 0x212   : > { %v2182_v57 = vpop.xlane.xlu1 %2181 }
 0x213   : > { %3271 = vpow2.f32 %v2281_v1  ;;  %v4274_v59 = vsub.f32 %v4136_v12, %v2182_v57  ;;  %2319 = vadd.xlane.f32.xlu0 %v3258_v49  ;;  %v2283_v6 = vmul.f32 1.442695, %v4271_v14 }
 0x214   : > { %v3260_v61 = vpop.eup %3259  ;;  %v2184_v46 = vpop.xlane.xlu0 %2183  ;;  %3273 = vpow2.f32 %v2271_v3 }
 0x215   : > { %v2277_v4 = vmul.f32 1.442695, %v4274_v59  ;;  %v4279_v38 = vsub.f32 %v4142_v40, %v2184_v46  ;;  %2325 = vadd.xlane.f32.xlu1 %v3260_v61  ;;  %v3262_v28 = vpop.eup %3261 }
 0x216   : > { %v2190_v9 = vpop.xlane.xlu1 %2189 }
 0x217   : > { %3275 = vpow2.f32 %v2277_v4  ;;  %v4282_v27 = vsub.f32 %v4148_v45, %v2190_v9  ;;  %2331 = vadd.xlane.f32.xlu0 %v3262_v28  ;;  %v2279_v32 = vmul.f32 1.442695, %v4279_v38 }
 0x218   : > { %v3264_v12 = vpop.eup %3263  ;;  %3277 = vpow2.f32 %v2283_v6 }
 0x219   : > { %v2285_v10 = vmul.f32 1.442695, %v4282_v27  ;;  %2337 = vadd.xlane.f32.xlu1 %v3264_v12  ;;  %v3266_v7 = vpop.eup %3265 }
 0x21a   : > { %v2192_v62 = vpop.xlane.xlu0 %2191 }
 0x21b   : > { %3279 = vpow2.f32 %v2285_v10  ;;  %v4287_v40 = vsub.f32 %v4155_v18, %v2192_v62  ;;  %2327 = vadd.xlane.f32.xlu0 %v3266_v7 }
 0x21c   : > { %v3268_v11 = vpop.eup %3267  ;;  %v2194_v19 = vpop.xlane.xlu1 %2193  ;;  %3281 = vpow2.f32 %v2279_v32 }
 0x21d   : > { %v2287_v45 = vmul.f32 1.442695, %v4287_v40  ;;  %v4291_v48 = vsub.f32 %v4161_v22, %v2194_v19  ;;  %2333 = vadd.xlane.f32.xlu1 %v3268_v11  ;;  %v3270_v42 = vpop.eup %3269 }
 0x21f   : > { %v2289_v5 = vmul.f32 1.442695, %v4291_v48  ;;  %2339 = vadd.xlane.f32.xlu0 %v3270_v42  ;;  %3283 = vpow2.f32 %v2287_v45 }
 0x220   : > { %v3272_v17 = vpop.eup %3271  ;;  %v2196_v43 = vpop.xlane.xlu0 %2195 }
 0x221   : > { %3285 = vpow2.f32 %v2289_v5  ;;  %v4295_v18 = vsub.f32 %v4167_v34, %v2196_v43  ;;  %2345 = vadd.xlane.f32.xlu1 %v3272_v17  ;;  %v3274_v52 = vpop.eup %3273 }
 0x223   : > { %v2291_v60 = vmul.f32 1.442695, %v4295_v18  ;;  %2335 = vadd.xlane.f32.xlu0 %v3274_v52 }
 0x224   : > { %v3276_v44 = vpop.eup %3275 }
 0x225   : > { %3287 = vpow2.f32 %v2291_v60  ;;  %2341 = vadd.xlane.f32.xlu1 %v3276_v44  ;;  %v3278_v22 = vpop.eup %3277 }
 0x227   : > { %2347 = vadd.xlane.f32.xlu0 %v3278_v22 }
 0x228   : > { %v3280_v36 = vpop.eup %3279 }
 0x229   : > { %2349 = vadd.xlane.f32.xlu1 %v3280_v36  ;;  %v3282_v39 = vpop.eup %3281 }
 0x22b   : > { %2343 = vadd.xlane.f32.xlu0 %v3282_v39 }
 0x22c   : > { %v3284_v51 = vpop.eup %3283 }
 0x22e   : > { %v3286_v56 = vpop.eup %3285 }
 0x22f   : > { %2353 = vadd.xlane.f32.xlu1 %v3286_v56  ;;  %2351 = vadd.xlane.f32.xlu0 %v3284_v51 }
 0x232   : > { %v3288_v34 = vpop.eup %3287 }
 0x233   : > { %2355 = vadd.xlane.f32.xlu0 %v3288_v34 }
 0x278   : > { %v2298_v54 = vpop.xlane.xlu1 %2297 }
 0x279   : > { %3289 = vlog2.f32 %v2298_v54 }
 0x27c   : > { %v2294_v3 = vpop.xlane.xlu1 %2293 }
 0x27d   : > { %3291 = vlog2.f32 %v2294_v3 }
 0x280   : > { %v2300_v1 = vpop.xlane.xlu0 %2299 }
 0x281   : > { %3293 = vlog2.f32 %v2300_v1 }
 0x282   : > { %v2306_v49 = vpop.xlane.xlu1 %2305 }
 0x283   : > { %3295 = vlog2.f32 %v2306_v49 }
 0x284   : > { %v2296_v57 = vpop.xlane.xlu0 %2295 }
 0x285   : > { %3297 = vlog2.f32 %v2296_v57 }
 0x286   : > { %v3290_v61 = vpop.eup %3289  ;;  %v2302_v46 = vpop.xlane.xlu1 %2301 }
 0x287   : > { %v2362_v6 = vmul.f32 0.6931472, %v3290_v61  ;;  %3299 = vlog2.f32 %v2302_v46 }
 0x288   : > { %v2308_v4 = vpop.xlane.xlu0 %2307 }
 0x289   : > { %v2423_v28 = vsub.f32 %v4171_v8, %v2362_v6  ;;  %3301 = vlog2.f32 %v2308_v4 }
 0x28a   : > { %v3292_v9 = vpop.eup %3291  ;;  %v2314_v12 = vpop.xlane.xlu1 %2313 }
 0x28b   : > { %2455 = vst [vmem:[%s4303_s20 + $0x10] sm:$0xff] %v2423_v28  ;;  %v2358_v32 = vmul.f32 0.6931472, %v3292_v9  ;;  %3303 = vlog2.f32 %v2314_v12 }
 0x28c   : > { %v2304_v10 = vpop.xlane.xlu0 %2303 }
 0x28d   : > { %v2421_v7 = vsub.f32 %v4175_v55, %v2358_v32  ;;  %3305 = vlog2.f32 %v2304_v10 }
 0x28e   : > { %v3294_v62 = vpop.eup %3293  ;;  %v2310_v11 = vpop.xlane.xlu1 %2309 }
 0x28f   : > { %2453 = vst [vmem:[%s4303_s20] sm:$0xff] %v2421_v7  ;;  %v2364_v19 = vmul.f32 0.6931472, %v3294_v62  ;;  %3307 = vlog2.f32 %v2310_v11 }
 0x290   : > { %v3296_v45 = vpop.eup %3295  ;;  %v2316_v42 = vpop.xlane.xlu0 %2315 }
 0x291   : > { %v2424_v8 = vsub.f32 %v4182_v25, %v2364_v19  ;;  %v2370_v5 = vmul.f32 0.6931472, %v3296_v45  ;;  %3309 = vlog2.f32 %v2316_v42 }
 0x292   : > { %v3298_v17 = vpop.eup %3297  ;;  %v2322_v43 = vpop.xlane.xlu1 %2321 }
 0x293   : > { %2456 = vst [vmem:[%s4303_s20 + $0x18] sm:$0xff] %v2424_v8  ;;  %v2427_v52 = vsub.f32 %v4186_v13, %v2370_v5  ;;  %v2360_v55 = vmul.f32 0.6931472, %v3298_v17  ;;  %3311 = vlog2.f32 %v2322_v43 }
 0x294   : > { %v3300_v60 = vpop.eup %3299  ;;  %v2312_v44 = vpop.xlane.xlu0 %2311 }
 0x295   : > { %2459 = vst [vmem:[%s4303_s20 + $0x30] sm:$0xff] %v2427_v52  ;;  %v2422_v22 = vsub.f32 %v4179_v41, %v2360_v55  ;;  %v2366_v36 = vmul.f32 0.6931472, %v3300_v60  ;;  %3313 = vlog2.f32 %v2312_v44 }
 0x296   : > { %v3302_v25 = vpop.eup %3301  ;;  %v2318_v39 = vpop.xlane.xlu1 %2317 }
 0x297   : > { %2454 = vst [vmem:[%s4303_s20 + $0x8] sm:$0xff] %v2422_v22  ;;  %v2425_v51 = vsub.f32 %v4194_v16, %v2366_v36  ;;  %v2372_v56 = vmul.f32 0.6931472, %v3302_v25  ;;  %3315 = vlog2.f32 %v2318_v39 }
 0x298   : > { %v3304_v13 = vpop.eup %3303  ;;  %v2324_v34 = vpop.xlane.xlu0 %2323 }
 0x299   : > { %2457 = vst [vmem:[%s4303_s20 + $0x20] sm:$0xff] %v2425_v51  ;;  %v2428_v54 = vsub.f32 %v4191_v37, %v2372_v56  ;;  %v2378_v3 = vmul.f32 0.6931472, %v3304_v13  ;;  %3317 = vlog2.f32 %v2324_v34 }
 0x29a   : > { %v3306_v41 = vpop.eup %3305  ;;  %v2330_v1 = vpop.xlane.xlu1 %2329 }
 0x29b   : > { %2460 = vst [vmem:[%s4303_s20 + $0x38] sm:$0xff] %v2428_v54  ;;  %v2431_v49 = vsub.f32 %v4202_v58, %v2378_v3  ;;  %v2368_v57 = vmul.f32 0.6931472, %v3306_v41  ;;  %3319 = vlog2.f32 %v2330_v1 }
 0x29c   : > { %v3308_v16 = vpop.eup %3307  ;;  %v2320_v61 = vpop.xlane.xlu0 %2319 }
 0x29d   : > { %2463 = vst [vmem:[%s4303_s20 + $0x50] sm:$0xff] %v2431_v49  ;;  %v2426_v46 = vsub.f32 %v4199_v21, %v2368_v57  ;;  %v2374_v6 = vmul.f32 0.6931472, %v3308_v16  ;;  %3321 = vlog2.f32 %v2320_v61 }
 0x29e   : > { %v3310_v37 = vpop.eup %3309  ;;  %v2326_v4 = vpop.xlane.xlu1 %2325 }
 0x29f   : > { %2458 = vst [vmem:[%s4303_s20 + $0x28] sm:$0xff] %v2426_v46  ;;  %v2429_v28 = vsub.f32 %v4210_v23, %v2374_v6  ;;  %v2380_v9 = vmul.f32 0.6931472, %v3310_v37  ;;  %3323 = vlog2.f32 %v2326_v4 }
 0x2a0   : > { %v3312_v58 = vpop.eup %3311  ;;  %v2332_v12 = vpop.xlane.xlu0 %2331 }
 0x2a1   : > { %2461 = vst [vmem:[%s4303_s20 + $0x40] sm:$0xff] %v2429_v28  ;;  %v2432_v32 = vsub.f32 %v4207_v47, %v2380_v9  ;;  %v2386_v10 = vmul.f32 0.6931472, %v3312_v58  ;;  %3325 = vlog2.f32 %v2332_v12 }
 0x2a2   : > { %v3314_v21 = vpop.eup %3313  ;;  %v2338_v7 = vpop.xlane.xlu1 %2337 }
 0x2a3   : > { %2464 = vst [vmem:[%s4303_s20 + $0x58] sm:$0xff] %v2432_v32  ;;  %v2435_v62 = vsub.f32 %v4218_v20, %v2386_v10  ;;  %v2376_v11 = vmul.f32 0.6931472, %v3314_v21  ;;  %3327 = vlog2.f32 %v2338_v7 }
 0x2a4   : > { %v3316_v23 = vpop.eup %3315  ;;  %v2328_v19 = vpop.xlane.xlu0 %2327 }
 0x2a5   : > { %2467 = vst [vmem:[%s4303_s20 + $0x70] sm:$0xff] %v2435_v62  ;;  %v2430_v45 = vsub.f32 %v4215_v2, %v2376_v11  ;;  %v2382_v42 = vmul.f32 0.6931472, %v3316_v23  ;;  %3329 = vlog2.f32 %v2328_v19 }
 0x2a6   : > { %v3318_v47 = vpop.eup %3317  ;;  %v2334_v8 = vpop.xlane.xlu1 %2333 }
 0x2a7   : > { %2462 = vst [vmem:[%s4303_s20 + $0x48] sm:$0xff] %v2430_v45  ;;  %v2433_v5 = vsub.f32 %v4226_v53, %v2382_v42  ;;  %v2388_v17 = vmul.f32 0.6931472, %v3318_v47  ;;  %3331 = vlog2.f32 %v2334_v8 }
 0x2a8   : > { %v3320_v20 = vpop.eup %3319  ;;  %v2340_v43 = vpop.xlane.xlu0 %2339 }
 0x2a9   : > { %2465 = vst [vmem:[%s4303_s20 + $0x60] sm:$0xff] %v2433_v5  ;;  %v2436_v52 = vsub.f32 %v4223_v31, %v2388_v17  ;;  %v2394_v55 = vmul.f32 0.6931472, %v3320_v20  ;;  %3333 = vlog2.f32 %v2340_v43 }
 0x2aa   : > { %v3322_v2 = vpop.eup %3321  ;;  %v2346_v60 = vpop.xlane.xlu1 %2345 }
 0x2ab   : > { %2468 = vst [vmem:[%s4303_s20 + $0x78] sm:$0xff] %v2436_v52  ;;  %v2439_v44 = vsub.f32 %v4234_v50, %v2394_v55  ;;  %v2384_v22 = vmul.f32 0.6931472, %v3322_v2  ;;  %3335 = vlog2.f32 %v2346_v60 }
 0x2ac   : > { %v3324_v53 = vpop.eup %3323  ;;  %v2336_v36 = vpop.xlane.xlu0 %2335 }
 0x2ad   : > { %2471 = vst [vmem:[%s4303_s20 + $0x90] sm:$0xff] %v2439_v44  ;;  %v2434_v25 = vsub.f32 %v4231_v30, %v2384_v22  ;;  %v2390_v39 = vmul.f32 0.6931472, %v3324_v53  ;;  %3337 = vlog2.f32 %v2336_v36 }
 0x2ae   : > { %v3326_v31 = vpop.eup %3325  ;;  %v2342_v51 = vpop.xlane.xlu1 %2341 }
 0x2af   : > { %2466 = vst [vmem:[%s4303_s20 + $0x68] sm:$0xff] %v2434_v25  ;;  %v2437_v56 = vsub.f32 %v4242_v63, %v2390_v39  ;;  %v2396_v13 = vmul.f32 0.6931472, %v3326_v31  ;;  %3339 = vlog2.f32 %v2342_v51 }
 0x2b0   : > { %v3328_v50 = vpop.eup %3327  ;;  %v2348_v34 = vpop.xlane.xlu0 %2347 }
 0x2b1   : > { %2469 = vst [vmem:[%s4303_s20 + $0x80] sm:$0xff] %v2437_v56  ;;  %v2440_v54 = vsub.f32 %v4239_v15, %v2396_v13  ;;  %v2402_v3 = vmul.f32 0.6931472, %v3328_v50  ;;  %3341 = vlog2.f32 %v2348_v34 }
 0x2b2   : > { %v3330_v30 = vpop.eup %3329  ;;  %v2350_v41 = vpop.xlane.xlu1 %2349 }
 0x2b3   : > { %2472 = vst [vmem:[%s4303_s20 + $0x98] sm:$0xff] %v2440_v54  ;;  %v2443_v1 = vsub.f32 %v4250_v0, %v2402_v3  ;;  %v2392_v49 = vmul.f32 0.6931472, %v3330_v30  ;;  %3343 = vlog2.f32 %v2350_v41 }
 0x2b4   : > { %v3332_v63 = vpop.eup %3331  ;;  %v2344_v57 = vpop.xlane.xlu0 %2343 }
 0x2b5   : > { %2475 = vst [vmem:[%s4303_s20 + $0xb0] sm:$0xff] %v2443_v1  ;;  %v2438_v16 = vsub.f32 %v4247_v29, %v2392_v49  ;;  %v2398_v61 = vmul.f32 0.6931472, %v3332_v63  ;;  %3345 = vlog2.f32 %v2344_v57 }
 0x2b6   : > { %v3334_v15 = vpop.eup %3333 }
 0x2b7   : > { %2470 = vst [vmem:[%s4303_s20 + $0x88] sm:$0xff] %v2438_v16  ;;  %v2441_v46 = vsub.f32 %v4258_v24, %v2398_v61  ;;  %v2404_v6 = vmul.f32 0.6931472, %v3334_v15 }
 0x2b8   : > { %v3336_v37 = vpop.eup %3335  ;;  %v2354_v4 = vpop.xlane.xlu1 %2353 }
 0x2b9   : > { %v2352_v0 = vpop.xlane.xlu0 %2351  ;;  %2473 = vst [vmem:[%s4303_s20 + $0xa0] sm:$0xff] %v2441_v46  ;;  %v2444_v28 = vsub.f32 %v4255_v26, %v2404_v6  ;;  %v2410_v9 = vmul.f32 0.6931472, %v3336_v37  ;;  %3347 = vlog2.f32 %v2354_v4 }
 0x2ba   : > { %v3338_v58 = vpop.eup %3337  ;;  %3349 = vlog2.f32 %v2352_v0 }
 0x2bb   : > { %2476 = vst [vmem:[%s4303_s20 + $0xb8] sm:$0xff] %v2444_v28  ;;  %v2447_v29 = vsub.f32 %v4266_v33, %v2410_v9  ;;  %v2400_v12 = vmul.f32 0.6931472, %v3338_v58 }
 0x2bc   : > { %v3340_v24 = vpop.eup %3339 }
 0x2bd   : > { %v2356_v32 = vpop.xlane.xlu0 %2355  ;;  %2479 = vst [vmem:[%s4303_s20 + $0xd0] sm:$0xff] %v2447_v29  ;;  %v2442_v10 = vsub.f32 %v4263_v35, %v2400_v12  ;;  %v2406_v21 = vmul.f32 0.6931472, %v3340_v24 }
 0x2be   : > { %3351 = vlog2.f32 %v2356_v32  ;;  %v3342_v7 = vpop.eup %3341 }
 0x2bf   : > { %2474 = vst [vmem:[%s4303_s20 + $0xa8] sm:$0xff] %v2442_v10  ;;  %v2445_v26 = vsub.f32 %v4274_v59, %v2406_v21  ;;  %v2412_v62 = vmul.f32 0.6931472, %v3342_v7 }
 0x2c0   : > { %v3344_v11 = vpop.eup %3343 }
 0x2c1   : > { %2477 = vst [vmem:[%s4303_s20 + $0xc0] sm:$0xff] %v2445_v26  ;;  %v2448_v33 = vsub.f32 %v4271_v14, %v2412_v62  ;;  %v2414_v23 = vmul.f32 0.6931472, %v3344_v11 }
 0x2c2   : > { %v3346_v19 = vpop.eup %3345 }
 0x2c3   : > { %2480 = vst [vmem:[%s4303_s20 + $0xd8] sm:$0xff] %v2448_v33  ;;  %v2449_v45 = vsub.f32 %v4282_v27, %v2414_v23  ;;  %v2408_v35 = vmul.f32 0.6931472, %v3346_v19 }
 0x2c5   : > { %2481 = vst [vmem:[%s4303_s20 + $0xe0] sm:$0xff] %v2449_v45  ;;  %v2446_v42 = vsub.f32 %v4279_v38, %v2408_v35 }
 0x2c6   : > { %v3348_v47 = vpop.eup %3347 }
 0x2c7   : > { %v3350_v8 = vpop.eup %3349  ;;  %2478 = vst [vmem:[%s4303_s20 + $0xc8] sm:$0xff] %v2446_v42  ;;  %v2418_v59 = vmul.f32 0.6931472, %v3348_v47 }
 0x2c8   : > { %v2416_v5 = vmul.f32 0.6931472, %v3350_v8 }
 0x2c9   : > { %v2451_v17 = vsub.f32 %v4291_v48, %v2418_v59 }
 0x2ca   : > { %v2450_v20 = vsub.f32 %v4287_v40, %v2416_v5 }
 0x2cb   : > { %v3352_v14 = vpop.eup %3351  ;;  %2483 = vst [vmem:[%s4303_s20 + $0xf0] sm:$0xff] %v2451_v17 }
 0x2cc   : > { %v2420_v43 = vmul.f32 0.6931472, %v3352_v14  ;;  %2482 = vst [vmem:[%s4303_s20 + $0xe8] sm:$0xff] %v2450_v20 }
 0x2ce   : > { %v2452_v27 = vsub.f32 %v4295_v18, %v2420_v43 }
 0x2d0   : > { %2484 = vst [vmem:[%s4303_s20 + $0xf8] sm:$0xff] %v2452_v27 }
 0x2d1 PF: > { %s16_s23 = sadd.s32 1, %s3375_s23   ;;  %s4437_s21 = smov %s3371_s22 }
 0x2d2   : > { %p13_p5 = scmp.ge.s32.totalorder %s16_s23, 4   ;;  %s4438_s22 = smov %s4440_s24 }
 0x2d4   :  { %15 = sbr.rel (!%p13_p5) target bundleno = 2 (0x2), region = 91 }

</bundles_post_ra>
